<compile_context>
chip_gen: v5e
topology: v5e:2x2
jax: 0.10.0
libtpu: 0.0.40
codegen_flags: <defaults>
</compile_context>

<pallas_src>
import jax
import jax.numpy as jnp
import numpy as np
from jax.experimental import pallas as pl
from jax.experimental.pallas import tpu as pltpu

C0_OUT = 16   # PixelwiseNet conv0 out channels
C1_OUT = 8    # PixelwiseNet conv1 out channels
_DCHUNK = 8   # sublane-tile sized depth chunk for the per-voxel MLP


# --------------------------------------------------------------------------
# Fused kernel: similarity + PixelwiseNet view weight + weighted aggregation
# + (last view) softmax / expected depth / confidence / argmax-gather.
# grid = (B, HW//T, Vsrc); Vsrc is the reduction axis ("arbitrary").
# --------------------------------------------------------------------------
def _depthnet_kernel(warped_ref, reffeat_ref, depth_ref,
                     w0_ref, b0_ref, w1_ref, b1_ref, w2_ref, b2_ref,
                     vw_out, prob_out, sdepth_out, wta_out, conf_out,
                     sim_acc, w_acc):
    v = pl.program_id(2)
    nv = pl.num_programs(2)

    reffeat = reffeat_ref[0]              # [C, T]
    C = reffeat.shape[0]
    D = sim_acc.shape[0]

    # similarity = mean over channels of (warped_volume * ref_feature).
    # Slice the warped ref one channel at a time (no [C, D, T] live value);
    # the 1/C mean is a single final multiply.
    acc = warped_ref[0, 0, 0] * reffeat[0:1, :]
    for c in range(1, C):
        acc = acc + warped_ref[0, 0, c] * reffeat[c:c + 1, :]
    sim = acc * (1.0 / C)                 # [D, T]

    # PixelwiseNet: per-voxel MLP 1 -> 16 -> 8 -> 1 (1x1x1 convs, BN folded),
    # ReLU between layers, then sigmoid and max over depth.  Processed in
    # 8-row depth chunks to bound the live vreg working set.
    # SMEM scalar reads hoisted once per grid step.
    w0 = [w0_ref[0, c] for c in range(C0_OUT)]
    b0 = [b0_ref[0, c] for c in range(C0_OUT)]
    w1 = [[w1_ref[j, c] for c in range(C0_OUT)] for j in range(C1_OUT)]
    b1 = [b1_ref[0, j] for j in range(C1_OUT)]
    w2 = [w2_ref[0, j] for j in range(C1_OUT)]

    run_max = None
    for d0 in range(0, D, _DCHUNK):
        d1 = min(d0 + _DCHUNK, D)
        sim_c = sim[d0:d1, :]             # [<=8, T]
        h1 = [None] * C1_OUT
        for c in range(C0_OUT):
            h0c = jnp.maximum(sim_c * w0[c] + b0[c], 0.0)
            for j in range(C1_OUT):
                t = h0c * w1[j][c]
                h1[j] = (t + b1[j]) if c == 0 else (h1[j] + t)
        outc = jnp.maximum(h1[0], 0.0) * w2[0]
        for j in range(1, C1_OUT):
            outc = outc + jnp.maximum(h1[j], 0.0) * w2[j]
        cmax = jnp.max(outc, axis=0, keepdims=True)       # [1, T]
        run_max = cmax if run_max is None else jnp.maximum(run_max, cmax)

    # sigmoid is monotone: max_d sigmoid(x_d + b2) == sigmoid(max_d x_d + b2),
    # so a single [1, T] sigmoid replaces the [D, T] one.
    vw = jax.nn.sigmoid(run_max + b2_ref[0, 0])           # [1, T]

    @pl.when(v == 0)
    def _():
        sim_acc[...] = jnp.zeros_like(sim_acc)
        w_acc[...] = jnp.full_like(w_acc, 1e-5)

    sim_acc[...] += sim * vw
    w_acc[...] += vw
    vw_out[0, 0] = vw

    @pl.when(v == nv - 1)
    def _():
        # weighted aggregation over views (reciprocal -> EUP slot)
        similarity = sim_acc[...] * pl.reciprocal(w_acc[...], approx=False)

        dvals = depth_ref[0]                      # [D, T]

        # softmax over depth (cost regularization treated as identity)
        m = jnp.max(similarity, axis=0, keepdims=True)
        e = jnp.exp(similarity - m)
        s = jnp.sum(e, axis=0, keepdims=True)
        inv_s = pl.reciprocal(s, approx=False)
        prob = e * inv_s
        prob_out[0] = prob

        # depth_wta: soft winner-take-all (expectation over depth hypotheses)
        sdepth_out[0] = jnp.sum(prob * dvals, axis=0, keepdims=True)

        # photometric confidence = max_d prob = exp(0)/s = 1/s (reuses m)
        conf_out[0] = inv_s

        # GoMVS: argmax over depth, gather depth_values.  argmax on the
        # pre-softmax similarity (softmax is monotone), reusing m.
        Dn = similarity.shape[0]
        iota = jax.lax.broadcasted_iota(jnp.int32, similarity.shape, 0)
        idx = jnp.min(jnp.where(similarity >= m, iota, Dn),
                      axis=0, keepdims=True)
        wta_out[0] = jnp.sum(jnp.where(iota == idx, dvals, 0.0),
                             axis=0, keepdims=True)


# --------------------------------------------------------------------------
# Wrapper
# --------------------------------------------------------------------------
def _pick_hw_tile(HW, C, D, vmem_budget_bytes=24 << 20):
    """Largest lane tile (multiple of 128 dividing HW) within a VMEM budget."""
    assert HW % 128 == 0, "HW must be a multiple of 128"
    best = 128
    for t in range(128, HW + 1, 128):
        if HW % t != 0:
            continue
        per_step = 4 * (
            2 * C * D * t              # warped block, double-buffered
            + 2 * C * t + 2 * D * t    # ref_feat + depth_values, double-buffered
            + 2 * (D * t + 4 * t)      # output blocks, double-buffered
            + D * t + t                # VMEM accumulators
            + (3 * D + 12 * _DCHUNK) * t)  # live temporaries headroom
        if per_step <= vmem_budget_bytes:
            best = t
    return best


def depthnet_stage(warped, ref_feat, depth_values, params):
    B, Vs, C, D, HW = warped.shape
    f32 = jnp.float32
    T = _pick_hw_tile(HW, C, D)
    nt = HW // T
    smem = pl.BlockSpec(memory_space=pltpu.MemorySpace.SMEM)

    view_weights, prob, sdepth, wta, conf = pl.pallas_call(
        _depthnet_kernel,
        out_shape=(jax.ShapeDtypeStruct((B, Vs, 1, HW), f32),
                   jax.ShapeDtypeStruct((B, D, HW), f32),
                   jax.ShapeDtypeStruct((B, 1, HW), f32),
                   jax.ShapeDtypeStruct((B, 1, HW), f32),
                   jax.ShapeDtypeStruct((B, 1, HW), f32)),
        grid_spec=pltpu.PrefetchScalarGridSpec(
            num_scalar_prefetch=0,
            grid=(B, nt, Vs),
            in_specs=[
                pl.BlockSpec((1, 1, C, D, T), lambda b, t, v: (b, v, 0, 0, t)),
                pl.BlockSpec((1, C, T), lambda b, t, v: (b, 0, t)),
                pl.BlockSpec((1, D, T), lambda b, t, v: (b, 0, t)),
                smem, smem, smem, smem, smem, smem,
            ],
            out_specs=[
                pl.BlockSpec((1, 1, 1, T), lambda b, t, v: (b, v, 0, t)),
                pl.BlockSpec((1, D, T), lambda b, t, v: (b, 0, t)),
                pl.BlockSpec((1, 1, T), lambda b, t, v: (b, 0, t)),
                pl.BlockSpec((1, 1, T), lambda b, t, v: (b, 0, t)),
                pl.BlockSpec((1, 1, T), lambda b, t, v: (b, 0, t)),
            ],
            scratch_shapes=[pltpu.VMEM((D, T), f32),
                            pltpu.VMEM((1, T), f32)],
        ),
        compiler_params=pltpu.CompilerParams(
            dimension_semantics=("parallel", "parallel", "arbitrary"),
            vmem_limit_bytes=32 << 20),
    )(warped, ref_feat, depth_values,
      params['w0'], params['b0'], params['w1'], params['b1'],
      params['w2'], params['b2'])

    return view_weights, prob, sdepth, wta, conf


# --------------------------------------------------------------------------
# Deterministic parameter init (PixelwiseNet), eval-mode BatchNorm folded.
# --------------------------------------------------------------------------
def init_params(key):
    ks = jax.random.split(key, 12)
    conv0_w = jax.random.normal(ks[0], (16, 1), jnp.float32) * 0.5
    bn0_g = 1.0 + 0.1 * jax.random.normal(ks[1], (16,), jnp.float32)
    bn0_b = 0.05 * jax.random.normal(ks[2], (16,), jnp.float32)
    bn0_m = 0.1 * jax.random.normal(ks[3], (16,), jnp.float32)
    bn0_v = 1.0 + 0.1 * jnp.abs(jax.random.normal(ks[4], (16,), jnp.float32))

    conv1_w = jax.random.normal(ks[5], (8, 16), jnp.float32) * 0.3
    bn1_g = 1.0 + 0.1 * jax.random.normal(ks[6], (8,), jnp.float32)
    bn1_b = 0.05 * jax.random.normal(ks[7], (8,), jnp.float32)
    bn1_m = 0.1 * jax.random.normal(ks[8], (8,), jnp.float32)
    bn1_v = 1.0 + 0.1 * jnp.abs(jax.random.normal(ks[9], (8,), jnp.float32))

    conv2_w = jax.random.normal(ks[10], (1, 8), jnp.float32) * 0.3
    conv2_b = 0.05 * jax.random.normal(ks[11], (1,), jnp.float32)

    eps = 1e-5
    s0 = bn0_g / jnp.sqrt(bn0_v + eps)
    s1 = bn1_g / jnp.sqrt(bn1_v + eps)
    return dict(
        w0=(conv0_w[:, 0] * s0).reshape(1, 16),
        b0=(bn0_b - bn0_m * s0).reshape(1, 16),
        w1=conv1_w * s1[:, None],
        b1=(bn1_b - bn1_m * s1).reshape(1, 8),
        w2=conv2_w.reshape(1, 8),
        b2=conv2_b.reshape(1, 1),
    )


# Pure-JAX reference of the same math, for correctness checking.
def ref_forward(warped, ref_feat, depth_values, p):
    sim_v = jnp.mean(warped * ref_feat[:, None, :, None, :], axis=2)  # [B,Vs,D,HW]
    x = sim_v[..., None]
    h0 = jax.nn.relu(x * p['w0'][0] + p['b0'][0])
    h1 = jax.nn.relu(jnp.einsum('bvdnc,jc->bvdnj', h0, p['w1'],
                                precision='highest') + p['b1'][0])
    h2 = jnp.einsum('bvdnj,j->bvdn', h1, p['w2'][0],
                    precision='highest') + p['b2'][0, 0]
    vw = jnp.max(jax.nn.sigmoid(h2), axis=2, keepdims=True)           # [B,Vs,1,HW]
    similarity = jnp.sum(sim_v * vw, axis=1) / (1e-5 + jnp.sum(vw, axis=1))
    prob = jax.nn.softmax(similarity, axis=1)
    sdepth = jnp.sum(prob * depth_values, axis=1, keepdims=True)
    conf = jnp.max(prob, axis=1, keepdims=True)
    idx = jnp.argmax(prob, axis=1)
    wta = jnp.take_along_axis(depth_values, idx[:, None, :], axis=1)
    return vw, prob, sdepth, wta, conf


if __name__ == "__main__":
    B, Vsrc, C, D, H, W = 2, 2, 4, 8, 16, 16
    HW = H * W
    key = jax.random.PRNGKey(0)
    k1, k2, k3, kp = jax.random.split(key, 4)

    # Stand-ins for FeatureNet ref-view output and homo_warping'd src volumes.
    ref_feat = jax.random.normal(k1, (B, C, HW), jnp.float32)
    warped = jax.random.normal(k2, (B, Vsrc, C, D, HW), jnp.float32)
    base = jnp.linspace(425.0, 935.0, D, dtype=jnp.float32)
    depth_values = base[None, :, None] + 0.5 * jax.random.normal(
        k3, (B, D, HW), jnp.float32)

    params = init_params(kp)

    vw, prob, sdepth, wta, conf = jax.block_until_ready(
        depthnet_stage(warped, ref_feat, depth_values, params))

    r_vw, r_prob, r_sd, r_wta, r_conf = ref_forward(
        warped, ref_feat, depth_values, params)
    np.testing.assert_allclose(np.asarray(vw), np.asarray(r_vw),
                               rtol=2e-4, atol=2e-4)
    np.testing.assert_allclose(np.asarray(prob), np.asarray(r_prob),
                               rtol=2e-4, atol=2e-4)
    np.testing.assert_allclose(np.asarray(sdepth), np.asarray(r_sd),
                               rtol=2e-4, atol=1e-2)
    np.testing.assert_allclose(np.asarray(wta), np.asarray(r_wta),
                               rtol=2e-4, atol=1e-2)
    np.testing.assert_allclose(np.asarray(conf), np.asarray(r_conf),
                               rtol=2e-4, atol=2e-4)

    outputs = {
        'depth': wta.reshape(B, H, W),                       # argmax-gathered
        'similarity_depth': sdepth.reshape(B, H, W),         # soft-WTA depth
        'photometric_confidence': conf.reshape(B, H, W),
        'prob_volume': prob.reshape(B, D, H, W),
        'depth_values': depth_values.reshape(B, D, H, W),
        'view_weights': vw.reshape(B, Vsrc, H, W),
    }
    _ = jax.tree_util.tree_map(lambda a: a.shape, outputs)
    print("KERNEL_OK")
</pallas_src>

<mosaic_0001>
module attributes {stable_mosaic.version = 11 : i64} {
  func.func @_depthnet_kernel(%arg0: i32, %arg1: i32, %arg2: i32, %arg3: memref<1x1x4x8x256xf32, #tpu.memory_space<vmem>>, %arg4: memref<1x4x256xf32, #tpu.memory_space<vmem>>, %arg5: memref<1x8x256xf32, #tpu.memory_space<vmem>>, %arg6: memref<1x16xf32, #tpu.memory_space<smem>>, %arg7: memref<1x16xf32, #tpu.memory_space<smem>>, %arg8: memref<8x16xf32, #tpu.memory_space<smem>>, %arg9: memref<1x8xf32, #tpu.memory_space<smem>>, %arg10: memref<1x8xf32, #tpu.memory_space<smem>>, %arg11: memref<1x1xf32, #tpu.memory_space<smem>>, %arg12: memref<1x1x1x256xf32, #tpu.memory_space<vmem>>, %arg13: memref<1x8x256xf32, #tpu.memory_space<vmem>>, %arg14: memref<1x1x256xf32, #tpu.memory_space<vmem>>, %arg15: memref<1x1x256xf32, #tpu.memory_space<vmem>>, %arg16: memref<1x1x256xf32, #tpu.memory_space<vmem>>, %arg17: memref<8x256xf32, #tpu.memory_space<vmem>>, %arg18: memref<1x256xf32, #tpu.memory_space<vmem>>) attributes {dimension_semantics = [#tpu.dimension_semantics<parallel>, #tpu.dimension_semantics<parallel>, #tpu.dimension_semantics<arbitrary>], iteration_bounds = array<i64: 2, 1, 2>, scalar_prefetch = 0 : i64, scratch_operands = 2 : i64, tpu.core_type = #tpu.core_type<tc>, window_params = [{transform_indices = @transform_0, window_bounds = array<i64: 1, 1, 4, 8, 256>}, {transform_indices = @transform_1, window_bounds = array<i64: 1, 4, 256>}, {transform_indices = @transform_2, window_bounds = array<i64: 1, 8, 256>}, {transform_indices = @transform_3, window_bounds = array<i64: 1, 16>}, {transform_indices = @transform_4, window_bounds = array<i64: 1, 16>}, {transform_indices = @transform_5, window_bounds = array<i64: 8, 16>}, {transform_indices = @transform_6, window_bounds = array<i64: 1, 8>}, {transform_indices = @transform_7, window_bounds = array<i64: 1, 8>}, {transform_indices = @transform_8, window_bounds = array<i64: 1, 1>}, {transform_indices = @transform_9, window_bounds = array<i64: 1, 1, 1, 256>}, {transform_indices = @transform_10, window_bounds = array<i64: 1, 8, 256>}, {transform_indices = @transform_11, window_bounds = array<i64: 1, 1, 256>}, {transform_indices = @transform_12, window_bounds = array<i64: 1, 1, 256>}, {transform_indices = @transform_13, window_bounds = array<i64: 1, 1, 256>}]} {
    %c0 = arith.constant 0 : index
    %c0_0 = arith.constant 0 : index
    %c0_1 = arith.constant 0 : index
    %0 = vector.load %arg4[%c0, %c0_0, %c0_1] : memref<1x4x256xf32, #tpu.memory_space<vmem>>, vector<1x4x256xf32>
    %1 = vector.shape_cast %0 : vector<1x4x256xf32> to vector<4x256xf32>
    %c0_2 = arith.constant 0 : index
    %c0_3 = arith.constant 0 : index
    %c0_4 = arith.constant 0 : index
    %c0_5 = arith.constant 0 : index
    %c0_6 = arith.constant 0 : index
    %2 = vector.load %arg3[%c0_2, %c0_3, %c0_4, %c0_5, %c0_6] : memref<1x1x4x8x256xf32, #tpu.memory_space<vmem>>, vector<1x1x1x8x256xf32>
    %3 = vector.shape_cast %2 : vector<1x1x1x8x256xf32> to vector<8x256xf32>
    %4 = vector.extract_strided_slice %1 {offsets = [0, 0], sizes = [1, 256], strides = [1, 1]} : vector<4x256xf32> to vector<1x256xf32>
    %5 = vector.broadcast %4 : vector<1x256xf32> to vector<8x256xf32>
    %6 = arith.mulf %3, %5 : vector<8x256xf32>
    %c0_7 = arith.constant 0 : index
    %c0_8 = arith.constant 0 : index
    %c1 = arith.constant 1 : index
    %c0_9 = arith.constant 0 : index
    %c0_10 = arith.constant 0 : index
    %7 = vector.load %arg3[%c0_7, %c0_8, %c1, %c0_9, %c0_10] : memref<1x1x4x8x256xf32, #tpu.memory_space<vmem>>, vector<1x1x1x8x256xf32>
    %8 = vector.shape_cast %7 : vector<1x1x1x8x256xf32> to vector<8x256xf32>
    %9 = vector.extract_strided_slice %1 {offsets = [1, 0], sizes = [1, 256], strides = [1, 1]} : vector<4x256xf32> to vector<1x256xf32>
    %10 = vector.broadcast %9 : vector<1x256xf32> to vector<8x256xf32>
    %11 = arith.mulf %8, %10 : vector<8x256xf32>
    %12 = arith.addf %6, %11 : vector<8x256xf32>
    %c0_11 = arith.constant 0 : index
    %c0_12 = arith.constant 0 : index
    %c2 = arith.constant 2 : index
    %c0_13 = arith.constant 0 : index
    %c0_14 = arith.constant 0 : index
    %13 = vector.load %arg3[%c0_11, %c0_12, %c2, %c0_13, %c0_14] : memref<1x1x4x8x256xf32, #tpu.memory_space<vmem>>, vector<1x1x1x8x256xf32>
    %14 = vector.shape_cast %13 : vector<1x1x1x8x256xf32> to vector<8x256xf32>
    %15 = vector.extract_strided_slice %1 {offsets = [2, 0], sizes = [1, 256], strides = [1, 1]} : vector<4x256xf32> to vector<1x256xf32>
    %16 = vector.broadcast %15 : vector<1x256xf32> to vector<8x256xf32>
    %17 = arith.mulf %14, %16 : vector<8x256xf32>
    %18 = arith.addf %12, %17 : vector<8x256xf32>
    %c0_15 = arith.constant 0 : index
    %c0_16 = arith.constant 0 : index
    %c3 = arith.constant 3 : index
    %c0_17 = arith.constant 0 : index
    %c0_18 = arith.constant 0 : index
    %19 = vector.load %arg3[%c0_15, %c0_16, %c3, %c0_17, %c0_18] : memref<1x1x4x8x256xf32, #tpu.memory_space<vmem>>, vector<1x1x1x8x256xf32>
    %20 = vector.shape_cast %19 : vector<1x1x1x8x256xf32> to vector<8x256xf32>
    %21 = vector.extract_strided_slice %1 {offsets = [3, 0], sizes = [1, 256], strides = [1, 1]} : vector<4x256xf32> to vector<1x256xf32>
    %22 = vector.broadcast %21 : vector<1x256xf32> to vector<8x256xf32>
    %23 = arith.mulf %20, %22 : vector<8x256xf32>
    %24 = arith.addf %18, %23 : vector<8x256xf32>
    %cst = arith.constant 2.500000e-01 : f32
    %25 = vector.broadcast %cst : f32 to vector<8x256xf32>
    %26 = arith.mulf %24, %25 : vector<8x256xf32>
    %c0_19 = arith.constant 0 : index
    %c0_20 = arith.constant 0 : index
    %27 = memref.load %arg6[%c0_19, %c0_20] : memref<1x16xf32, #tpu.memory_space<smem>>
    %c0_21 = arith.constant 0 : index
    %c1_22 = arith.constant 1 : index
    %28 = memref.load %arg6[%c0_21, %c1_22] : memref<1x16xf32, #tpu.memory_space<smem>>
    %c0_23 = arith.constant 0 : index
    %c2_24 = arith.constant 2 : index
    %29 = memref.load %arg6[%c0_23, %c2_24] : memref<1x16xf32, #tpu.memory_space<smem>>
    %c0_25 = arith.constant 0 : index
    %c3_26 = arith.constant 3 : index
    %30 = memref.load %arg6[%c0_25, %c3_26] : memref<1x16xf32, #tpu.memory_space<smem>>
    %c0_27 = arith.constant 0 : index
    %c4 = arith.constant 4 : index
    %31 = memref.load %arg6[%c0_27, %c4] : memref<1x16xf32, #tpu.memory_space<smem>>
    %c0_28 = arith.constant 0 : index
    %c5 = arith.constant 5 : index
    %32 = memref.load %arg6[%c0_28, %c5] : memref<1x16xf32, #tpu.memory_space<smem>>
    %c0_29 = arith.constant 0 : index
    %c6 = arith.constant 6 : index
    %33 = memref.load %arg6[%c0_29, %c6] : memref<1x16xf32, #tpu.memory_space<smem>>
    %c0_30 = arith.constant 0 : index
    %c7 = arith.constant 7 : index
    %34 = memref.load %arg6[%c0_30, %c7] : memref<1x16xf32, #tpu.memory_space<smem>>
    %c0_31 = arith.constant 0 : index
    %c8 = arith.constant 8 : index
    %35 = memref.load %arg6[%c0_31, %c8] : memref<1x16xf32, #tpu.memory_space<smem>>
    %c0_32 = arith.constant 0 : index
    %c9 = arith.constant 9 : index
    %36 = memref.load %arg6[%c0_32, %c9] : memref<1x16xf32, #tpu.memory_space<smem>>
    %c0_33 = arith.constant 0 : index
    %c10 = arith.constant 10 : index
    %37 = memref.load %arg6[%c0_33, %c10] : memref<1x16xf32, #tpu.memory_space<smem>>
    %c0_34 = arith.constant 0 : index
    %c11 = arith.constant 11 : index
    %38 = memref.load %arg6[%c0_34, %c11] : memref<1x16xf32, #tpu.memory_space<smem>>
    %c0_35 = arith.constant 0 : index
    %c12 = arith.constant 12 : index
    %39 = memref.load %arg6[%c0_35, %c12] : memref<1x16xf32, #tpu.memory_space<smem>>
    %c0_36 = arith.constant 0 : index
    %c13 = arith.constant 13 : index
    %40 = memref.load %arg6[%c0_36, %c13] : memref<1x16xf32, #tpu.memory_space<smem>>
    %c0_37 = arith.constant 0 : index
    %c14 = arith.constant 14 : index
    %41 = memref.load %arg6[%c0_37, %c14] : memref<1x16xf32, #tpu.memory_space<smem>>
    %c0_38 = arith.constant 0 : index
    %c15 = arith.constant 15 : index
    %42 = memref.load %arg6[%c0_38, %c15] : memref<1x16xf32, #tpu.memory_space<smem>>
    %c0_39 = arith.constant 0 : index
    %c0_40 = arith.constant 0 : index
    %43 = memref.load %arg7[%c0_39, %c0_40] : memref<1x16xf32, #tpu.memory_space<smem>>
    %c0_41 = arith.constant 0 : index
    %c1_42 = arith.constant 1 : index
    %44 = memref.load %arg7[%c0_41, %c1_42] : memref<1x16xf32, #tpu.memory_space<smem>>
    %c0_43 = arith.constant 0 : index
    %c2_44 = arith.constant 2 : index
    %45 = memref.load %arg7[%c0_43, %c2_44] : memref<1x16xf32, #tpu.memory_space<smem>>
    %c0_45 = arith.constant 0 : index
    %c3_46 = arith.constant 3 : index
    %46 = memref.load %arg7[%c0_45, %c3_46] : memref<1x16xf32, #tpu.memory_space<smem>>
    %c0_47 = arith.constant 0 : index
    %c4_48 = arith.constant 4 : index
    %47 = memref.load %arg7[%c0_47, %c4_48] : memref<1x16xf32, #tpu.memory_space<smem>>
    %c0_49 = arith.constant 0 : index
    %c5_50 = arith.constant 5 : index
    %48 = memref.load %arg7[%c0_49, %c5_50] : memref<1x16xf32, #tpu.memory_space<smem>>
    %c0_51 = arith.constant 0 : index
    %c6_52 = arith.constant 6 : index
    %49 = memref.load %arg7[%c0_51, %c6_52] : memref<1x16xf32, #tpu.memory_space<smem>>
    %c0_53 = arith.constant 0 : index
    %c7_54 = arith.constant 7 : index
    %50 = memref.load %arg7[%c0_53, %c7_54] : memref<1x16xf32, #tpu.memory_space<smem>>
    %c0_55 = arith.constant 0 : index
    %c8_56 = arith.constant 8 : index
    %51 = memref.load %arg7[%c0_55, %c8_56] : memref<1x16xf32, #tpu.memory_space<smem>>
    %c0_57 = arith.constant 0 : index
    %c9_58 = arith.constant 9 : index
    %52 = memref.load %arg7[%c0_57, %c9_58] : memref<1x16xf32, #tpu.memory_space<smem>>
    %c0_59 = arith.constant 0 : index
    %c10_60 = arith.constant 10 : index
    %53 = memref.load %arg7[%c0_59, %c10_60] : memref<1x16xf32, #tpu.memory_space<smem>>
    %c0_61 = arith.constant 0 : index
    %c11_62 = arith.constant 11 : index
    %54 = memref.load %arg7[%c0_61, %c11_62] : memref<1x16xf32, #tpu.memory_space<smem>>
    %c0_63 = arith.constant 0 : index
    %c12_64 = arith.constant 12 : index
    %55 = memref.load %arg7[%c0_63, %c12_64] : memref<1x16xf32, #tpu.memory_space<smem>>
    %c0_65 = arith.constant 0 : index
    %c13_66 = arith.constant 13 : index
    %56 = memref.load %arg7[%c0_65, %c13_66] : memref<1x16xf32, #tpu.memory_space<smem>>
    %c0_67 = arith.constant 0 : index
    %c14_68 = arith.constant 14 : index
    %57 = memref.load %arg7[%c0_67, %c14_68] : memref<1x16xf32, #tpu.memory_space<smem>>
    %c0_69 = arith.constant 0 : index
    %c15_70 = arith.constant 15 : index
    %58 = memref.load %arg7[%c0_69, %c15_70] : memref<1x16xf32, #tpu.memory_space<smem>>
    %c0_71 = arith.constant 0 : index
    %c0_72 = arith.constant 0 : index
    %59 = memref.load %arg8[%c0_71, %c0_72] : memref<8x16xf32, #tpu.memory_space<smem>>
    %c0_73 = arith.constant 0 : index
    %c1_74 = arith.constant 1 : index
    %60 = memref.load %arg8[%c0_73, %c1_74] : memref<8x16xf32, #tpu.memory_space<smem>>
    %c0_75 = arith.constant 0 : index
    %c2_76 = arith.constant 2 : index
    %61 = memref.load %arg8[%c0_75, %c2_76] : memref<8x16xf32, #tpu.memory_space<smem>>
    %c0_77 = arith.constant 0 : index
    %c3_78 = arith.constant 3 : index
    %62 = memref.load %arg8[%c0_77, %c3_78] : memref<8x16xf32, #tpu.memory_space<smem>>
    %c0_79 = arith.constant 0 : index
    %c4_80 = arith.constant 4 : index
    %63 = memref.load %arg8[%c0_79, %c4_80] : memref<8x16xf32, #tpu.memory_space<smem>>
    %c0_81 = arith.constant 0 : index
    %c5_82 = arith.constant 5 : index
    %64 = memref.load %arg8[%c0_81, %c5_82] : memref<8x16xf32, #tpu.memory_space<smem>>
    %c0_83 = arith.constant 0 : index
    %c6_84 = arith.constant 6 : index
    %65 = memref.load %arg8[%c0_83, %c6_84] : memref<8x16xf32, #tpu.memory_space<smem>>
    %c0_85 = arith.constant 0 : index
    %c7_86 = arith.constant 7 : index
    %66 = memref.load %arg8[%c0_85, %c7_86] : memref<8x16xf32, #tpu.memory_space<smem>>
    %c0_87 = arith.constant 0 : index
    %c8_88 = arith.constant 8 : index
    %67 = memref.load %arg8[%c0_87, %c8_88] : memref<8x16xf32, #tpu.memory_space<smem>>
    %c0_89 = arith.constant 0 : index
    %c9_90 = arith.constant 9 : index
    %68 = memref.load %arg8[%c0_89, %c9_90] : memref<8x16xf32, #tpu.memory_space<smem>>
    %c0_91 = arith.constant 0 : index
    %c10_92 = arith.constant 10 : index
    %69 = memref.load %arg8[%c0_91, %c10_92] : memref<8x16xf32, #tpu.memory_space<smem>>
    %c0_93 = arith.constant 0 : index
    %c11_94 = arith.constant 11 : index
    %70 = memref.load %arg8[%c0_93, %c11_94] : memref<8x16xf32, #tpu.memory_space<smem>>
    %c0_95 = arith.constant 0 : index
    %c12_96 = arith.constant 12 : index
    %71 = memref.load %arg8[%c0_95, %c12_96] : memref<8x16xf32, #tpu.memory_space<smem>>
    %c0_97 = arith.constant 0 : index
    %c13_98 = arith.constant 13 : index
    %72 = memref.load %arg8[%c0_97, %c13_98] : memref<8x16xf32, #tpu.memory_space<smem>>
    %c0_99 = arith.constant 0 : index
    %c14_100 = arith.constant 14 : index
    %73 = memref.load %arg8[%c0_99, %c14_100] : memref<8x16xf32, #tpu.memory_space<smem>>
    %c0_101 = arith.constant 0 : index
    %c15_102 = arith.constant 15 : index
    %74 = memref.load %arg8[%c0_101, %c15_102] : memref<8x16xf32, #tpu.memory_space<smem>>
    %c1_103 = arith.constant 1 : index
    %c0_104 = arith.constant 0 : index
    %75 = memref.load %arg8[%c1_103, %c0_104] : memref<8x16xf32, #tpu.memory_space<smem>>
    %c1_105 = arith.constant 1 : index
    %c1_106 = arith.constant 1 : index
    %76 = memref.load %arg8[%c1_105, %c1_106] : memref<8x16xf32, #tpu.memory_space<smem>>
    %c1_107 = arith.constant 1 : index
    %c2_108 = arith.constant 2 : index
    %77 = memref.load %arg8[%c1_107, %c2_108] : memref<8x16xf32, #tpu.memory_space<smem>>
    %c1_109 = arith.constant 1 : index
    %c3_110 = arith.constant 3 : index
    %78 = memref.load %arg8[%c1_109, %c3_110] : memref<8x16xf32, #tpu.memory_space<smem>>
    %c1_111 = arith.constant 1 : index
    %c4_112 = arith.constant 4 : index
    %79 = memref.load %arg8[%c1_111, %c4_112] : memref<8x16xf32, #tpu.memory_space<smem>>
    %c1_113 = arith.constant 1 : index
    %c5_114 = arith.constant 5 : index
    %80 = memref.load %arg8[%c1_113, %c5_114] : memref<8x16xf32, #tpu.memory_space<smem>>
    %c1_115 = arith.constant 1 : index
    %c6_116 = arith.constant 6 : index
    %81 = memref.load %arg8[%c1_115, %c6_116] : memref<8x16xf32, #tpu.memory_space<smem>>
    %c1_117 = arith.constant 1 : index
    %c7_118 = arith.constant 7 : index
    %82 = memref.load %arg8[%c1_117, %c7_118] : memref<8x16xf32, #tpu.memory_space<smem>>
    %c1_119 = arith.constant 1 : index
    %c8_120 = arith.constant 8 : index
    %83 = memref.load %arg8[%c1_119, %c8_120] : memref<8x16xf32, #tpu.memory_space<smem>>
    %c1_121 = arith.constant 1 : index
    %c9_122 = arith.constant 9 : index
    %84 = memref.load %arg8[%c1_121, %c9_122] : memref<8x16xf32, #tpu.memory_space<smem>>
    %c1_123 = arith.constant 1 : index
    %c10_124 = arith.constant 10 : index
    %85 = memref.load %arg8[%c1_123, %c10_124] : memref<8x16xf32, #tpu.memory_space<smem>>
    %c1_125 = arith.constant 1 : index
    %c11_126 = arith.constant 11 : index
    %86 = memref.load %arg8[%c1_125, %c11_126] : memref<8x16xf32, #tpu.memory_space<smem>>
    %c1_127 = arith.constant 1 : index
    %c12_128 = arith.constant 12 : index
    %87 = memref.load %arg8[%c1_127, %c12_128] : memref<8x16xf32, #tpu.memory_space<smem>>
    %c1_129 = arith.constant 1 : index
    %c13_130 = arith.constant 13 : index
    %88 = memref.load %arg8[%c1_129, %c13_130] : memref<8x16xf32, #tpu.memory_space<smem>>
    %c1_131 = arith.constant 1 : index
    %c14_132 = arith.constant 14 : index
    %89 = memref.load %arg8[%c1_131, %c14_132] : memref<8x16xf32, #tpu.memory_space<smem>>
    %c1_133 = arith.constant 1 : index
    %c15_134 = arith.constant 15 : index
    %90 = memref.load %arg8[%c1_133, %c15_134] : memref<8x16xf32, #tpu.memory_space<smem>>
    %c2_135 = arith.constant 2 : index
    %c0_136 = arith.constant 0 : index
    %91 = memref.load %arg8[%c2_135, %c0_136] : memref<8x16xf32, #tpu.memory_space<smem>>
    %c2_137 = arith.constant 2 : index
    %c1_138 = arith.constant 1 : index
    %92 = memref.load %arg8[%c2_137, %c1_138] : memref<8x16xf32, #tpu.memory_space<smem>>
    %c2_139 = arith.constant 2 : index
    %c2_140 = arith.constant 2 : index
    %93 = memref.load %arg8[%c2_139, %c2_140] : memref<8x16xf32, #tpu.memory_space<smem>>
    %c2_141 = arith.constant 2 : index
    %c3_142 = arith.constant 3 : index
    %94 = memref.load %arg8[%c2_141, %c3_142] : memref<8x16xf32, #tpu.memory_space<smem>>
    %c2_143 = arith.constant 2 : index
    %c4_144 = arith.constant 4 : index
    %95 = memref.load %arg8[%c2_143, %c4_144] : memref<8x16xf32, #tpu.memory_space<smem>>
    %c2_145 = arith.constant 2 : index
    %c5_146 = arith.constant 5 : index
    %96 = memref.load %arg8[%c2_145, %c5_146] : memref<8x16xf32, #tpu.memory_space<smem>>
    %c2_147 = arith.constant 2 : index
    %c6_148 = arith.constant 6 : index
    %97 = memref.load %arg8[%c2_147, %c6_148] : memref<8x16xf32, #tpu.memory_space<smem>>
    %c2_149 = arith.constant 2 : index
    %c7_150 = arith.constant 7 : index
    %98 = memref.load %arg8[%c2_149, %c7_150] : memref<8x16xf32, #tpu.memory_space<smem>>
    %c2_151 = arith.constant 2 : index
    %c8_152 = arith.constant 8 : index
    %99 = memref.load %arg8[%c2_151, %c8_152] : memref<8x16xf32, #tpu.memory_space<smem>>
    %c2_153 = arith.constant 2 : index
    %c9_154 = arith.constant 9 : index
    %100 = memref.load %arg8[%c2_153, %c9_154] : memref<8x16xf32, #tpu.memory_space<smem>>
    %c2_155 = arith.constant 2 : index
    %c10_156 = arith.constant 10 : index
    %101 = memref.load %arg8[%c2_155, %c10_156] : memref<8x16xf32, #tpu.memory_space<smem>>
    %c2_157 = arith.constant 2 : index
    %c11_158 = arith.constant 11 : index
    %102 = memref.load %arg8[%c2_157, %c11_158] : memref<8x16xf32, #tpu.memory_space<smem>>
    %c2_159 = arith.constant 2 : index
    %c12_160 = arith.constant 12 : index
    %103 = memref.load %arg8[%c2_159, %c12_160] : memref<8x16xf32, #tpu.memory_space<smem>>
    %c2_161 = arith.constant 2 : index
    %c13_162 = arith.constant 13 : index
    %104 = memref.load %arg8[%c2_161, %c13_162] : memref<8x16xf32, #tpu.memory_space<smem>>
    %c2_163 = arith.constant 2 : index
    %c14_164 = arith.constant 14 : index
    %105 = memref.load %arg8[%c2_163, %c14_164] : memref<8x16xf32, #tpu.memory_space<smem>>
    %c2_165 = arith.constant 2 : index
    %c15_166 = arith.constant 15 : index
    %106 = memref.load %arg8[%c2_165, %c15_166] : memref<8x16xf32, #tpu.memory_space<smem>>
    %c3_167 = arith.constant 3 : index
    %c0_168 = arith.constant 0 : index
    %107 = memref.load %arg8[%c3_167, %c0_168] : memref<8x16xf32, #tpu.memory_space<smem>>
    %c3_169 = arith.constant 3 : index
    %c1_170 = arith.constant 1 : index
    %108 = memref.load %arg8[%c3_169, %c1_170] : memref<8x16xf32, #tpu.memory_space<smem>>
    %c3_171 = arith.constant 3 : index
    %c2_172 = arith.constant 2 : index
    %109 = memref.load %arg8[%c3_171, %c2_172] : memref<8x16xf32, #tpu.memory_space<smem>>
    %c3_173 = arith.constant 3 : index
    %c3_174 = arith.constant 3 : index
    %110 = memref.load %arg8[%c3_173, %c3_174] : memref<8x16xf32, #tpu.memory_space<smem>>
    %c3_175 = arith.constant 3 : index
    %c4_176 = arith.constant 4 : index
    %111 = memref.load %arg8[%c3_175, %c4_176] : memref<8x16xf32, #tpu.memory_space<smem>>
    %c3_177 = arith.constant 3 : index
    %c5_178 = arith.constant 5 : index
    %112 = memref.load %arg8[%c3_177, %c5_178] : memref<8x16xf32, #tpu.memory_space<smem>>
    %c3_179 = arith.constant 3 : index
    %c6_180 = arith.constant 6 : index
    %113 = memref.load %arg8[%c3_179, %c6_180] : memref<8x16xf32, #tpu.memory_space<smem>>
    %c3_181 = arith.constant 3 : index
    %c7_182 = arith.constant 7 : index
    %114 = memref.load %arg8[%c3_181, %c7_182] : memref<8x16xf32, #tpu.memory_space<smem>>
    %c3_183 = arith.constant 3 : index
    %c8_184 = arith.constant 8 : index
    %115 = memref.load %arg8[%c3_183, %c8_184] : memref<8x16xf32, #tpu.memory_space<smem>>
    %c3_185 = arith.constant 3 : index
    %c9_186 = arith.constant 9 : index
    %116 = memref.load %arg8[%c3_185, %c9_186] : memref<8x16xf32, #tpu.memory_space<smem>>
    %c3_187 = arith.constant 3 : index
    %c10_188 = arith.constant 10 : index
    %117 = memref.load %arg8[%c3_187, %c10_188] : memref<8x16xf32, #tpu.memory_space<smem>>
    %c3_189 = arith.constant 3 : index
    %c11_190 = arith.constant 11 : index
    %118 = memref.load %arg8[%c3_189, %c11_190] : memref<8x16xf32, #tpu.memory_space<smem>>
    %c3_191 = arith.constant 3 : index
    %c12_192 = arith.constant 12 : index
    %119 = memref.load %arg8[%c3_191, %c12_192] : memref<8x16xf32, #tpu.memory_space<smem>>
    %c3_193 = arith.constant 3 : index
    %c13_194 = arith.constant 13 : index
    %120 = memref.load %arg8[%c3_193, %c13_194] : memref<8x16xf32, #tpu.memory_space<smem>>
    %c3_195 = arith.constant 3 : index
    %c14_196 = arith.constant 14 : index
    %121 = memref.load %arg8[%c3_195, %c14_196] : memref<8x16xf32, #tpu.memory_space<smem>>
    %c3_197 = arith.constant 3 : index
    %c15_198 = arith.constant 15 : index
    %122 = memref.load %arg8[%c3_197, %c15_198] : memref<8x16xf32, #tpu.memory_space<smem>>
    %c4_199 = arith.constant 4 : index
    %c0_200 = arith.constant 0 : index
    %123 = memref.load %arg8[%c4_199, %c0_200] : memref<8x16xf32, #tpu.memory_space<smem>>
    %c4_201 = arith.constant 4 : index
    %c1_202 = arith.constant 1 : index
    %124 = memref.load %arg8[%c4_201, %c1_202] : memref<8x16xf32, #tpu.memory_space<smem>>
    %c4_203 = arith.constant 4 : index
    %c2_204 = arith.constant 2 : index
    %125 = memref.load %arg8[%c4_203, %c2_204] : memref<8x16xf32, #tpu.memory_space<smem>>
    %c4_205 = arith.constant 4 : index
    %c3_206 = arith.constant 3 : index
    %126 = memref.load %arg8[%c4_205, %c3_206] : memref<8x16xf32, #tpu.memory_space<smem>>
    %c4_207 = arith.constant 4 : index
    %c4_208 = arith.constant 4 : index
    %127 = memref.load %arg8[%c4_207, %c4_208] : memref<8x16xf32, #tpu.memory_space<smem>>
    %c4_209 = arith.constant 4 : index
    %c5_210 = arith.constant 5 : index
    %128 = memref.load %arg8[%c4_209, %c5_210] : memref<8x16xf32, #tpu.memory_space<smem>>
    %c4_211 = arith.constant 4 : index
    %c6_212 = arith.constant 6 : index
    %129 = memref.load %arg8[%c4_211, %c6_212] : memref<8x16xf32, #tpu.memory_space<smem>>
    %c4_213 = arith.constant 4 : index
    %c7_214 = arith.constant 7 : index
    %130 = memref.load %arg8[%c4_213, %c7_214] : memref<8x16xf32, #tpu.memory_space<smem>>
    %c4_215 = arith.constant 4 : index
    %c8_216 = arith.constant 8 : index
    %131 = memref.load %arg8[%c4_215, %c8_216] : memref<8x16xf32, #tpu.memory_space<smem>>
    %c4_217 = arith.constant 4 : index
    %c9_218 = arith.constant 9 : index
    %132 = memref.load %arg8[%c4_217, %c9_218] : memref<8x16xf32, #tpu.memory_space<smem>>
    %c4_219 = arith.constant 4 : index
    %c10_220 = arith.constant 10 : index
    %133 = memref.load %arg8[%c4_219, %c10_220] : memref<8x16xf32, #tpu.memory_space<smem>>
    %c4_221 = arith.constant 4 : index
    %c11_222 = arith.constant 11 : index
    %134 = memref.load %arg8[%c4_221, %c11_222] : memref<8x16xf32, #tpu.memory_space<smem>>
    %c4_223 = arith.constant 4 : index
    %c12_224 = arith.constant 12 : index
    %135 = memref.load %arg8[%c4_223, %c12_224] : memref<8x16xf32, #tpu.memory_space<smem>>
    %c4_225 = arith.constant 4 : index
    %c13_226 = arith.constant 13 : index
    %136 = memref.load %arg8[%c4_225, %c13_226] : memref<8x16xf32, #tpu.memory_space<smem>>
    %c4_227 = arith.constant 4 : index
    %c14_228 = arith.constant 14 : index
    %137 = memref.load %arg8[%c4_227, %c14_228] : memref<8x16xf32, #tpu.memory_space<smem>>
    %c4_229 = arith.constant 4 : index
    %c15_230 = arith.constant 15 : index
    %138 = memref.load %arg8[%c4_229, %c15_230] : memref<8x16xf32, #tpu.memory_space<smem>>
    %c5_231 = arith.constant 5 : index
    %c0_232 = arith.constant 0 : index
    %139 = memref.load %arg8[%c5_231, %c0_232] : memref<8x16xf32, #tpu.memory_space<smem>>
    %c5_233 = arith.constant 5 : index
    %c1_234 = arith.constant 1 : index
    %140 = memref.load %arg8[%c5_233, %c1_234] : memref<8x16xf32, #tpu.memory_space<smem>>
    %c5_235 = arith.constant 5 : index
    %c2_236 = arith.constant 2 : index
    %141 = memref.load %arg8[%c5_235, %c2_236] : memref<8x16xf32, #tpu.memory_space<smem>>
    %c5_237 = arith.constant 5 : index
    %c3_238 = arith.constant 3 : index
    %142 = memref.load %arg8[%c5_237, %c3_238] : memref<8x16xf32, #tpu.memory_space<smem>>
    %c5_239 = arith.constant 5 : index
    %c4_240 = arith.constant 4 : index
    %143 = memref.load %arg8[%c5_239, %c4_240] : memref<8x16xf32, #tpu.memory_space<smem>>
    %c5_241 = arith.constant 5 : index
    %c5_242 = arith.constant 5 : index
    %144 = memref.load %arg8[%c5_241, %c5_242] : memref<8x16xf32, #tpu.memory_space<smem>>
    %c5_243 = arith.constant 5 : index
    %c6_244 = arith.constant 6 : index
    %145 = memref.load %arg8[%c5_243, %c6_244] : memref<8x16xf32, #tpu.memory_space<smem>>
    %c5_245 = arith.constant 5 : index
    %c7_246 = arith.constant 7 : index
    %146 = memref.load %arg8[%c5_245, %c7_246] : memref<8x16xf32, #tpu.memory_space<smem>>
    %c5_247 = arith.constant 5 : index
    %c8_248 = arith.constant 8 : index
    %147 = memref.load %arg8[%c5_247, %c8_248] : memref<8x16xf32, #tpu.memory_space<smem>>
    %c5_249 = arith.constant 5 : index
    %c9_250 = arith.constant 9 : index
    %148 = memref.load %arg8[%c5_249, %c9_250] : memref<8x16xf32, #tpu.memory_space<smem>>
    %c5_251 = arith.constant 5 : index
    %c10_252 = arith.constant 10 : index
    %149 = memref.load %arg8[%c5_251, %c10_252] : memref<8x16xf32, #tpu.memory_space<smem>>
    %c5_253 = arith.constant 5 : index
    %c11_254 = arith.constant 11 : index
    %150 = memref.load %arg8[%c5_253, %c11_254] : memref<8x16xf32, #tpu.memory_space<smem>>
    %c5_255 = arith.constant 5 : index
    %c12_256 = arith.constant 12 : index
    %151 = memref.load %arg8[%c5_255, %c12_256] : memref<8x16xf32, #tpu.memory_space<smem>>
    %c5_257 = arith.constant 5 : index
    %c13_258 = arith.constant 13 : index
    %152 = memref.load %arg8[%c5_257, %c13_258] : memref<8x16xf32, #tpu.memory_space<smem>>
    %c5_259 = arith.constant 5 : index
    %c14_260 = arith.constant 14 : index
    %153 = memref.load %arg8[%c5_259, %c14_260] : memref<8x16xf32, #tpu.memory_space<smem>>
    %c5_261 = arith.constant 5 : index
    %c15_262 = arith.constant 15 : index
    %154 = memref.load %arg8[%c5_261, %c15_262] : memref<8x16xf32, #tpu.memory_space<smem>>
    %c6_263 = arith.constant 6 : index
    %c0_264 = arith.constant 0 : index
    %155 = memref.load %arg8[%c6_263, %c0_264] : memref<8x16xf32, #tpu.memory_space<smem>>
    %c6_265 = arith.constant 6 : index
    %c1_266 = arith.constant 1 : index
    %156 = memref.load %arg8[%c6_265, %c1_266] : memref<8x16xf32, #tpu.memory_space<smem>>
    %c6_267 = arith.constant 6 : index
    %c2_268 = arith.constant 2 : index
    %157 = memref.load %arg8[%c6_267, %c2_268] : memref<8x16xf32, #tpu.memory_space<smem>>
    %c6_269 = arith.constant 6 : index
    %c3_270 = arith.constant 3 : index
    %158 = memref.load %arg8[%c6_269, %c3_270] : memref<8x16xf32, #tpu.memory_space<smem>>
    %c6_271 = arith.constant 6 : index
    %c4_272 = arith.constant 4 : index
    %159 = memref.load %arg8[%c6_271, %c4_272] : memref<8x16xf32, #tpu.memory_space<smem>>
    %c6_273 = arith.constant 6 : index
    %c5_274 = arith.constant 5 : index
    %160 = memref.load %arg8[%c6_273, %c5_274] : memref<8x16xf32, #tpu.memory_space<smem>>
    %c6_275 = arith.constant 6 : index
    %c6_276 = arith.constant 6 : index
    %161 = memref.load %arg8[%c6_275, %c6_276] : memref<8x16xf32, #tpu.memory_space<smem>>
    %c6_277 = arith.constant 6 : index
    %c7_278 = arith.constant 7 : index
    %162 = memref.load %arg8[%c6_277, %c7_278] : memref<8x16xf32, #tpu.memory_space<smem>>
    %c6_279 = arith.constant 6 : index
    %c8_280 = arith.constant 8 : index
    %163 = memref.load %arg8[%c6_279, %c8_280] : memref<8x16xf32, #tpu.memory_space<smem>>
    %c6_281 = arith.constant 6 : index
    %c9_282 = arith.constant 9 : index
    %164 = memref.load %arg8[%c6_281, %c9_282] : memref<8x16xf32, #tpu.memory_space<smem>>
    %c6_283 = arith.constant 6 : index
    %c10_284 = arith.constant 10 : index
    %165 = memref.load %arg8[%c6_283, %c10_284] : memref<8x16xf32, #tpu.memory_space<smem>>
    %c6_285 = arith.constant 6 : index
    %c11_286 = arith.constant 11 : index
    %166 = memref.load %arg8[%c6_285, %c11_286] : memref<8x16xf32, #tpu.memory_space<smem>>
    %c6_287 = arith.constant 6 : index
    %c12_288 = arith.constant 12 : index
    %167 = memref.load %arg8[%c6_287, %c12_288] : memref<8x16xf32, #tpu.memory_space<smem>>
    %c6_289 = arith.constant 6 : index
    %c13_290 = arith.constant 13 : index
    %168 = memref.load %arg8[%c6_289, %c13_290] : memref<8x16xf32, #tpu.memory_space<smem>>
    %c6_291 = arith.constant 6 : index
    %c14_292 = arith.constant 14 : index
    %169 = memref.load %arg8[%c6_291, %c14_292] : memref<8x16xf32, #tpu.memory_space<smem>>
    %c6_293 = arith.constant 6 : index
    %c15_294 = arith.constant 15 : index
    %170 = memref.load %arg8[%c6_293, %c15_294] : memref<8x16xf32, #tpu.memory_space<smem>>
    %c7_295 = arith.constant 7 : index
    %c0_296 = arith.constant 0 : index
    %171 = memref.load %arg8[%c7_295, %c0_296] : memref<8x16xf32, #tpu.memory_space<smem>>
    %c7_297 = arith.constant 7 : index
    %c1_298 = arith.constant 1 : index
    %172 = memref.load %arg8[%c7_297, %c1_298] : memref<8x16xf32, #tpu.memory_space<smem>>
    %c7_299 = arith.constant 7 : index
    %c2_300 = arith.constant 2 : index
    %173 = memref.load %arg8[%c7_299, %c2_300] : memref<8x16xf32, #tpu.memory_space<smem>>
    %c7_301 = arith.constant 7 : index
    %c3_302 = arith.constant 3 : index
    %174 = memref.load %arg8[%c7_301, %c3_302] : memref<8x16xf32, #tpu.memory_space<smem>>
    %c7_303 = arith.constant 7 : index
    %c4_304 = arith.constant 4 : index
    %175 = memref.load %arg8[%c7_303, %c4_304] : memref<8x16xf32, #tpu.memory_space<smem>>
    %c7_305 = arith.constant 7 : index
    %c5_306 = arith.constant 5 : index
    %176 = memref.load %arg8[%c7_305, %c5_306] : memref<8x16xf32, #tpu.memory_space<smem>>
    %c7_307 = arith.constant 7 : index
    %c6_308 = arith.constant 6 : index
    %177 = memref.load %arg8[%c7_307, %c6_308] : memref<8x16xf32, #tpu.memory_space<smem>>
    %c7_309 = arith.constant 7 : index
    %c7_310 = arith.constant 7 : index
    %178 = memref.load %arg8[%c7_309, %c7_310] : memref<8x16xf32, #tpu.memory_space<smem>>
    %c7_311 = arith.constant 7 : index
    %c8_312 = arith.constant 8 : index
    %179 = memref.load %arg8[%c7_311, %c8_312] : memref<8x16xf32, #tpu.memory_space<smem>>
    %c7_313 = arith.constant 7 : index
    %c9_314 = arith.constant 9 : index
    %180 = memref.load %arg8[%c7_313, %c9_314] : memref<8x16xf32, #tpu.memory_space<smem>>
    %c7_315 = arith.constant 7 : index
    %c10_316 = arith.constant 10 : index
    %181 = memref.load %arg8[%c7_315, %c10_316] : memref<8x16xf32, #tpu.memory_space<smem>>
    %c7_317 = arith.constant 7 : index
    %c11_318 = arith.constant 11 : index
    %182 = memref.load %arg8[%c7_317, %c11_318] : memref<8x16xf32, #tpu.memory_space<smem>>
    %c7_319 = arith.constant 7 : index
    %c12_320 = arith.constant 12 : index
    %183 = memref.load %arg8[%c7_319, %c12_320] : memref<8x16xf32, #tpu.memory_space<smem>>
    %c7_321 = arith.constant 7 : index
    %c13_322 = arith.constant 13 : index
    %184 = memref.load %arg8[%c7_321, %c13_322] : memref<8x16xf32, #tpu.memory_space<smem>>
    %c7_323 = arith.constant 7 : index
    %c14_324 = arith.constant 14 : index
    %185 = memref.load %arg8[%c7_323, %c14_324] : memref<8x16xf32, #tpu.memory_space<smem>>
    %c7_325 = arith.constant 7 : index
    %c15_326 = arith.constant 15 : index
    %186 = memref.load %arg8[%c7_325, %c15_326] : memref<8x16xf32, #tpu.memory_space<smem>>
    %c0_327 = arith.constant 0 : index
    %c0_328 = arith.constant 0 : index
    %187 = memref.load %arg9[%c0_327, %c0_328] : memref<1x8xf32, #tpu.memory_space<smem>>
    %c0_329 = arith.constant 0 : index
    %c1_330 = arith.constant 1 : index
    %188 = memref.load %arg9[%c0_329, %c1_330] : memref<1x8xf32, #tpu.memory_space<smem>>
    %c0_331 = arith.constant 0 : index
    %c2_332 = arith.constant 2 : index
    %189 = memref.load %arg9[%c0_331, %c2_332] : memref<1x8xf32, #tpu.memory_space<smem>>
    %c0_333 = arith.constant 0 : index
    %c3_334 = arith.constant 3 : index
    %190 = memref.load %arg9[%c0_333, %c3_334] : memref<1x8xf32, #tpu.memory_space<smem>>
    %c0_335 = arith.constant 0 : index
    %c4_336 = arith.constant 4 : index
    %191 = memref.load %arg9[%c0_335, %c4_336] : memref<1x8xf32, #tpu.memory_space<smem>>
    %c0_337 = arith.constant 0 : index
    %c5_338 = arith.constant 5 : index
    %192 = memref.load %arg9[%c0_337, %c5_338] : memref<1x8xf32, #tpu.memory_space<smem>>
    %c0_339 = arith.constant 0 : index
    %c6_340 = arith.constant 6 : index
    %193 = memref.load %arg9[%c0_339, %c6_340] : memref<1x8xf32, #tpu.memory_space<smem>>
    %c0_341 = arith.constant 0 : index
    %c7_342 = arith.constant 7 : index
    %194 = memref.load %arg9[%c0_341, %c7_342] : memref<1x8xf32, #tpu.memory_space<smem>>
    %c0_343 = arith.constant 0 : index
    %c0_344 = arith.constant 0 : index
    %195 = memref.load %arg10[%c0_343, %c0_344] : memref<1x8xf32, #tpu.memory_space<smem>>
    %c0_345 = arith.constant 0 : index
    %c1_346 = arith.constant 1 : index
    %196 = memref.load %arg10[%c0_345, %c1_346] : memref<1x8xf32, #tpu.memory_space<smem>>
    %c0_347 = arith.constant 0 : index
    %c2_348 = arith.constant 2 : index
    %197 = memref.load %arg10[%c0_347, %c2_348] : memref<1x8xf32, #tpu.memory_space<smem>>
    %c0_349 = arith.constant 0 : index
    %c3_350 = arith.constant 3 : index
    %198 = memref.load %arg10[%c0_349, %c3_350] : memref<1x8xf32, #tpu.memory_space<smem>>
    %c0_351 = arith.constant 0 : index
    %c4_352 = arith.constant 4 : index
    %199 = memref.load %arg10[%c0_351, %c4_352] : memref<1x8xf32, #tpu.memory_space<smem>>
    %c0_353 = arith.constant 0 : index
    %c5_354 = arith.constant 5 : index
    %200 = memref.load %arg10[%c0_353, %c5_354] : memref<1x8xf32, #tpu.memory_space<smem>>
    %c0_355 = arith.constant 0 : index
    %c6_356 = arith.constant 6 : index
    %201 = memref.load %arg10[%c0_355, %c6_356] : memref<1x8xf32, #tpu.memory_space<smem>>
    %c0_357 = arith.constant 0 : index
    %c7_358 = arith.constant 7 : index
    %202 = memref.load %arg10[%c0_357, %c7_358] : memref<1x8xf32, #tpu.memory_space<smem>>
    %203 = vector.broadcast %27 : f32 to vector<8x256xf32>
    %204 = arith.mulf %26, %203 : vector<8x256xf32>
    %205 = vector.broadcast %43 : f32 to vector<8x256xf32>
    %206 = arith.addf %204, %205 : vector<8x256xf32>
    %cst_359 = arith.constant 0.000000e+00 : f32
    %207 = vector.broadcast %cst_359 : f32 to vector<8x256xf32>
    %208 = arith.maximumf %206, %207 : vector<8x256xf32>
    %209 = vector.broadcast %59 : f32 to vector<8x256xf32>
    %210 = arith.mulf %208, %209 : vector<8x256xf32>
    %211 = vector.broadcast %187 : f32 to vector<8x256xf32>
    %212 = arith.addf %210, %211 : vector<8x256xf32>
    %213 = vector.broadcast %75 : f32 to vector<8x256xf32>
    %214 = arith.mulf %208, %213 : vector<8x256xf32>
    %215 = vector.broadcast %188 : f32 to vector<8x256xf32>
    %216 = arith.addf %214, %215 : vector<8x256xf32>
    %217 = vector.broadcast %91 : f32 to vector<8x256xf32>
    %218 = arith.mulf %208, %217 : vector<8x256xf32>
    %219 = vector.broadcast %189 : f32 to vector<8x256xf32>
    %220 = arith.addf %218, %219 : vector<8x256xf32>
    %221 = vector.broadcast %107 : f32 to vector<8x256xf32>
    %222 = arith.mulf %208, %221 : vector<8x256xf32>
    %223 = vector.broadcast %190 : f32 to vector<8x256xf32>
    %224 = arith.addf %222, %223 : vector<8x256xf32>
    %225 = vector.broadcast %123 : f32 to vector<8x256xf32>
    %226 = arith.mulf %208, %225 : vector<8x256xf32>
    %227 = vector.broadcast %191 : f32 to vector<8x256xf32>
    %228 = arith.addf %226, %227 : vector<8x256xf32>
    %229 = vector.broadcast %139 : f32 to vector<8x256xf32>
    %230 = arith.mulf %208, %229 : vector<8x256xf32>
    %231 = vector.broadcast %192 : f32 to vector<8x256xf32>
    %232 = arith.addf %230, %231 : vector<8x256xf32>
    %233 = vector.broadcast %155 : f32 to vector<8x256xf32>
    %234 = arith.mulf %208, %233 : vector<8x256xf32>
    %235 = vector.broadcast %193 : f32 to vector<8x256xf32>
    %236 = arith.addf %234, %235 : vector<8x256xf32>
    %237 = vector.broadcast %171 : f32 to vector<8x256xf32>
    %238 = arith.mulf %208, %237 : vector<8x256xf32>
    %239 = vector.broadcast %194 : f32 to vector<8x256xf32>
    %240 = arith.addf %238, %239 : vector<8x256xf32>
    %241 = vector.broadcast %28 : f32 to vector<8x256xf32>
    %242 = arith.mulf %26, %241 : vector<8x256xf32>
    %243 = vector.broadcast %44 : f32 to vector<8x256xf32>
    %244 = arith.addf %242, %243 : vector<8x256xf32>
    %cst_360 = arith.constant 0.000000e+00 : f32
    %245 = vector.broadcast %cst_360 : f32 to vector<8x256xf32>
    %246 = arith.maximumf %244, %245 : vector<8x256xf32>
    %247 = vector.broadcast %60 : f32 to vector<8x256xf32>
    %248 = arith.mulf %246, %247 : vector<8x256xf32>
    %249 = arith.addf %212, %248 : vector<8x256xf32>
    %250 = vector.broadcast %76 : f32 to vector<8x256xf32>
    %251 = arith.mulf %246, %250 : vector<8x256xf32>
    %252 = arith.addf %216, %251 : vector<8x256xf32>
    %253 = vector.broadcast %92 : f32 to vector<8x256xf32>
    %254 = arith.mulf %246, %253 : vector<8x256xf32>
    %255 = arith.addf %220, %254 : vector<8x256xf32>
    %256 = vector.broadcast %108 : f32 to vector<8x256xf32>
    %257 = arith.mulf %246, %256 : vector<8x256xf32>
    %258 = arith.addf %224, %257 : vector<8x256xf32>
    %259 = vector.broadcast %124 : f32 to vector<8x256xf32>
    %260 = arith.mulf %246, %259 : vector<8x256xf32>
    %261 = arith.addf %228, %260 : vector<8x256xf32>
    %262 = vector.broadcast %140 : f32 to vector<8x256xf32>
    %263 = arith.mulf %246, %262 : vector<8x256xf32>
    %264 = arith.addf %232, %263 : vector<8x256xf32>
    %265 = vector.broadcast %156 : f32 to vector<8x256xf32>
    %266 = arith.mulf %246, %265 : vector<8x256xf32>
    %267 = arith.addf %236, %266 : vector<8x256xf32>
    %268 = vector.broadcast %172 : f32 to vector<8x256xf32>
    %269 = arith.mulf %246, %268 : vector<8x256xf32>
    %270 = arith.addf %240, %269 : vector<8x256xf32>
    %271 = vector.broadcast %29 : f32 to vector<8x256xf32>
    %272 = arith.mulf %26, %271 : vector<8x256xf32>
    %273 = vector.broadcast %45 : f32 to vector<8x256xf32>
    %274 = arith.addf %272, %273 : vector<8x256xf32>
    %cst_361 = arith.constant 0.000000e+00 : f32
    %275 = vector.broadcast %cst_361 : f32 to vector<8x256xf32>
    %276 = arith.maximumf %274, %275 : vector<8x256xf32>
    %277 = vector.broadcast %61 : f32 to vector<8x256xf32>
    %278 = arith.mulf %276, %277 : vector<8x256xf32>
    %279 = arith.addf %249, %278 : vector<8x256xf32>
    %280 = vector.broadcast %77 : f32 to vector<8x256xf32>
    %281 = arith.mulf %276, %280 : vector<8x256xf32>
    %282 = arith.addf %252, %281 : vector<8x256xf32>
    %283 = vector.broadcast %93 : f32 to vector<8x256xf32>
    %284 = arith.mulf %276, %283 : vector<8x256xf32>
    %285 = arith.addf %255, %284 : vector<8x256xf32>
    %286 = vector.broadcast %109 : f32 to vector<8x256xf32>
    %287 = arith.mulf %276, %286 : vector<8x256xf32>
    %288 = arith.addf %258, %287 : vector<8x256xf32>
    %289 = vector.broadcast %125 : f32 to vector<8x256xf32>
    %290 = arith.mulf %276, %289 : vector<8x256xf32>
    %291 = arith.addf %261, %290 : vector<8x256xf32>
    %292 = vector.broadcast %141 : f32 to vector<8x256xf32>
    %293 = arith.mulf %276, %292 : vector<8x256xf32>
    %294 = arith.addf %264, %293 : vector<8x256xf32>
    %295 = vector.broadcast %157 : f32 to vector<8x256xf32>
    %296 = arith.mulf %276, %295 : vector<8x256xf32>
    %297 = arith.addf %267, %296 : vector<8x256xf32>
    %298 = vector.broadcast %173 : f32 to vector<8x256xf32>
    %299 = arith.mulf %276, %298 : vector<8x256xf32>
    %300 = arith.addf %270, %299 : vector<8x256xf32>
    %301 = vector.broadcast %30 : f32 to vector<8x256xf32>
    %302 = arith.mulf %26, %301 : vector<8x256xf32>
    %303 = vector.broadcast %46 : f32 to vector<8x256xf32>
    %304 = arith.addf %302, %303 : vector<8x256xf32>
    %cst_362 = arith.constant 0.000000e+00 : f32
    %305 = vector.broadcast %cst_362 : f32 to vector<8x256xf32>
    %306 = arith.maximumf %304, %305 : vector<8x256xf32>
    %307 = vector.broadcast %62 : f32 to vector<8x256xf32>
    %308 = arith.mulf %306, %307 : vector<8x256xf32>
    %309 = arith.addf %279, %308 : vector<8x256xf32>
    %310 = vector.broadcast %78 : f32 to vector<8x256xf32>
    %311 = arith.mulf %306, %310 : vector<8x256xf32>
    %312 = arith.addf %282, %311 : vector<8x256xf32>
    %313 = vector.broadcast %94 : f32 to vector<8x256xf32>
    %314 = arith.mulf %306, %313 : vector<8x256xf32>
    %315 = arith.addf %285, %314 : vector<8x256xf32>
    %316 = vector.broadcast %110 : f32 to vector<8x256xf32>
    %317 = arith.mulf %306, %316 : vector<8x256xf32>
    %318 = arith.addf %288, %317 : vector<8x256xf32>
    %319 = vector.broadcast %126 : f32 to vector<8x256xf32>
    %320 = arith.mulf %306, %319 : vector<8x256xf32>
    %321 = arith.addf %291, %320 : vector<8x256xf32>
    %322 = vector.broadcast %142 : f32 to vector<8x256xf32>
    %323 = arith.mulf %306, %322 : vector<8x256xf32>
    %324 = arith.addf %294, %323 : vector<8x256xf32>
    %325 = vector.broadcast %158 : f32 to vector<8x256xf32>
    %326 = arith.mulf %306, %325 : vector<8x256xf32>
    %327 = arith.addf %297, %326 : vector<8x256xf32>
    %328 = vector.broadcast %174 : f32 to vector<8x256xf32>
    %329 = arith.mulf %306, %328 : vector<8x256xf32>
    %330 = arith.addf %300, %329 : vector<8x256xf32>
    %331 = vector.broadcast %31 : f32 to vector<8x256xf32>
    %332 = arith.mulf %26, %331 : vector<8x256xf32>
    %333 = vector.broadcast %47 : f32 to vector<8x256xf32>
    %334 = arith.addf %332, %333 : vector<8x256xf32>
    %cst_363 = arith.constant 0.000000e+00 : f32
    %335 = vector.broadcast %cst_363 : f32 to vector<8x256xf32>
    %336 = arith.maximumf %334, %335 : vector<8x256xf32>
    %337 = vector.broadcast %63 : f32 to vector<8x256xf32>
    %338 = arith.mulf %336, %337 : vector<8x256xf32>
    %339 = arith.addf %309, %338 : vector<8x256xf32>
    %340 = vector.broadcast %79 : f32 to vector<8x256xf32>
    %341 = arith.mulf %336, %340 : vector<8x256xf32>
    %342 = arith.addf %312, %341 : vector<8x256xf32>
    %343 = vector.broadcast %95 : f32 to vector<8x256xf32>
    %344 = arith.mulf %336, %343 : vector<8x256xf32>
    %345 = arith.addf %315, %344 : vector<8x256xf32>
    %346 = vector.broadcast %111 : f32 to vector<8x256xf32>
    %347 = arith.mulf %336, %346 : vector<8x256xf32>
    %348 = arith.addf %318, %347 : vector<8x256xf32>
    %349 = vector.broadcast %127 : f32 to vector<8x256xf32>
    %350 = arith.mulf %336, %349 : vector<8x256xf32>
    %351 = arith.addf %321, %350 : vector<8x256xf32>
    %352 = vector.broadcast %143 : f32 to vector<8x256xf32>
    %353 = arith.mulf %336, %352 : vector<8x256xf32>
    %354 = arith.addf %324, %353 : vector<8x256xf32>
    %355 = vector.broadcast %159 : f32 to vector<8x256xf32>
    %356 = arith.mulf %336, %355 : vector<8x256xf32>
    %357 = arith.addf %327, %356 : vector<8x256xf32>
    %358 = vector.broadcast %175 : f32 to vector<8x256xf32>
    %359 = arith.mulf %336, %358 : vector<8x256xf32>
    %360 = arith.addf %330, %359 : vector<8x256xf32>
    %361 = vector.broadcast %32 : f32 to vector<8x256xf32>
    %362 = arith.mulf %26, %361 : vector<8x256xf32>
    %363 = vector.broadcast %48 : f32 to vector<8x256xf32>
    %364 = arith.addf %362, %363 : vector<8x256xf32>
    %cst_364 = arith.constant 0.000000e+00 : f32
    %365 = vector.broadcast %cst_364 : f32 to vector<8x256xf32>
    %366 = arith.maximumf %364, %365 : vector<8x256xf32>
    %367 = vector.broadcast %64 : f32 to vector<8x256xf32>
    %368 = arith.mulf %366, %367 : vector<8x256xf32>
    %369 = arith.addf %339, %368 : vector<8x256xf32>
    %370 = vector.broadcast %80 : f32 to vector<8x256xf32>
    %371 = arith.mulf %366, %370 : vector<8x256xf32>
    %372 = arith.addf %342, %371 : vector<8x256xf32>
    %373 = vector.broadcast %96 : f32 to vector<8x256xf32>
    %374 = arith.mulf %366, %373 : vector<8x256xf32>
    %375 = arith.addf %345, %374 : vector<8x256xf32>
    %376 = vector.broadcast %112 : f32 to vector<8x256xf32>
    %377 = arith.mulf %366, %376 : vector<8x256xf32>
    %378 = arith.addf %348, %377 : vector<8x256xf32>
    %379 = vector.broadcast %128 : f32 to vector<8x256xf32>
    %380 = arith.mulf %366, %379 : vector<8x256xf32>
    %381 = arith.addf %351, %380 : vector<8x256xf32>
    %382 = vector.broadcast %144 : f32 to vector<8x256xf32>
    %383 = arith.mulf %366, %382 : vector<8x256xf32>
    %384 = arith.addf %354, %383 : vector<8x256xf32>
    %385 = vector.broadcast %160 : f32 to vector<8x256xf32>
    %386 = arith.mulf %366, %385 : vector<8x256xf32>
    %387 = arith.addf %357, %386 : vector<8x256xf32>
    %388 = vector.broadcast %176 : f32 to vector<8x256xf32>
    %389 = arith.mulf %366, %388 : vector<8x256xf32>
    %390 = arith.addf %360, %389 : vector<8x256xf32>
    %391 = vector.broadcast %33 : f32 to vector<8x256xf32>
    %392 = arith.mulf %26, %391 : vector<8x256xf32>
    %393 = vector.broadcast %49 : f32 to vector<8x256xf32>
    %394 = arith.addf %392, %393 : vector<8x256xf32>
    %cst_365 = arith.constant 0.000000e+00 : f32
    %395 = vector.broadcast %cst_365 : f32 to vector<8x256xf32>
    %396 = arith.maximumf %394, %395 : vector<8x256xf32>
    %397 = vector.broadcast %65 : f32 to vector<8x256xf32>
    %398 = arith.mulf %396, %397 : vector<8x256xf32>
    %399 = arith.addf %369, %398 : vector<8x256xf32>
    %400 = vector.broadcast %81 : f32 to vector<8x256xf32>
    %401 = arith.mulf %396, %400 : vector<8x256xf32>
    %402 = arith.addf %372, %401 : vector<8x256xf32>
    %403 = vector.broadcast %97 : f32 to vector<8x256xf32>
    %404 = arith.mulf %396, %403 : vector<8x256xf32>
    %405 = arith.addf %375, %404 : vector<8x256xf32>
    %406 = vector.broadcast %113 : f32 to vector<8x256xf32>
    %407 = arith.mulf %396, %406 : vector<8x256xf32>
    %408 = arith.addf %378, %407 : vector<8x256xf32>
    %409 = vector.broadcast %129 : f32 to vector<8x256xf32>
    %410 = arith.mulf %396, %409 : vector<8x256xf32>
    %411 = arith.addf %381, %410 : vector<8x256xf32>
    %412 = vector.broadcast %145 : f32 to vector<8x256xf32>
    %413 = arith.mulf %396, %412 : vector<8x256xf32>
    %414 = arith.addf %384, %413 : vector<8x256xf32>
    %415 = vector.broadcast %161 : f32 to vector<8x256xf32>
    %416 = arith.mulf %396, %415 : vector<8x256xf32>
    %417 = arith.addf %387, %416 : vector<8x256xf32>
    %418 = vector.broadcast %177 : f32 to vector<8x256xf32>
    %419 = arith.mulf %396, %418 : vector<8x256xf32>
    %420 = arith.addf %390, %419 : vector<8x256xf32>
    %421 = vector.broadcast %34 : f32 to vector<8x256xf32>
    %422 = arith.mulf %26, %421 : vector<8x256xf32>
    %423 = vector.broadcast %50 : f32 to vector<8x256xf32>
    %424 = arith.addf %422, %423 : vector<8x256xf32>
    %cst_366 = arith.constant 0.000000e+00 : f32
    %425 = vector.broadcast %cst_366 : f32 to vector<8x256xf32>
    %426 = arith.maximumf %424, %425 : vector<8x256xf32>
    %427 = vector.broadcast %66 : f32 to vector<8x256xf32>
    %428 = arith.mulf %426, %427 : vector<8x256xf32>
    %429 = arith.addf %399, %428 : vector<8x256xf32>
    %430 = vector.broadcast %82 : f32 to vector<8x256xf32>
    %431 = arith.mulf %426, %430 : vector<8x256xf32>
    %432 = arith.addf %402, %431 : vector<8x256xf32>
    %433 = vector.broadcast %98 : f32 to vector<8x256xf32>
    %434 = arith.mulf %426, %433 : vector<8x256xf32>
    %435 = arith.addf %405, %434 : vector<8x256xf32>
    %436 = vector.broadcast %114 : f32 to vector<8x256xf32>
    %437 = arith.mulf %426, %436 : vector<8x256xf32>
    %438 = arith.addf %408, %437 : vector<8x256xf32>
    %439 = vector.broadcast %130 : f32 to vector<8x256xf32>
    %440 = arith.mulf %426, %439 : vector<8x256xf32>
    %441 = arith.addf %411, %440 : vector<8x256xf32>
    %442 = vector.broadcast %146 : f32 to vector<8x256xf32>
    %443 = arith.mulf %426, %442 : vector<8x256xf32>
    %444 = arith.addf %414, %443 : vector<8x256xf32>
    %445 = vector.broadcast %162 : f32 to vector<8x256xf32>
    %446 = arith.mulf %426, %445 : vector<8x256xf32>
    %447 = arith.addf %417, %446 : vector<8x256xf32>
    %448 = vector.broadcast %178 : f32 to vector<8x256xf32>
    %449 = arith.mulf %426, %448 : vector<8x256xf32>
    %450 = arith.addf %420, %449 : vector<8x256xf32>
    %451 = vector.broadcast %35 : f32 to vector<8x256xf32>
    %452 = arith.mulf %26, %451 : vector<8x256xf32>
    %453 = vector.broadcast %51 : f32 to vector<8x256xf32>
    %454 = arith.addf %452, %453 : vector<8x256xf32>
    %cst_367 = arith.constant 0.000000e+00 : f32
    %455 = vector.broadcast %cst_367 : f32 to vector<8x256xf32>
    %456 = arith.maximumf %454, %455 : vector<8x256xf32>
    %457 = vector.broadcast %67 : f32 to vector<8x256xf32>
    %458 = arith.mulf %456, %457 : vector<8x256xf32>
    %459 = arith.addf %429, %458 : vector<8x256xf32>
    %460 = vector.broadcast %83 : f32 to vector<8x256xf32>
    %461 = arith.mulf %456, %460 : vector<8x256xf32>
    %462 = arith.addf %432, %461 : vector<8x256xf32>
    %463 = vector.broadcast %99 : f32 to vector<8x256xf32>
    %464 = arith.mulf %456, %463 : vector<8x256xf32>
    %465 = arith.addf %435, %464 : vector<8x256xf32>
    %466 = vector.broadcast %115 : f32 to vector<8x256xf32>
    %467 = arith.mulf %456, %466 : vector<8x256xf32>
    %468 = arith.addf %438, %467 : vector<8x256xf32>
    %469 = vector.broadcast %131 : f32 to vector<8x256xf32>
    %470 = arith.mulf %456, %469 : vector<8x256xf32>
    %471 = arith.addf %441, %470 : vector<8x256xf32>
    %472 = vector.broadcast %147 : f32 to vector<8x256xf32>
    %473 = arith.mulf %456, %472 : vector<8x256xf32>
    %474 = arith.addf %444, %473 : vector<8x256xf32>
    %475 = vector.broadcast %163 : f32 to vector<8x256xf32>
    %476 = arith.mulf %456, %475 : vector<8x256xf32>
    %477 = arith.addf %447, %476 : vector<8x256xf32>
    %478 = vector.broadcast %179 : f32 to vector<8x256xf32>
    %479 = arith.mulf %456, %478 : vector<8x256xf32>
    %480 = arith.addf %450, %479 : vector<8x256xf32>
    %481 = vector.broadcast %36 : f32 to vector<8x256xf32>
    %482 = arith.mulf %26, %481 : vector<8x256xf32>
    %483 = vector.broadcast %52 : f32 to vector<8x256xf32>
    %484 = arith.addf %482, %483 : vector<8x256xf32>
    %cst_368 = arith.constant 0.000000e+00 : f32
    %485 = vector.broadcast %cst_368 : f32 to vector<8x256xf32>
    %486 = arith.maximumf %484, %485 : vector<8x256xf32>
    %487 = vector.broadcast %68 : f32 to vector<8x256xf32>
    %488 = arith.mulf %486, %487 : vector<8x256xf32>
    %489 = arith.addf %459, %488 : vector<8x256xf32>
    %490 = vector.broadcast %84 : f32 to vector<8x256xf32>
    %491 = arith.mulf %486, %490 : vector<8x256xf32>
    %492 = arith.addf %462, %491 : vector<8x256xf32>
    %493 = vector.broadcast %100 : f32 to vector<8x256xf32>
    %494 = arith.mulf %486, %493 : vector<8x256xf32>
    %495 = arith.addf %465, %494 : vector<8x256xf32>
    %496 = vector.broadcast %116 : f32 to vector<8x256xf32>
    %497 = arith.mulf %486, %496 : vector<8x256xf32>
    %498 = arith.addf %468, %497 : vector<8x256xf32>
    %499 = vector.broadcast %132 : f32 to vector<8x256xf32>
    %500 = arith.mulf %486, %499 : vector<8x256xf32>
    %501 = arith.addf %471, %500 : vector<8x256xf32>
    %502 = vector.broadcast %148 : f32 to vector<8x256xf32>
    %503 = arith.mulf %486, %502 : vector<8x256xf32>
    %504 = arith.addf %474, %503 : vector<8x256xf32>
    %505 = vector.broadcast %164 : f32 to vector<8x256xf32>
    %506 = arith.mulf %486, %505 : vector<8x256xf32>
    %507 = arith.addf %477, %506 : vector<8x256xf32>
    %508 = vector.broadcast %180 : f32 to vector<8x256xf32>
    %509 = arith.mulf %486, %508 : vector<8x256xf32>
    %510 = arith.addf %480, %509 : vector<8x256xf32>
    %511 = vector.broadcast %37 : f32 to vector<8x256xf32>
    %512 = arith.mulf %26, %511 : vector<8x256xf32>
    %513 = vector.broadcast %53 : f32 to vector<8x256xf32>
    %514 = arith.addf %512, %513 : vector<8x256xf32>
    %cst_369 = arith.constant 0.000000e+00 : f32
    %515 = vector.broadcast %cst_369 : f32 to vector<8x256xf32>
    %516 = arith.maximumf %514, %515 : vector<8x256xf32>
    %517 = vector.broadcast %69 : f32 to vector<8x256xf32>
    %518 = arith.mulf %516, %517 : vector<8x256xf32>
    %519 = arith.addf %489, %518 : vector<8x256xf32>
    %520 = vector.broadcast %85 : f32 to vector<8x256xf32>
    %521 = arith.mulf %516, %520 : vector<8x256xf32>
    %522 = arith.addf %492, %521 : vector<8x256xf32>
    %523 = vector.broadcast %101 : f32 to vector<8x256xf32>
    %524 = arith.mulf %516, %523 : vector<8x256xf32>
    %525 = arith.addf %495, %524 : vector<8x256xf32>
    %526 = vector.broadcast %117 : f32 to vector<8x256xf32>
    %527 = arith.mulf %516, %526 : vector<8x256xf32>
    %528 = arith.addf %498, %527 : vector<8x256xf32>
    %529 = vector.broadcast %133 : f32 to vector<8x256xf32>
    %530 = arith.mulf %516, %529 : vector<8x256xf32>
    %531 = arith.addf %501, %530 : vector<8x256xf32>
    %532 = vector.broadcast %149 : f32 to vector<8x256xf32>
    %533 = arith.mulf %516, %532 : vector<8x256xf32>
    %534 = arith.addf %504, %533 : vector<8x256xf32>
    %535 = vector.broadcast %165 : f32 to vector<8x256xf32>
    %536 = arith.mulf %516, %535 : vector<8x256xf32>
    %537 = arith.addf %507, %536 : vector<8x256xf32>
    %538 = vector.broadcast %181 : f32 to vector<8x256xf32>
    %539 = arith.mulf %516, %538 : vector<8x256xf32>
    %540 = arith.addf %510, %539 : vector<8x256xf32>
    %541 = vector.broadcast %38 : f32 to vector<8x256xf32>
    %542 = arith.mulf %26, %541 : vector<8x256xf32>
    %543 = vector.broadcast %54 : f32 to vector<8x256xf32>
    %544 = arith.addf %542, %543 : vector<8x256xf32>
    %cst_370 = arith.constant 0.000000e+00 : f32
    %545 = vector.broadcast %cst_370 : f32 to vector<8x256xf32>
    %546 = arith.maximumf %544, %545 : vector<8x256xf32>
    %547 = vector.broadcast %70 : f32 to vector<8x256xf32>
    %548 = arith.mulf %546, %547 : vector<8x256xf32>
    %549 = arith.addf %519, %548 : vector<8x256xf32>
    %550 = vector.broadcast %86 : f32 to vector<8x256xf32>
    %551 = arith.mulf %546, %550 : vector<8x256xf32>
    %552 = arith.addf %522, %551 : vector<8x256xf32>
    %553 = vector.broadcast %102 : f32 to vector<8x256xf32>
    %554 = arith.mulf %546, %553 : vector<8x256xf32>
    %555 = arith.addf %525, %554 : vector<8x256xf32>
    %556 = vector.broadcast %118 : f32 to vector<8x256xf32>
    %557 = arith.mulf %546, %556 : vector<8x256xf32>
    %558 = arith.addf %528, %557 : vector<8x256xf32>
    %559 = vector.broadcast %134 : f32 to vector<8x256xf32>
    %560 = arith.mulf %546, %559 : vector<8x256xf32>
    %561 = arith.addf %531, %560 : vector<8x256xf32>
    %562 = vector.broadcast %150 : f32 to vector<8x256xf32>
    %563 = arith.mulf %546, %562 : vector<8x256xf32>
    %564 = arith.addf %534, %563 : vector<8x256xf32>
    %565 = vector.broadcast %166 : f32 to vector<8x256xf32>
    %566 = arith.mulf %546, %565 : vector<8x256xf32>
    %567 = arith.addf %537, %566 : vector<8x256xf32>
    %568 = vector.broadcast %182 : f32 to vector<8x256xf32>
    %569 = arith.mulf %546, %568 : vector<8x256xf32>
    %570 = arith.addf %540, %569 : vector<8x256xf32>
    %571 = vector.broadcast %39 : f32 to vector<8x256xf32>
    %572 = arith.mulf %26, %571 : vector<8x256xf32>
    %573 = vector.broadcast %55 : f32 to vector<8x256xf32>
    %574 = arith.addf %572, %573 : vector<8x256xf32>
    %cst_371 = arith.constant 0.000000e+00 : f32
    %575 = vector.broadcast %cst_371 : f32 to vector<8x256xf32>
    %576 = arith.maximumf %574, %575 : vector<8x256xf32>
    %577 = vector.broadcast %71 : f32 to vector<8x256xf32>
    %578 = arith.mulf %576, %577 : vector<8x256xf32>
    %579 = arith.addf %549, %578 : vector<8x256xf32>
    %580 = vector.broadcast %87 : f32 to vector<8x256xf32>
    %581 = arith.mulf %576, %580 : vector<8x256xf32>
    %582 = arith.addf %552, %581 : vector<8x256xf32>
    %583 = vector.broadcast %103 : f32 to vector<8x256xf32>
    %584 = arith.mulf %576, %583 : vector<8x256xf32>
    %585 = arith.addf %555, %584 : vector<8x256xf32>
    %586 = vector.broadcast %119 : f32 to vector<8x256xf32>
    %587 = arith.mulf %576, %586 : vector<8x256xf32>
    %588 = arith.addf %558, %587 : vector<8x256xf32>
    %589 = vector.broadcast %135 : f32 to vector<8x256xf32>
    %590 = arith.mulf %576, %589 : vector<8x256xf32>
    %591 = arith.addf %561, %590 : vector<8x256xf32>
    %592 = vector.broadcast %151 : f32 to vector<8x256xf32>
    %593 = arith.mulf %576, %592 : vector<8x256xf32>
    %594 = arith.addf %564, %593 : vector<8x256xf32>
    %595 = vector.broadcast %167 : f32 to vector<8x256xf32>
    %596 = arith.mulf %576, %595 : vector<8x256xf32>
    %597 = arith.addf %567, %596 : vector<8x256xf32>
    %598 = vector.broadcast %183 : f32 to vector<8x256xf32>
    %599 = arith.mulf %576, %598 : vector<8x256xf32>
    %600 = arith.addf %570, %599 : vector<8x256xf32>
    %601 = vector.broadcast %40 : f32 to vector<8x256xf32>
    %602 = arith.mulf %26, %601 : vector<8x256xf32>
    %603 = vector.broadcast %56 : f32 to vector<8x256xf32>
    %604 = arith.addf %602, %603 : vector<8x256xf32>
    %cst_372 = arith.constant 0.000000e+00 : f32
    %605 = vector.broadcast %cst_372 : f32 to vector<8x256xf32>
    %606 = arith.maximumf %604, %605 : vector<8x256xf32>
    %607 = vector.broadcast %72 : f32 to vector<8x256xf32>
    %608 = arith.mulf %606, %607 : vector<8x256xf32>
    %609 = arith.addf %579, %608 : vector<8x256xf32>
    %610 = vector.broadcast %88 : f32 to vector<8x256xf32>
    %611 = arith.mulf %606, %610 : vector<8x256xf32>
    %612 = arith.addf %582, %611 : vector<8x256xf32>
    %613 = vector.broadcast %104 : f32 to vector<8x256xf32>
    %614 = arith.mulf %606, %613 : vector<8x256xf32>
    %615 = arith.addf %585, %614 : vector<8x256xf32>
    %616 = vector.broadcast %120 : f32 to vector<8x256xf32>
    %617 = arith.mulf %606, %616 : vector<8x256xf32>
    %618 = arith.addf %588, %617 : vector<8x256xf32>
    %619 = vector.broadcast %136 : f32 to vector<8x256xf32>
    %620 = arith.mulf %606, %619 : vector<8x256xf32>
    %621 = arith.addf %591, %620 : vector<8x256xf32>
    %622 = vector.broadcast %152 : f32 to vector<8x256xf32>
    %623 = arith.mulf %606, %622 : vector<8x256xf32>
    %624 = arith.addf %594, %623 : vector<8x256xf32>
    %625 = vector.broadcast %168 : f32 to vector<8x256xf32>
    %626 = arith.mulf %606, %625 : vector<8x256xf32>
    %627 = arith.addf %597, %626 : vector<8x256xf32>
    %628 = vector.broadcast %184 : f32 to vector<8x256xf32>
    %629 = arith.mulf %606, %628 : vector<8x256xf32>
    %630 = arith.addf %600, %629 : vector<8x256xf32>
    %631 = vector.broadcast %41 : f32 to vector<8x256xf32>
    %632 = arith.mulf %26, %631 : vector<8x256xf32>
    %633 = vector.broadcast %57 : f32 to vector<8x256xf32>
    %634 = arith.addf %632, %633 : vector<8x256xf32>
    %cst_373 = arith.constant 0.000000e+00 : f32
    %635 = vector.broadcast %cst_373 : f32 to vector<8x256xf32>
    %636 = arith.maximumf %634, %635 : vector<8x256xf32>
    %637 = vector.broadcast %73 : f32 to vector<8x256xf32>
    %638 = arith.mulf %636, %637 : vector<8x256xf32>
    %639 = arith.addf %609, %638 : vector<8x256xf32>
    %640 = vector.broadcast %89 : f32 to vector<8x256xf32>
    %641 = arith.mulf %636, %640 : vector<8x256xf32>
    %642 = arith.addf %612, %641 : vector<8x256xf32>
    %643 = vector.broadcast %105 : f32 to vector<8x256xf32>
    %644 = arith.mulf %636, %643 : vector<8x256xf32>
    %645 = arith.addf %615, %644 : vector<8x256xf32>
    %646 = vector.broadcast %121 : f32 to vector<8x256xf32>
    %647 = arith.mulf %636, %646 : vector<8x256xf32>
    %648 = arith.addf %618, %647 : vector<8x256xf32>
    %649 = vector.broadcast %137 : f32 to vector<8x256xf32>
    %650 = arith.mulf %636, %649 : vector<8x256xf32>
    %651 = arith.addf %621, %650 : vector<8x256xf32>
    %652 = vector.broadcast %153 : f32 to vector<8x256xf32>
    %653 = arith.mulf %636, %652 : vector<8x256xf32>
    %654 = arith.addf %624, %653 : vector<8x256xf32>
    %655 = vector.broadcast %169 : f32 to vector<8x256xf32>
    %656 = arith.mulf %636, %655 : vector<8x256xf32>
    %657 = arith.addf %627, %656 : vector<8x256xf32>
    %658 = vector.broadcast %185 : f32 to vector<8x256xf32>
    %659 = arith.mulf %636, %658 : vector<8x256xf32>
    %660 = arith.addf %630, %659 : vector<8x256xf32>
    %661 = vector.broadcast %42 : f32 to vector<8x256xf32>
    %662 = arith.mulf %26, %661 : vector<8x256xf32>
    %663 = vector.broadcast %58 : f32 to vector<8x256xf32>
    %664 = arith.addf %662, %663 : vector<8x256xf32>
    %cst_374 = arith.constant 0.000000e+00 : f32
    %665 = vector.broadcast %cst_374 : f32 to vector<8x256xf32>
    %666 = arith.maximumf %664, %665 : vector<8x256xf32>
    %667 = vector.broadcast %74 : f32 to vector<8x256xf32>
    %668 = arith.mulf %666, %667 : vector<8x256xf32>
    %669 = arith.addf %639, %668 : vector<8x256xf32>
    %670 = vector.broadcast %90 : f32 to vector<8x256xf32>
    %671 = arith.mulf %666, %670 : vector<8x256xf32>
    %672 = arith.addf %642, %671 : vector<8x256xf32>
    %673 = vector.broadcast %106 : f32 to vector<8x256xf32>
    %674 = arith.mulf %666, %673 : vector<8x256xf32>
    %675 = arith.addf %645, %674 : vector<8x256xf32>
    %676 = vector.broadcast %122 : f32 to vector<8x256xf32>
    %677 = arith.mulf %666, %676 : vector<8x256xf32>
    %678 = arith.addf %648, %677 : vector<8x256xf32>
    %679 = vector.broadcast %138 : f32 to vector<8x256xf32>
    %680 = arith.mulf %666, %679 : vector<8x256xf32>
    %681 = arith.addf %651, %680 : vector<8x256xf32>
    %682 = vector.broadcast %154 : f32 to vector<8x256xf32>
    %683 = arith.mulf %666, %682 : vector<8x256xf32>
    %684 = arith.addf %654, %683 : vector<8x256xf32>
    %685 = vector.broadcast %170 : f32 to vector<8x256xf32>
    %686 = arith.mulf %666, %685 : vector<8x256xf32>
    %687 = arith.addf %657, %686 : vector<8x256xf32>
    %688 = vector.broadcast %186 : f32 to vector<8x256xf32>
    %689 = arith.mulf %666, %688 : vector<8x256xf32>
    %690 = arith.addf %660, %689 : vector<8x256xf32>
    %cst_375 = arith.constant 0.000000e+00 : f32
    %691 = vector.broadcast %cst_375 : f32 to vector<8x256xf32>
    %692 = arith.maximumf %669, %691 : vector<8x256xf32>
    %693 = vector.broadcast %195 : f32 to vector<8x256xf32>
    %694 = arith.mulf %692, %693 : vector<8x256xf32>
    %cst_376 = arith.constant 0.000000e+00 : f32
    %695 = vector.broadcast %cst_376 : f32 to vector<8x256xf32>
    %696 = arith.maximumf %672, %695 : vector<8x256xf32>
    %697 = vector.broadcast %196 : f32 to vector<8x256xf32>
    %698 = arith.mulf %696, %697 : vector<8x256xf32>
    %699 = arith.addf %694, %698 : vector<8x256xf32>
    %cst_377 = arith.constant 0.000000e+00 : f32
    %700 = vector.broadcast %cst_377 : f32 to vector<8x256xf32>
    %701 = arith.maximumf %675, %700 : vector<8x256xf32>
    %702 = vector.broadcast %197 : f32 to vector<8x256xf32>
    %703 = arith.mulf %701, %702 : vector<8x256xf32>
    %704 = arith.addf %699, %703 : vector<8x256xf32>
    %cst_378 = arith.constant 0.000000e+00 : f32
    %705 = vector.broadcast %cst_378 : f32 to vector<8x256xf32>
    %706 = arith.maximumf %678, %705 : vector<8x256xf32>
    %707 = vector.broadcast %198 : f32 to vector<8x256xf32>
    %708 = arith.mulf %706, %707 : vector<8x256xf32>
    %709 = arith.addf %704, %708 : vector<8x256xf32>
    %cst_379 = arith.constant 0.000000e+00 : f32
    %710 = vector.broadcast %cst_379 : f32 to vector<8x256xf32>
    %711 = arith.maximumf %681, %710 : vector<8x256xf32>
    %712 = vector.broadcast %199 : f32 to vector<8x256xf32>
    %713 = arith.mulf %711, %712 : vector<8x256xf32>
    %714 = arith.addf %709, %713 : vector<8x256xf32>
    %cst_380 = arith.constant 0.000000e+00 : f32
    %715 = vector.broadcast %cst_380 : f32 to vector<8x256xf32>
    %716 = arith.maximumf %684, %715 : vector<8x256xf32>
    %717 = vector.broadcast %200 : f32 to vector<8x256xf32>
    %718 = arith.mulf %716, %717 : vector<8x256xf32>
    %719 = arith.addf %714, %718 : vector<8x256xf32>
    %cst_381 = arith.constant 0.000000e+00 : f32
    %720 = vector.broadcast %cst_381 : f32 to vector<8x256xf32>
    %721 = arith.maximumf %687, %720 : vector<8x256xf32>
    %722 = vector.broadcast %201 : f32 to vector<8x256xf32>
    %723 = arith.mulf %721, %722 : vector<8x256xf32>
    %724 = arith.addf %719, %723 : vector<8x256xf32>
    %cst_382 = arith.constant 0.000000e+00 : f32
    %725 = vector.broadcast %cst_382 : f32 to vector<8x256xf32>
    %726 = arith.maximumf %690, %725 : vector<8x256xf32>
    %727 = vector.broadcast %202 : f32 to vector<8x256xf32>
    %728 = arith.mulf %726, %727 : vector<8x256xf32>
    %729 = arith.addf %724, %728 : vector<8x256xf32>
    %cst_383 = arith.constant dense<0xFF800000> : vector<256xf32>
    %730 = vector.multi_reduction <maximumf>, %729, %cst_383 [0] : vector<8x256xf32> to vector<256xf32>
    %731 = vector.shape_cast %730 : vector<256xf32> to vector<1x256xf32>
    %c0_384 = arith.constant 0 : index
    %c0_385 = arith.constant 0 : index
    %732 = memref.load %arg11[%c0_384, %c0_385] : memref<1x1xf32, #tpu.memory_space<smem>>
    %733 = vector.broadcast %732 : f32 to vector<1x256xf32>
    %734 = arith.addf %731, %733 : vector<1x256xf32>
    %735 = arith.negf %734 : vector<1x256xf32>
    %736 = math.exp %735 : vector<1x256xf32>
    %cst_386 = arith.constant 1.000000e+00 : f32
    %737 = vector.broadcast %cst_386 : f32 to vector<1x256xf32>
    %738 = arith.addf %737, %736 : vector<1x256xf32>
    %739 = arith.divf %737, %738 : vector<1x256xf32>
    %c0_i32 = arith.constant 0 : i32
    %740 = arith.cmpi eq, %arg2, %c0_i32 : i32
    %741 = arith.extui %740 : i1 to i32
    %c0_i32_387 = arith.constant 0 : i32
    %742 = arith.cmpi ne, %741, %c0_i32_387 : i32
    scf.if %742 {
      %cst_401 = arith.constant 0.000000e+00 : f32
      %757 = vector.broadcast %cst_401 : f32 to vector<8x256xf32>
      %c0_402 = arith.constant 0 : index
      %c0_403 = arith.constant 0 : index
      %758 = vector.load %arg17[%c0_402, %c0_403] : memref<8x256xf32, #tpu.memory_space<vmem>>, vector<8x256xf32>
      tpu.vector_store %arg17[%c0_402, %c0_403], %757 {strides = array<i32>} : memref<8x256xf32, #tpu.memory_space<vmem>>, vector<8x256xf32>,
      %cst_404 = arith.constant 9.99999974E-6 : f32
      %759 = vector.broadcast %cst_404 : f32 to vector<1x256xf32>
      %c0_405 = arith.constant 0 : index
      %c0_406 = arith.constant 0 : index
      %760 = vector.load %arg18[%c0_405, %c0_406] : memref<1x256xf32, #tpu.memory_space<vmem>>, vector<1x256xf32>
      tpu.vector_store %arg18[%c0_405, %c0_406], %759 {strides = array<i32>} : memref<1x256xf32, #tpu.memory_space<vmem>>, vector<1x256xf32>,
    } else {
    }
    %c0_388 = arith.constant 0 : index
    %c0_389 = arith.constant 0 : index
    %743 = vector.load %arg17[%c0_388, %c0_389] : memref<8x256xf32, #tpu.memory_space<vmem>>, vector<8x256xf32>
    %744 = vector.broadcast %739 : vector<1x256xf32> to vector<8x256xf32>
    %745 = arith.mulf %26, %744 : vector<8x256xf32>
    %746 = arith.addf %743, %745 : vector<8x256xf32>
    %c0_390 = arith.constant 0 : index
    %c0_391 = arith.constant 0 : index
    %747 = vector.load %arg17[%c0_390, %c0_391] : memref<8x256xf32, #tpu.memory_space<vmem>>, vector<8x256xf32>
    tpu.vector_store %arg17[%c0_390, %c0_391], %746 {strides = array<i32>} : memref<8x256xf32, #tpu.memory_space<vmem>>, vector<8x256xf32>,
    %c0_392 = arith.constant 0 : index
    %c0_393 = arith.constant 0 : index
    %748 = vector.load %arg18[%c0_392, %c0_393] : memref<1x256xf32, #tpu.memory_space<vmem>>, vector<1x256xf32>
    %749 = arith.addf %748, %739 : vector<1x256xf32>
    %c0_394 = arith.constant 0 : index
    %c0_395 = arith.constant 0 : index
    %750 = vector.load %arg18[%c0_394, %c0_395] : memref<1x256xf32, #tpu.memory_space<vmem>>, vector<1x256xf32>
    tpu.vector_store %arg18[%c0_394, %c0_395], %749 {strides = array<i32>} : memref<1x256xf32, #tpu.memory_space<vmem>>, vector<1x256xf32>,
    %c0_396 = arith.constant 0 : index
    %c0_397 = arith.constant 0 : index
    %c0_398 = arith.constant 0 : index
    %c0_399 = arith.constant 0 : index
    %751 = vector.load %arg12[%c0_396, %c0_397, %c0_398, %c0_399] : memref<1x1x1x256xf32, #tpu.memory_space<vmem>>, vector<1x1x1x256xf32>
    %752 = vector.shape_cast %751 : vector<1x1x1x256xf32> to vector<1x256xf32>
    %753 = vector.shape_cast %739 : vector<1x256xf32> to vector<1x1x1x256xf32>
    tpu.vector_store %arg12[%c0_396, %c0_397, %c0_398, %c0_399], %753 {strides = array<i32>} : memref<1x1x1x256xf32, #tpu.memory_space<vmem>>, vector<1x1x1x256xf32>,
    %c1_i32 = arith.constant 1 : i32
    %754 = arith.cmpi eq, %arg2, %c1_i32 : i32
    %755 = arith.extui %754 : i1 to i32
    %c0_i32_400 = arith.constant 0 : i32
    %756 = arith.cmpi ne, %755, %c0_i32_400 : i32
    scf.if %756 {
      %c0_401 = arith.constant 0 : index
      %c0_402 = arith.constant 0 : index
      %757 = vector.load %arg17[%c0_401, %c0_402] : memref<8x256xf32, #tpu.memory_space<vmem>>, vector<8x256xf32>
      %c0_403 = arith.constant 0 : index
      %c0_404 = arith.constant 0 : index
      %758 = vector.load %arg18[%c0_403, %c0_404] : memref<1x256xf32, #tpu.memory_space<vmem>>, vector<1x256xf32>
      %759 = tpu.reciprocal %758 : vector<1x256xf32> -> vector<1x256xf32>
      %760 = vector.broadcast %759 : vector<1x256xf32> to vector<8x256xf32>
      %761 = arith.mulf %757, %760 : vector<8x256xf32>
      %c0_405 = arith.constant 0 : index
      %c0_406 = arith.constant 0 : index
      %c0_407 = arith.constant 0 : index
      %762 = vector.load %arg5[%c0_405, %c0_406, %c0_407] : memref<1x8x256xf32, #tpu.memory_space<vmem>>, vector<1x8x256xf32>
      %763 = vector.shape_cast %762 : vector<1x8x256xf32> to vector<8x256xf32>
      %cst_408 = arith.constant dense<0xFF800000> : vector<256xf32>
      %764 = vector.multi_reduction <maximumf>, %761, %cst_408 [0] : vector<8x256xf32> to vector<256xf32>
      %765 = vector.shape_cast %764 : vector<256xf32> to vector<1x256xf32>
      %766 = vector.broadcast %765 : vector<1x256xf32> to vector<8x256xf32>
      %767 = arith.subf %761, %766 : vector<8x256xf32>
      %768 = math.exp %767 : vector<8x256xf32>
      %cst_409 = arith.constant dense<0.000000e+00> : vector<256xf32>
      %769 = vector.multi_reduction <add>, %768, %cst_409 [0] : vector<8x256xf32> to vector<256xf32>
      %770 = vector.shape_cast %769 : vector<256xf32> to vector<1x256xf32>
      %771 = tpu.reciprocal %770 : vector<1x256xf32> -> vector<1x256xf32>
      %772 = vector.broadcast %771 : vector<1x256xf32> to vector<8x256xf32>
      %773 = arith.mulf %768, %772 : vector<8x256xf32>
      %c0_410 = arith.constant 0 : index
      %c0_411 = arith.constant 0 : index
      %c0_412 = arith.constant 0 : index
      %774 = vector.load %arg13[%c0_410, %c0_411, %c0_412] : memref<1x8x256xf32, #tpu.memory_space<vmem>>, vector<1x8x256xf32>
      %775 = vector.shape_cast %774 : vector<1x8x256xf32> to vector<8x256xf32>
      %776 = vector.shape_cast %773 : vector<8x256xf32> to vector<1x8x256xf32>
      tpu.vector_store %arg13[%c0_410, %c0_411, %c0_412], %776 {strides = array<i32>} : memref<1x8x256xf32, #tpu.memory_space<vmem>>, vector<1x8x256xf32>,
      %777 = arith.mulf %773, %763 : vector<8x256xf32>
      %cst_413 = arith.constant dense<0.000000e+00> : vector<256xf32>
      %778 = vector.multi_reduction <add>, %777, %cst_413 [0] : vector<8x256xf32> to vector<256xf32>
      %779 = vector.shape_cast %778 : vector<256xf32> to vector<1x256xf32>
      %c0_414 = arith.constant 0 : index
      %c0_415 = arith.constant 0 : index
      %c0_416 = arith.constant 0 : index
      %780 = vector.load %arg14[%c0_414, %c0_415, %c0_416] : memref<1x1x256xf32, #tpu.memory_space<vmem>>, vector<1x1x256xf32>
      %781 = vector.shape_cast %780 : vector<1x1x256xf32> to vector<1x256xf32>
      %782 = vector.shape_cast %779 : vector<1x256xf32> to vector<1x1x256xf32>
      tpu.vector_store %arg14[%c0_414, %c0_415, %c0_416], %782 {strides = array<i32>} : memref<1x1x256xf32, #tpu.memory_space<vmem>>, vector<1x1x256xf32>,
      %c0_417 = arith.constant 0 : index
      %c0_418 = arith.constant 0 : index
      %c0_419 = arith.constant 0 : index
      %783 = vector.load %arg16[%c0_417, %c0_418, %c0_419] : memref<1x1x256xf32, #tpu.memory_space<vmem>>, vector<1x1x256xf32>
      %784 = vector.shape_cast %783 : vector<1x1x256xf32> to vector<1x256xf32>
      %785 = vector.shape_cast %771 : vector<1x256xf32> to vector<1x1x256xf32>
      tpu.vector_store %arg16[%c0_417, %c0_418, %c0_419], %785 {strides = array<i32>} : memref<1x1x256xf32, #tpu.memory_space<vmem>>, vector<1x1x256xf32>,
      %786 = tpu.iota {dimensions = array<i32: 0>} : vector<8x256xi32>
      %787 = vector.broadcast %765 : vector<1x256xf32> to vector<8x256xf32>
      %788 = arith.cmpf oge, %761, %787 : vector<8x256xf32>
      %c8_i32 = arith.constant 8 : i32
      %789 = vector.broadcast %c8_i32 : i32 to vector<8x256xi32>
      %790 = arith.select %788, %786, %789 : vector<8x256xi1>, vector<8x256xi32>
      %cst_420 = arith.constant dense<2147483647> : vector<256xi32>
      %791 = vector.multi_reduction <minsi>, %790, %cst_420 [0] : vector<8x256xi32> to vector<256xi32>
      %792 = vector.shape_cast %791 : vector<256xi32> to vector<1x256xi32>
      %793 = vector.broadcast %792 : vector<1x256xi32> to vector<8x256xi32>
      %794 = arith.cmpi eq, %786, %793 : vector<8x256xi32>
      %cst_421 = arith.constant 0.000000e+00 : f32
      %795 = vector.broadcast %cst_421 : f32 to vector<8x256xf32>
      %796 = arith.select %794, %763, %795 : vector<8x256xi1>, vector<8x256xf32>
      %cst_422 = arith.constant dense<0.000000e+00> : vector<256xf32>
      %797 = vector.multi_reduction <add>, %796, %cst_422 [0] : vector<8x256xf32> to vector<256xf32>
      %798 = vector.shape_cast %797 : vector<256xf32> to vector<1x256xf32>
      %c0_423 = arith.constant 0 : index
      %c0_424 = arith.constant 0 : index
      %c0_425 = arith.constant 0 : index
      %799 = vector.load %arg15[%c0_423, %c0_424, %c0_425] : memref<1x1x256xf32, #tpu.memory_space<vmem>>, vector<1x1x256xf32>
      %800 = vector.shape_cast %799 : vector<1x1x256xf32> to vector<1x256xf32>
      %801 = vector.shape_cast %798 : vector<1x256xf32> to vector<1x1x256xf32>
      tpu.vector_store %arg15[%c0_423, %c0_424, %c0_425], %801 {strides = array<i32>} : memref<1x1x256xf32, #tpu.memory_space<vmem>>, vector<1x1x256xf32>,
    } else {
    }
    return
  }
  func.func @transform_0(%arg0: i32, %arg1: i32, %arg2: i32) -> (i32, i32, i32, i32, i32) {
    %c0_i32 = arith.constant 0 : i32
    %c0_i32_0 = arith.constant 0 : i32
    %c0_i32_1 = arith.constant 0 : i32
    return %arg0, %arg2, %c0_i32, %c0_i32_0, %arg1 : i32, i32, i32, i32, i32
  }
  func.func @transform_1(%arg0: i32, %arg1: i32, %arg2: i32) -> (i32, i32, i32) {
    %c0_i32 = arith.constant 0 : i32
    %c0_i32_0 = arith.constant 0 : i32
    return %arg0, %c0_i32, %arg1 : i32, i32, i32
  }
  func.func @transform_2(%arg0: i32, %arg1: i32, %arg2: i32) -> (i32, i32, i32) {
    %c0_i32 = arith.constant 0 : i32
    %c0_i32_0 = arith.constant 0 : i32
    return %arg0, %c0_i32, %arg1 : i32, i32, i32
  }
  func.func @transform_3(%arg0: i32, %arg1: i32, %arg2: i32) -> (i32, i32) {
    %c0_i32 = arith.constant 0 : i32
    %c0_i32_0 = arith.constant 0 : i32
    %c0_i32_1 = arith.constant 0 : i32
    return %c0_i32, %c0_i32_0 : i32, i32
  }
  func.func @transform_4(%arg0: i32, %arg1: i32, %arg2: i32) -> (i32, i32) {
    %c0_i32 = arith.constant 0 : i32
    %c0_i32_0 = arith.constant 0 : i32
    %c0_i32_1 = arith.constant 0 : i32
    return %c0_i32, %c0_i32_0 : i32, i32
  }
  func.func @transform_5(%arg0: i32, %arg1: i32, %arg2: i32) -> (i32, i32) {
    %c0_i32 = arith.constant 0 : i32
    %c0_i32_0 = arith.constant 0 : i32
    %c0_i32_1 = arith.constant 0 : i32
    return %c0_i32, %c0_i32_0 : i32, i32
  }
  func.func @transform_6(%arg0: i32, %arg1: i32, %arg2: i32) -> (i32, i32) {
    %c0_i32 = arith.constant 0 : i32
    %c0_i32_0 = arith.constant 0 : i32
    %c0_i32_1 = arith.constant 0 : i32
    return %c0_i32, %c0_i32_0 : i32, i32
  }
  func.func @transform_7(%arg0: i32, %arg1: i32, %arg2: i32) -> (i32, i32) {
    %c0_i32 = arith.constant 0 : i32
    %c0_i32_0 = arith.constant 0 : i32
    %c0_i32_1 = arith.constant 0 : i32
    return %c0_i32, %c0_i32_0 : i32, i32
  }
  func.func @transform_8(%arg0: i32, %arg1: i32, %arg2: i32) -> (i32, i32) {
    %c0_i32 = arith.constant 0 : i32
    %c0_i32_0 = arith.constant 0 : i32
    %c0_i32_1 = arith.constant 0 : i32
    return %c0_i32, %c0_i32_0 : i32, i32
  }
  func.func @transform_9(%arg0: i32, %arg1: i32, %arg2: i32) -> (i32, i32, i32, i32) {
    %c0_i32 = arith.constant 0 : i32
    %c0_i32_0 = arith.constant 0 : i32
    return %arg0, %arg2, %c0_i32, %arg1 : i32, i32, i32, i32
  }
  func.func @transform_10(%arg0: i32, %arg1: i32, %arg2: i32) -> (i32, i32, i32) {
    %c0_i32 = arith.constant 0 : i32
    %c0_i32_0 = arith.constant 0 : i32
    return %arg0, %c0_i32, %arg1 : i32, i32, i32
  }
  func.func @transform_11(%arg0: i32, %arg1: i32, %arg2: i32) -> (i32, i32, i32) {
    %c0_i32 = arith.constant 0 : i32
    %c0_i32_0 = arith.constant 0 : i32
    return %arg0, %c0_i32, %arg1 : i32, i32, i32
  }
  func.func @transform_12(%arg0: i32, %arg1: i32, %arg2: i32) -> (i32, i32, i32) {
    %c0_i32 = arith.constant 0 : i32
    %c0_i32_0 = arith.constant 0 : i32
    return %arg0, %c0_i32, %arg1 : i32, i32, i32
  }
  func.func @transform_13(%arg0: i32, %arg1: i32, %arg2: i32) -> (i32, i32, i32) {
    %c0_i32 = arith.constant 0 : i32
    %c0_i32_0 = arith.constant 0 : i32
    return %arg0, %c0_i32, %arg1 : i32, i32, i32
  }
}

</mosaic_0001>

<bundles_post_ra>
// kernel: tpu_custom_call.1
= control target key start
LH: loop header
LB: loop body
LE: loop exit
PB: predicated region body
PF: predicated region fallthrough
CT: control target
= control target key end

     0   :  { %s4778_s0 = inlined_call_operand.hbm [shape: f32[2,2,4,8,256], index: 0, kind: input, shape index: {}]   ;;  %s4779_s1 = inlined_call_operand.hbm [shape: f32[2,4,256], index: 1, kind: input, shape index: {}]   ;;  %s4780_s2 = inlined_call_operand.hbm [shape: f32[2,8,256], index: 2, kind: input, shape index: {}]   ;;  %s4781_s3 = inlined_call_operand.vmem [shape: f32[1,16], index: 3, kind: input, shape index: {}]   ;;  %s4782_s4 = inlined_call_operand.vmem [shape: f32[1,16], index: 4, kind: input, shape index: {}]   ;;  %s4783_s5 = inlined_call_operand.hbm [shape: f32[8,16], index: 5, kind: input, shape index: {}]   ;;  %s4784_s6 = inlined_call_operand.vmem [shape: f32[1,8], index: 6, kind: input, shape index: {}]   ;;  %s4785_s7 = inlined_call_operand.vmem [shape: f32[1,8], index: 7, kind: input, shape index: {}]   ;;  %s4786_s8 = inlined_call_operand.<no memory space> [shape: f32[1,1], index: 8, kind: input, shape index: {}]   ;;  %s4787_s9 = inlined_call_operand.hbm [shape: f32[2,2,1,256], index: 9, kind: output, shape index: {0}]   ;;  %s4788_s10 = inlined_call_operand.hbm [shape: f32[2,8,256], index: 10, kind: output, shape index: {1}]   ;;  %s4789_s11 = inlined_call_operand.hbm [shape: f32[2,1,256], index: 11, kind: output, shape index: {2}]   ;;  %s4790_s12 = inlined_call_operand.hbm [shape: f32[2,1,256], index: 12, kind: output, shape index: {3}]   ;;  %s4791_s13 = inlined_call_operand.hbm [shape: f32[2,1,256], index: 13, kind: output, shape index: {4}]  }
   0x1   :  { %4831 = sst [smem:[#allocation77_spill]] %s4778_s0 }
   0x2   :  { %4832 = sst [smem:[#allocation78_spill]] %s4779_s1 }
   0x3   :  { %4833 = sst [smem:[#allocation79_spill]] %s4780_s2 }
   0x4   :  { %4834 = sst [smem:[#allocation80_spill]] %s4781_s3 }
   0x5   :  { %4835 = sst [smem:[#allocation81_spill]] %s4782_s4 }
   0x6   :  { %4836 = sst [smem:[#allocation82_spill]] %s4783_s5 }
   0x7   :  { %4837 = sst [smem:[#allocation83_spill]] %s4784_s6 }
   0x8   :  { %4838 = sst [smem:[#allocation84_spill]] %s4785_s7 }
   0x9   :  { %4839 = sst [smem:[#allocation85_spill]] %s4787_s9 }
   0xa   :  { %4840 = sst [smem:[#allocation86_spill]] %s4788_s10 }
   0xb   :  { %4841 = sst [smem:[#allocation87_spill]] %s4789_s11 }
   0xc   :  { %4842 = sst [smem:[#allocation88_spill]] %s4790_s12 }
   0xd   :  { %4843 = sst [smem:[#allocation89_spill]] %s4791_s13 }
   0xe   :  { %19 = sst [smem:[#allocation4]] %s4786_s8 }
   0xf   :  { %20 = vsyncpa [#allocation6], 0 }
  0x10   :  { %22 = vsyncpa [#allocation6 + $0x1], 0 }
  0x11   :  { %23 = vsyncpa [#allocation11], 0 }
  0x12   :  { %25 = vsyncpa [#allocation11 + $0x1], 0 }
  0x13   :  { %26 = vsyncpa [#allocation9], 0 }
  0x14   :  { %27 = vsyncpa [#allocation15], 0 }
  0x15   :  { %28 = vsyncpa [#allocation8], 0 }
  0x16   :  { %29 = vsyncpa [#allocation19], 0 }
  0x17   :  { %30 = vsyncpa [#allocation7], 0 }
  0x18   :  { %32 = vsyncpa [#allocation7 + $0x1], 0 }
  0x19   :  { %33 = vsyncpa [#allocation22], 0 }
  0x1a   :  { %35 = vsyncpa [#allocation22 + $0x1], 0 }
  0x1b   :  { %36 = vsyncpa [#allocation25], 0 }
  0x1c   :  { %38 = vsyncpa [#allocation25 + $0x1], 0  ;;  %s3390_s27 = smov 0   ;;  %s3392_s28 = smov 0  }
  0x1d   :  { %s3394_s29 = smov 0   ;;  %s3396_s8 = smov 0  }
  0x1e   :  { %s3398_s30 = smov 0   ;;  %s3400_s14 = smov 0  }
  0x1f   :  { %s3402_s15 = smov 0   ;;  %s3404_s16 = smov 0  }
  0x20   :  { %s3406_s17 = smov 0   ;;  %s3408_s18 = smov 0  }
  0x21   :  { %s3410_s19 = smov 0  }
  0x22 LB: > { %4844 = sst [smem:[#allocation37_spill]] %s3270_s28  ;;  %s3449_s23 = sadd.s32 4294967295, %s3306_s19   ;;  %s3306_s19 = sphi %s3410_s19, %s44_s19   ;;  %s3302_s18 = sphi %s3408_s18, %s4993_s18   ;;  %s3298_s17 = sphi %s3406_s17, %s4992_s17   ;;  %s3294_s16 = sphi %s3404_s16, %s4991_s16   ;;  %s3290_s15 = sphi %s3402_s15, %s4990_s15   ;;  %s3286_s14 = sphi %s3400_s14, %s4989_s14   ;;  %s3282_s30 = sphi %s3398_s30, %s4988_s30   ;;  %s3278_s8 = sphi %s3396_s8, %s4987_s8   ;;  %s3274_s29 = sphi %s3394_s29, %s4986_s29   ;;  %s3270_s28 = sphi %s3392_s28, %s4985_s28   ;;  %s3266_s27 = sphi %s3390_s27, %s4984_s27  }
  0x23   : > { %4845 = sst [smem:[#allocation38_spill]] %s3274_s29  ;;  %p2441_p0 = scmp.ge.s32.totalorder %s3306_s19, 1 }
  0x24   : > { %4846 = sst [smem:[#allocation39_spill]] %s3278_s8  ;;  %p4798_p1 = scmp.eq.s32.totalorder %s3449_s23, 0 }
  0x25   : > { %4847 = sst [smem:[#allocation40_spill]] %s3282_s30  ;;  %p422_p2 = scmp.lt.s32.totalorder %s3306_s19, 5 }
  0x26   : > { %4848 = sst [smem:[#allocation41_spill]] %s3286_s14  ;;  %s3308_s26 = smov [#allocation14]  }
  0x27   : > { %4849 = sst [smem:[#allocation42_spill]] %s3290_s15  ;;  %p3454_p3 = pnand %p2441_p0, %p422_p2 }
  0x28   : > { %4850 = sst [smem:[#allocation43_spill]] %s3294_s16  ;;  %s4799_s20 = sadd.s32 4294967294, %s3306_s19  }
  0x29   : > { %4851 = sst [smem:[#allocation44_spill]] %s3298_s17  ;;  %p2706_p4 = pneg %p3454_p3 }
  0x2a   : > { %4852 = sst [smem:[#allocation45_spill]] %s3302_s18  ;;  %p4793_p6 = scmp.ne.s32.totalorder %s3286_s14, %s3282_s30 }
  0x2b   : > { %s4853_s4 = sld [smem:[#allocation81_spill]]  ;;  %p3462_p5 = pnand %p2706_p4, %p4798_p1 }
  0x2c   : > { %4854 = sst [smem:[#allocation46_spill]] %s3449_s23  ;;  %p82_p7 = scmp.eq.s32.totalorder %s3306_s19, 0 }
  0x2d   : > { %s4855_s24 = scalar_select %p3454_p3, 1, 0 }
  0x2e   : > { %s4856_s25 = scalar_select %p3462_p5, 1, 0 }
  0x2f   : > { %p87_p8 = scmp.ne.s32.totalorder %s3282_s30, %s3278_s8  ;;  %p109_p9 = scmp.ne.s32.totalorder %s3274_s29, %s3270_s28 }
  0x30   : > { %p83_p10 = por %p82_p7, %p4793_p6  ;;  %p115_p13 = scmp.ne.s32.totalorder %s3270_s28, %s3266_s27 }
  0x31   : > { %s444_s22 = sshll.u32 %s4853_s4, 4  ;;  %p3483_p11 = por %p4798_p1, %p87_p8  ;;  %s445_s22 = int_to_ptr.vmem [resolvable:$true] %s444_s22 }
  0x32   : > { %2712 = dma.vmem_to_smem (!%p3462_p5), %s445_s22, 16, %s3308_s26, [#allocation15]  }
  0x33   : > { %s4857_s13 = scalar_select %p3483_p11, 1, 0 }
  0x34   : > { %p3487_p12 = por %p109_p9, %p82_p7  ;;  %p297_p0 = scmp.eq.s32.totalorder %s3449_s23, 3 }
  0x35   : > { %p303_p2 = scmp.eq.s32.totalorder %s4799_s20, 3  ;;  %p3498_p4 = por %p115_p13, %p4798_p1 }
  0x36   : > { %p2753_p6 = scmp.lt.s32.totalorder %s3306_s19, 4  ;;  %p4861_p3 = scmp.ne.s32.totalorder %s3286_s14, %s3282_s30 }
  0x37   : > { %s4859_s26 = scalar_select %p3498_p4, 1, 0 }
  0x38   : > { %p3506_p5 = por %p297_p0, %p4861_p3  ;;  %p3510_p7 = por %p303_p2, %p87_p8 }
  0x39   : > { %4860 = sst [smem:[#allocation47_spill]] %s4859_s26  ;;  %p3514_p11 = por %p297_p0, %p109_p9 }
  0x3a   : > { %s4862_s4 = scalar_select %p3506_p5, 1, 0 }
  0x3b   : > { %s4864_s21 = scalar_select %p3510_p7, 1, 0 }
  0x3c   : > { %4863 = sst [smem:[#allocation48_spill]] %s4862_s4  ;;  %p3518_p1 = por %p303_p2, %p115_p13 }
  0x3d   : > { %4865 = sst [smem:[#allocation49_spill]] %s4864_s21  ;;  %p3524_p4 = pnand %p2753_p6, %p83_p10 }
  0x3e   : > { %s4866_s27 = scalar_select %p3514_p11, 1, 0 }
  0x3f   : > { %s4868_s20 = scalar_select %p3518_p1, 1, 0 }
  0x40   : > { %4867 = sst [smem:[#allocation50_spill]] %s4866_s27  ;;  %s514_s11 = sand.u32 1, %s3306_s19  }
  0x41   : > { %4869 = sst [smem:[#allocation51_spill]] %s4868_s20  ;;  %s516_s9 = sand.u32 1, %s3274_s29  }
  0x42   : > { %s2452_s4 = sshll.u32 %s516_s9, 3  ;;  %s2667_s12 = sshll.u32 %s3302_s18, 3 }
  0x43   : > { %s4871_s1 = sld [smem:[#allocation78_spill]]  ;;  %s518_s15 = scalar_lea.vmem [#allocation10], %s2452_s4 }
  0x44   : > { %s529_s27 = sshll.u32 %s518_s15, 4  ;;  %p3538_p3 = pnand %p2753_p6, %p3487_p12  ;;  %s530_s27 = int_to_ptr.vmem [resolvable:$true] %s529_s27 }
  0x45   : > { %s3542_s28 = sshll.u32 %s516_s9, 4  ;;  %s3544_s23 = scalar_lea.sflag [#allocation11], %s514_s11 }
  0x46   : > { %s4873_s3 = sld [smem:[#allocation80_spill]]  ;;  %s3309_s9 = smov [#allocation13]  }
  0x47   : > { %s4874_s5 = sld [smem:[#allocation82_spill]]  ;;  %p4875_p6 = scmp.ne.s32.totalorder %s4856_s25, 0 }
  0x48   : > { %s3310_s11 = smov [#allocation16]   ;;  %s4876_s6 = sld [smem:[#allocation83_spill]] }
  0x49   : > { %s525_s16 = scalar_lea.hbm %s4871_s1, %s2667_s12  ;;  %s4877_s7 = sld [smem:[#allocation84_spill]] }
  0x4a   : > { %s527_s26 = sshll.u32 %s525_s16, 4  ;;  %s3311_s16 = smov [#allocation17]   ;;  %s528_s26 = int_to_ptr.hbm [resolvable:$true] %s527_s26 }
  0x4b   : > { %2728 = dma.hbm_to_vmem [thread:$0]  (!%p3538_p3), %s528_s26, 128, %s530_s27, %s3544_s23  }
  0x4c   : > { %s434_s12 = sshll.u32 %s4873_s3, 4  ;;  %s2449_s26 = sshll.u32 %s3298_s17, 3  ;;  %s435_s12 = int_to_ptr.vmem [resolvable:$true] %s434_s12 }
  0x4d   : > { %s454_s21 = sshll.u32 %s4874_s5, 4  ;;  %s4879_s1 = sadd.s32 1, %s3302_s18  ;;  %s455_s21 = int_to_ptr.hbm [resolvable:$true] %s454_s21 }
  0x4e   : > { %2709 = dma.vmem_to_smem (!%p4875_p6), %s435_s12, 16, %s3309_s9, [#allocation9]  }
  0x4f   : > { %2715 = dma.hbm_to_smem (!%p4875_p6), %s455_s21, 128, %s3310_s11, [#allocation8]  }
  0x50   : > { %s464_s27 = sshll.u32 %s4876_s6, 4  ;;  %s474_s15 = sshll.u32 %s4877_s7, 4  ;;  %s465_s27 = int_to_ptr.vmem [resolvable:$true] %s464_s27  ;;  %s475_s15 = int_to_ptr.vmem [resolvable:$true] %s474_s15 }
  0x51   : > { %2718 = dma.vmem_to_smem (!%p4875_p6), %s465_s27, 16, %s3311_s16, [#allocation15]  }
  0x52   : > { %s3312_s12 = smov [#allocation18]   ;;  %s74_s21 = sadd.s32 1, %s3286_s14 }
  0x53   : > { %2721 = dma.vmem_to_smem (!%p4875_p6), %s475_s15, 16, %s3312_s12, [#allocation19]  }
  0x54   : > { %s488_s9 = sand.u32 1, %s3286_s14   ;;  %s56_s11 = sadd.s32 1, %s3298_s17 }
  0x55   : > { %p57_p8 = scmp.ge.s32.totalorder %s56_s11, 2  ;;  %s2448_s22 = sshll.u32 %s488_s9, 6 }
  0x56   : > { %s2450_s27 = sshll.u32 %s3302_s18, 4  ;;  %s492_s15 = scalar_lea.vmem [#allocation5], %s2448_s22 }
  0x57   : > { %s4995_s11 = smov (%p57_p8, %s56_s11), 0  ;;  %s4997_s1 = smov (!%p57_p8, %s4879_s1), %s3302_s18 }
  0x58   : > { %4878 = sst [smem:[#allocation52_spill]] %s4995_s11  ;;  %s68_s4 = ssub.s32 %s3298_s17, %s4995_s11 }
  0x59   : > { %p65_p9 = scmp.ge.s32.totalorder %s4997_s1, 2  ;;  %s499_s25 = sadd.s32 %s2450_s27, %s2449_s26 }
  0x5a   : > { %s2451_s10 = sshll.u32 %s499_s25, 3  ;;  %s504_s16 = sshll.u32 %s492_s15, 4  ;;  %s505_s16 = int_to_ptr.vmem [resolvable:$true] %s504_s16 }
  0x5b   : > { %s4999_s1 = smov (%p65_p9, %s4997_s1), 0  ;;  %s4881_s0 = sld [smem:[#allocation77_spill]] }
  0x5c   : > { %4880 = sst [smem:[#allocation53_spill]] %s4999_s1  ;;  %s67_s6 = ssub.s32 %s3302_s18, %s4999_s1 }
  0x5d   : > { %s69_s11 = sor.u32 %s68_s4, %s67_s6  ;;  %p100_p10 = scmp.eq.s32.totalorder %s67_s6, 0 }
  0x5e   : > { %p72_p12 = scmp.eq.s32.totalorder %s69_s11, 0  ;;  %s4882_s22 = sadd.s32 1, %s3274_s29 }
  0x5f   : > { %s3591_s26 = scalar_select %p100_p10, %s3274_s29, %s4882_s22  }
  0x60   : > { %s3594_s25 = scalar_select %p72_p12, %s3286_s14, %s74_s21  }
  0x61   : > { %s501_s5 = scalar_lea.hbm %s4881_s0, %s2451_s10  ;;  %4883 = sst [smem:[#allocation54_spill]] %s3591_s26 }
  0x62   : > { %s502_s7 = sshll.u32 %s501_s5, 4  ;;  %4884 = sst [smem:[#allocation55_spill]] %s3594_s25  ;;  %s503_s7 = int_to_ptr.hbm [resolvable:$true] %s502_s7 }
  0x63   : > { %s489_s15 = scalar_lea.sflag [#allocation6], %s488_s9  ;;  %s3313_s17 = smov 256  }
  0x64   : > { %s3314_s3 = smov 16   ;;  %s4885_s2 = sld [smem:[#allocation79_spill]] }
  0x65   : > { %2725 = dma.hbm_to_vmem [thread:$0]  (!%p3524_p4), %s503_s7, 1024, %s505_s16, %s489_s15, %s3313_s17, %s3313_s17, %s3314_s3  }
  0x66   : > { %s540_s0 = scalar_lea.vmem [#allocation12], %s3542_s28  ;;  %p4886_p13 = scmp.ne.s32.totalorder %s4855_s24, 0 }
  0x67   : > { %s551_s1 = sshll.u32 %s540_s0, 4  ;;  %s552_s1 = int_to_ptr.vmem [resolvable:$true] %s551_s1 }
  0x68   : > { %560 = sbr.rel (%p4886_p13) target bundleno = 633 (0x279), region = 56 }
  0x6a   : > { %s547_s5 = scalar_lea.hbm %s4885_s2, %s2450_s27 }
  0x6b   : > { %s549_s4 = sshll.u32 %s547_s5, 4  ;;  %s550_s4 = int_to_ptr.hbm [resolvable:$true] %s549_s4 }
  0x6c   : > { %2731 = dma.hbm_to_vmem [thread:$0]  (!%p3538_p3), %s550_s4, 256, %s552_s1, %s3544_s23  }
  0x6d   : > { %s3608_s6 = sand.u32 1, %s3282_s30   ;;  %p4887_p0 = scmp.ne.s32.totalorder %s4857_s13, 0 }
  0x6e   : > { %s2459_s7 = sshll.u32 %s3608_s6, 6  ;;  %s563_s8 = scalar_lea.sflag [#allocation6], %s3608_s6 }
  0x6f   : > { %s3612_s17 = scalar_lea.vmem [#allocation5], %s2459_s7 }
  0x70   : > { %3225 = dma.done.wait (%p4887_p0), %s563_s8, 1024  }
  0x71   : > { %3227 = vsyncadd (%p4887_p0), %s563_s8, 4294966272  ;;  %s4888_s0 = sld [smem:[#allocation46_spill]] }
  0x72   : > { %s4889_s1 = sld [smem:[#allocation37_spill]] }
  0x73   : > { %s4890_s28 = sld [smem:[#allocation47_spill]] }
  0x77   : > { %s3619_s23 = sand.u32 1, %s4888_s0  }
  0x78   : > { %s3622_s24 = sand.u32 1, %s4889_s1   ;;  %s573_s21 = scalar_lea.sflag [#allocation11], %s3619_s23 }
  0x79   : > { %s2460_s20 = sshll.u32 %s3622_s24, 3  ;;  %p4891_p2 = scmp.ne.s32.totalorder %s4890_s28, 0 }
  0x7a   : > { %s576_s9 = scalar_lea.vmem [#allocation10], %s2460_s20 }
  0x7b   : > { %3229 = dma.done.wait (%p4891_p2), %s573_s21, 384  }
  0x7c   : > { %3231 = vsyncadd (%p4891_p2), %s573_s21, 4294966912  ;;  %s4821_s13 = sshll.u32 %s3622_s24, 4  ;;  %p4892_p4 = scmp.eq.s32.totalorder %s4888_s0, 0 }
  0x7d   : > { %s3633_s11 = scalar_lea.vmem [#allocation12], %s4821_s13 }
  0x7e   : > { %3233 = dma.done.wait (%p4892_p4), [#allocation9], 16   ;;  %p4893_p3 = pmov %p4892_p4 }
  0x80   : > { %3235 = vsyncadd (%p4893_p3), [#allocation9], 4294967280  ;;  %p4894_p6 = pmov %p4893_p3 }
  0x81   : > { %p4895_p8 = pmov %p4893_p3 }
  0x82   : > { %3237 = dma.done.wait (%p4894_p6), [#allocation15], 16  }
  0x83   : > { %3239 = vsyncadd (%p4895_p8), [#allocation15], 4294967280  ;;  %p4896_p9 = pmov %p4893_p3 }
  0x84   : > { %p4897_p10 = pmov %p4893_p3 }
  0x85   : > { %3241 = dma.done.wait (%p4896_p9), [#allocation8], 128  }
  0x86   : > { %3243 = vsyncadd (%p4897_p10), [#allocation8], 4294967168  ;;  %p4898_p12 = pmov %p4893_p3 }
  0x87   : > { %p4899_p13 = pmov %p4893_p3 }
  0x88   : > { %3245 = dma.done.wait (%p4898_p12), [#allocation15], 16  }
  0x89   : > { %3247 = vsyncadd (%p4899_p13), [#allocation15], 4294967280  ;;  %p4900_p0 = pmov %p4893_p3 }
  0x8b   : > { %3249 = dma.done.wait (%p4900_p0), [#allocation19], 16   ;;  %p4901_p2 = pmov %p4900_p0 }
  0x8d   : > { %3251 = vsyncadd (%p4901_p2), [#allocation19], 4294967280 }
  0x8e   : > { %617 = sfence }
  0x8f   : > { %s3657_s16 = sshll.u32 %s3622_s24, 1  ;;  %v694_v0 = vld [vmem:[%s576_s9] sm:$0xff]  ;;  %v2472_v13 = vld [vmem:[%s3612_s17 + $0x10] sm:$0xff]  ;;  %v2473_v14 = vld [vmem:[%s3612_s17 + $0x18] sm:$0xff]  ;;  %s3663_s22 = sld [smem:[#allocation13]] }
  0x90   : > { %v698_v1 = vperm.slane %v694_v0, 0  ;;  %v699_v2 = vperm.slane %v694_v0, 4  ;;  %v709_v3 = vperm.slane %v694_v0, 1  ;;  %v710_v4 = vperm.slane %v694_v0, 5  ;;  %v695_v7 = vld [vmem:[%s3612_s17] sm:$0xff]  ;;  %v696_v8 = vld [vmem:[%s3612_s17 + $0x8] sm:$0xff] }
  0x91   : > { %v722_v11 = vperm.slane %v694_v0, 2  ;;  %v723_v12 = vperm.slane %v694_v0, 6  ;;  %v735_v17 = vperm.slane %v694_v0, 3  ;;  %v736_v18 = vperm.slane %v694_v0, 7  ;;  %s3665_s15 = sld [smem:[#allocation13 + $0x1]]  ;;  %v2474_v23 = vld [vmem:[%s3612_s17 + $0x20] sm:$0xff] }
  0x92   : > { %v702_v5 = vperm.slane %v698_v1, 0  ;;  %v703_v6 = vperm.slane %v699_v2, 0  ;;  %v713_v9 = vperm.slane %v709_v3, 1  ;;  %v714_v10 = vperm.slane %v710_v4, 1  ;;  %v2475_v24 = vld [vmem:[%s3612_s17 + $0x28] sm:$0xff]  ;;  %s3669_s3 = sld [smem:[#allocation13 + $0x2]] }
  0x93   : > { %v726_v21 = vperm.slane %v722_v11, 2  ;;  %v727_v22 = vperm.slane %v723_v12, 2  ;;  %s3671_s10 = sld [smem:[#allocation13 + $0x3]]  ;;  %v739_v25 = vperm.slane %v735_v17, 3  ;;  %v740_v26 = vperm.slane %v736_v18, 3  ;;  %v2476_v31 = vld [vmem:[%s3612_s17 + $0x30] sm:$0xff] }
  0x94   : > { %v704_v15 = vmul.f32 %v702_v5, %v695_v7  ;;  %v705_v16 = vmul.f32 %v703_v6, %v696_v8  ;;  %v715_v19 = vmul.f32 %v2472_v13, %v713_v9  ;;  %v716_v20 = vmul.f32 %v2473_v14, %v714_v10  ;;  %s3673_s12 = sld [smem:[#allocation13 + $0x4]]  ;;  %v2477_v32 = vld [vmem:[%s3612_s17 + $0x38] sm:$0xff] }
  0x95   : > { %v728_v29 = vmul.f32 %v2474_v23, %v726_v21  ;;  %v729_v30 = vmul.f32 %v2475_v24, %v727_v22  ;;  %s3675_s5 = sld [smem:[#allocation13 + $0x5]]  ;;  %v741_v35 = vmul.f32 %v2476_v31, %v739_v25  ;;  %v742_v36 = vmul.f32 %v2477_v32, %v740_v26 }
  0x96   : > { %v717_v27 = vadd.f32 %v715_v19, %v704_v15  ;;  %v718_v28 = vadd.f32 %v716_v20, %v705_v16  ;;  %s3679_s4 = sld [smem:[#allocation14]]  ;;  %v923_v41 = vstv %s3663_s22 }
  0x97   : > { %s3681_s7 = sld [smem:[#allocation14 + $0x1]]  ;;  %v979_v45 = vstv %s3665_s15 }
  0x98   : > { %s3683_s8 = sld [smem:[#allocation14 + $0x2]]  ;;  %v730_v33 = vadd.f32 %v728_v29, %v717_v27  ;;  %v731_v34 = vadd.f32 %v729_v30, %v718_v28  ;;  %v1027_v57 = vstv %s3669_s3 }
  0x99   : > { %s3685_s0 = sld [smem:[#allocation14 + $0x3]] }
  0x9a   : > { %s3687_s1 = sld [smem:[#allocation14 + $0x4]]  ;;  %v743_v37 = vadd.f32 %v741_v35, %v730_v33  ;;  %v744_v38 = vadd.f32 %v742_v36, %v731_v34 }
  0x9b   : > { %s3689_s28 = sld [smem:[#allocation16]] }
  0x9c   : > { %s3691_s20 = sld [smem:[#allocation16 + $0x1]]  ;;  %v3701_v39 = vmul.f32 0.25, %v743_v37  ;;  %v3703_v40 = vmul.f32 0.25, %v744_v38  ;;  %v926_v44 = vstv %s3679_s4 }
  0x9d   : > { %s3693_s17 = sld [smem:[#allocation16 + $0x2]]  ;;  %v982_v50 = vstv %s3681_s7 }
  0x9e   : > { %s3695_s21 = sld [smem:[#allocation16 + $0x3]]  ;;  %4902 = vst [vmem:[#allocation56_spill] sm:$0xff] %v3701_v39  ;;  %v924_v42 = vmul.f32 %v923_v41, %v3701_v39  ;;  %v925_v43 = vmul.f32 %v923_v41, %v3703_v40  ;;  %v980_v48 = vmul.f32 %v979_v45, %v3701_v39  ;;  %v981_v49 = vmul.f32 %v979_v45, %v3703_v40 }
  0x9f   : > { %s3697_s9 = sld [smem:[#allocation16 + $0x80]]  ;;  %4903 = vst [vmem:[#allocation57_spill] sm:$0xff] %v3703_v40  ;;  %v1028_v5 = vmul.f32 %v1027_v57, %v3701_v39  ;;  %v1029_v13 = vmul.f32 %v1027_v57, %v3703_v40  ;;  %v1030_v16 = vstv %s3683_s8 }
  0xa0   : > { %s3699_s13 = sld [smem:[#allocation16 + $0x81]]  ;;  %v927_v46 = vadd.f32 %v926_v44, %v924_v42  ;;  %v928_v47 = vadd.f32 %v926_v44, %v925_v43  ;;  %v983_v53 = vadd.f32 %v982_v50, %v980_v48  ;;  %v984_v54 = vadd.f32 %v982_v50, %v981_v49 }
  0xa1   : > { %s3705_s27 = sld [smem:[#allocation16 + $0x82]]  ;;  %v931_v55 = vstv %s3689_s28  ;;  %v1031_v24 = vadd.f32 %v1030_v16, %v1028_v5  ;;  %v1032_v25 = vadd.f32 %v1030_v16, %v1029_v13 }
  0xa2   : > { %s3707_s2 = sld [smem:[#allocation16 + $0x83]]  ;;  %v3731_v51 = vmax.f32 %v927_v46, 0.0  ;;  %v3733_v52 = vmax.f32 %v928_v47, 0.0  ;;  %v3757_v63 = vmax.f32 %v983_v53, 0.0  ;;  %v3759_v0 = vmax.f32 %v984_v54, 0.0 }
  0xa3   : > { %s3709_s18 = sld [smem:[#allocation16 + $0x100]]  ;;  %v987_v1 = vstv %s3691_s20  ;;  %v1035_v17 = vstv %s3693_s17  ;;  %v1033_v33 = vmax.f32 %v1031_v24, 0.0  ;;  %v1034_v43 = vmax.f32 %v1032_v25, 0.0 }
  0xa4   : > { %s3711_s25 = sld [smem:[#allocation16 + $0x101]]  ;;  %v3743_v58 = vmul.f32 %v931_v55, %v3731_v51  ;;  %v3746_v59 = vmul.f32 %v931_v55, %v3733_v52  ;;  %v3776_v7 = vmul.f32 %v987_v1, %v3757_v63  ;;  %v3779_v8 = vmul.f32 %v987_v1, %v3759_v0 }
  0xa5   : > { %s3714_s14 = sld [smem:[#allocation16 + $0x102]]  ;;  %v937_v56 = vstv %s3697_s9  ;;  %v3870_v46 = vmul.f32 %v1035_v17, %v1033_v33  ;;  %v3875_v48 = vmul.f32 %v1035_v17, %v1034_v43 }
  0xa6   : > { %s3718_s30 = sld [smem:[#allocation16 + $0x180]]  ;;  %v3749_v60 = vmul.f32 %v937_v56, %v3731_v51  ;;  %v3752_v61 = vmul.f32 %v937_v56, %v3733_v52  ;;  %v992_v4 = vstv %s3699_s13 }
  0xa7   : > { %s3722_s26 = sld [smem:[#allocation16 + $0x181]]  ;;  %v3782_v9 = vmul.f32 %v992_v4, %v3757_v63  ;;  %v3793_v12 = vmul.f32 %v992_v4, %v3759_v0  ;;  %v1040_v47 = vstv %s3705_s27 }
  0xa8   : > { %s3726_s22 = sld [smem:[#allocation16 + $0x200]]  ;;  %v3877_v49 = vmul.f32 %v1040_v47, %v1033_v33  ;;  %v3879_v50 = vmul.f32 %v1040_v47, %v1034_v43  ;;  %v1078_v47 = vstv %s3685_s0 }
  0xa9   : > { %s3729_s29 = sld [smem:[#allocation16 + $0x201]]  ;;  %v943_v62 = vstv %s3709_s18 }
  0xaa   : > { %s3735_s15 = sld [smem:[#allocation16 + $0x280]]  ;;  %v3765_v2 = vmul.f32 %v943_v62, %v3731_v51  ;;  %v3768_v3 = vmul.f32 %v943_v62, %v3733_v52  ;;  %v997_v15 = vstv %s3711_s25 }
  0xab   : > { %s3740_s4 = sld [smem:[#allocation16 + $0x281]]  ;;  %v3811_v20 = vmul.f32 %v997_v15, %v3757_v63  ;;  %v3814_v21 = vmul.f32 %v997_v15, %v3759_v0  ;;  %v1045_v53 = vstv %s3714_s14  ;;  %v1075_v15 = vstv %s3671_s10 }
  0xac   : > { %s3754_s7 = sld [smem:[#allocation16 + $0x300]]  ;;  %v949_v6 = vstv %s3718_s30  ;;  %v3884_v54 = vmul.f32 %v1045_v53, %v1033_v33  ;;  %v3886_v55 = vmul.f32 %v1045_v53, %v1034_v43  ;;  %v1083_v53 = vstv %s3695_s21 }
  0xad   : > { %s3762_s3 = sld [smem:[#allocation16 + $0x103]]  ;;  %v3787_v10 = vmul.f32 %v949_v6, %v3731_v51  ;;  %v3790_v11 = vmul.f32 %v949_v6, %v3733_v52  ;;  %v1002_v23 = vstv %s3722_s26 }
  0xae   : > { %s3772_s18 = sld [smem:[#allocation16 + $0x301]]  ;;  %v955_v14 = vstv %s3726_s22  ;;  %v3829_v28 = vmul.f32 %v1002_v23, %v3757_v63  ;;  %v3832_v29 = vmul.f32 %v1002_v23, %v3759_v0 }
  0xaf   : > { %s3784_s28 = sld [smem:[#allocation16 + $0x182]]  ;;  %v3805_v18 = vmul.f32 %v955_v14, %v3731_v51  ;;  %v3808_v19 = vmul.f32 %v955_v14, %v3733_v52  ;;  %v1007_v31 = vstv %s3729_s29 }
  0xb0   : > { %s3796_s30 = sld [smem:[#allocation16 + $0x183]]  ;;  %v961_v22 = vstv %s3735_s15  ;;  %v3848_v36 = vmul.f32 %v1007_v31, %v3757_v63  ;;  %v3851_v37 = vmul.f32 %v1007_v31, %v3759_v0 }
  0xb1   : > { %s3802_s13 = sld [smem:[#allocation16 + $0x202]]  ;;  %v3823_v26 = vmul.f32 %v961_v22, %v3731_v51  ;;  %v3826_v27 = vmul.f32 %v961_v22, %v3733_v52  ;;  %v1012_v32 = vstv %s3740_s4 }
  0xb2   : > { %s3816_s25 = sld [smem:[#allocation16 + $0x282]]  ;;  %v967_v30 = vstv %s3754_s7  ;;  %v3856_v38 = vmul.f32 %v1012_v32, %v3757_v63  ;;  %v3859_v41 = vmul.f32 %v1012_v32, %v3759_v0 }
  0xb3   : > { %s3820_s8 = sld [smem:[#allocation16 + $0x302]]  ;;  %v3842_v34 = vmul.f32 %v967_v30, %v3731_v51  ;;  %v3845_v35 = vmul.f32 %v967_v30, %v3733_v52 }
  0xb4   : > { %s3834_s20 = sld [smem:[#allocation16 + $0x203]]  ;;  %v1017_v42 = vstv %s3772_s18 }
  0xb5   : > { %s3839_s26 = sld [smem:[#allocation16 + $0x380]]  ;;  %v3865_v44 = vmul.f32 %v1017_v42, %v3757_v63  ;;  %v3868_v45 = vmul.f32 %v1017_v42, %v3759_v0  ;;  %v1050_v56 = vstv %s3784_s28 }
  0xb6   : > { %s3853_s17 = sld [smem:[#allocation16 + $0x381]]  ;;  %v3892_v62 = vmul.f32 %v1050_v56, %v1033_v33  ;;  %v3894_v1 = vmul.f32 %v1050_v56, %v1034_v43 }
  0xb7   : > { %s3862_s29 = sld [smem:[#allocation16 + $0x382]]  ;;  %v1055_v57 = vstv %s3802_s13 }
  0xb8   : > { %s3873_s9 = sld [smem:[#allocation16 + $0x283]]  ;;  %v3896_v4 = vmul.f32 %v1055_v57, %v1033_v33  ;;  %v3898_v5 = vmul.f32 %v1055_v57, %v1034_v43  ;;  %v1060_v13 = vstv %s3816_s25 }
  0xb9   : > { %s3882_s22 = sld [smem:[#allocation16 + $0x303]]  ;;  %v1065_v14 = vstv %s3820_s8  ;;  %v3915_v23 = vmul.f32 %v1060_v13, %v1033_v33  ;;  %v3925_v30 = vmul.f32 %v1060_v13, %v1034_v43  ;;  %v1093_v13 = vstv %s3762_s3 }
  0xba   : > { %s3890_s27 = sld [smem:[#allocation16 + $0x383]]  ;;  %4904 = vst [vmem:[#allocation58_spill] sm:$0xff] %v3896_v4 }
  0xbb   : > { %4905 = vst [vmem:[#allocation59_spill] sm:$0xff] %v3898_v5  ;;  %s3900_s14 = sld [smem:[#allocation16 + $0x4]]  ;;  %v973_v6 = vstv %s3839_s26 }
  0xbc   : > { %s3906_s15 = sld [smem:[#allocation16 + $0x84]]  ;;  %v3909_v16 = vmul.f32 %v973_v6, %v3731_v51  ;;  %v3912_v17 = vmul.f32 %v973_v6, %v3733_v52  ;;  %v1022_v22 = vstv %s3853_s17  ;;  %4906 = vst [vmem:[#allocation60_spill] sm:$0xff] %v3915_v23  ;;  %v3927_v51 = vmul.f32 %v1065_v14, %v1033_v33 }
  0xbd   : > { %s3917_s4 = sld [smem:[#allocation16 + $0x104]]  ;;  %v3920_v24 = vmul.f32 %v1022_v22, %v3757_v63  ;;  %v3923_v25 = vmul.f32 %v1022_v22, %v3759_v0  ;;  %4907 = vst [vmem:[#allocation61_spill] sm:$0xff] %v3925_v30  ;;  %v3931_v52 = vmul.f32 %v1065_v14, %v1034_v43  ;;  %v1070_v31 = vstv %s3862_s29 }
  0xbe   : > { %4908 = vst [vmem:[#allocation62_spill] sm:$0xff] %v3927_v51  ;;  %s3929_s10 = sld [smem:[#allocation16 + $0x184]]  ;;  %v1076_v63 = vmul.f32 %v1075_v15, %v3701_v39  ;;  %v1077_v0 = vmul.f32 %v1075_v15, %v3703_v40  ;;  %v3938_v32 = vmul.f32 %v1070_v31, %v1033_v33  ;;  %v3940_v42 = vmul.f32 %v1070_v31, %v1034_v43 }
  0xbf   : > { %4909 = vst [vmem:[#allocation63_spill] sm:$0xff] %v3931_v52  ;;  %s3936_s7 = sld [smem:[#allocation16 + $0x204]]  ;;  %v1088_v6 = vstv %s3707_s2  ;;  %v1098_v14 = vstv %s3796_s30  ;;  %v1103_v15 = vstv %s3834_s20  ;;  %v1108_v33 = vstv %s3873_s9 }
  0xc0   : > { %4910 = vst [vmem:[#allocation64_spill] sm:$0xff] %v3938_v32  ;;  %s3944_s18 = sld [smem:[#allocation16 + $0x284]]  ;;  %v1079_v56 = vadd.f32 %v1078_v47, %v1076_v63  ;;  %v1080_v57 = vadd.f32 %v1078_v47, %v1077_v0  ;;  %v1113_v22 = vstv %s3882_s22  ;;  %v1123_v32 = vstv %s3673_s12 }
  0xc1   : > { %4911 = vst [vmem:[#allocation65_spill] sm:$0xff] %v3940_v42  ;;  %s3948_s28 = sld [smem:[#allocation16 + $0x304]]  ;;  %v1118_v42 = vstv %s3890_s27  ;;  %v1124_v63 = vmul.f32 %v1123_v32, %v3701_v39  ;;  %v1125_v0 = vmul.f32 %v1123_v32, %v3703_v40  ;;  %v1126_v47 = vstv %s3687_s1 }
  0xc2   : > { %s3954_s13 = sld [smem:[#allocation16 + $0x384]]  ;;  %v1081_v43 = vmax.f32 %v1079_v56, 0.0  ;;  %v1082_v31 = vmax.f32 %v1080_v57, 0.0  ;;  %v1131_v52 = vstv %s3900_s14 }
  0xc3   : > { %s3958_s0 = sld [smem:[#allocation14 + $0x5]] }
  0xc4   : > { %v3964_v51 = vmul.f32 %v1083_v53, %v1081_v43  ;;  %v3966_v30 = vmul.f32 %v1083_v53, %v1082_v31  ;;  %v3968_v23 = vmul.f32 %v1088_v6, %v1081_v43  ;;  %v3970_v5 = vmul.f32 %v1088_v6, %v1082_v31  ;;  %s3972_s2 = sld [smem:[#allocation17]] }
  0xc5   : > { %v3974_v56 = vmul.f32 %v1093_v13, %v1081_v43  ;;  %v3976_v57 = vmul.f32 %v1093_v13, %v1082_v31  ;;  %v3978_v4 = vmul.f32 %v1098_v14, %v1081_v43  ;;  %v3980_v32 = vmul.f32 %v1098_v14, %v1082_v31  ;;  %s3982_s12 = sld [smem:[#allocation17 + $0x1]] }
  0xc6   : > { %4912 = vst [vmem:[#allocation66_spill] sm:$0xff] %v3970_v5  ;;  %v3984_v53 = vmul.f32 %v1103_v15, %v1081_v43  ;;  %v3986_v6 = vmul.f32 %v1103_v15, %v1082_v31  ;;  %v3988_v5 = vmul.f32 %v1108_v33, %v1081_v43  ;;  %v3990_v13 = vmul.f32 %v1108_v33, %v1082_v31  ;;  %s3992_s1 = sld [smem:[#allocation17 + $0x2]] }
  0xc7   : > { %4913 = vst [vmem:[#allocation67_spill] sm:$0xff] %v3978_v4  ;;  %v3994_v4 = vmul.f32 %v1113_v22, %v1081_v43  ;;  %v3996_v14 = vmul.f32 %v1113_v22, %v1082_v31  ;;  %s4002_s21 = sld [smem:[#allocation17 + $0x3]]  ;;  %v1127_v15 = vadd.f32 %v1126_v47, %v1124_v63  ;;  %v1171_v63 = vstv %s3675_s5 }
  0xc8   : > { %4914 = vst [vmem:[#allocation68_spill] sm:$0xff] %v3980_v32  ;;  %v3998_v32 = vmul.f32 %v1118_v42, %v1081_v43  ;;  %s4006_s3 = sld [smem:[#allocation17 + $0x4]] }
  0xc9   : > { %4915 = vst [vmem:[#allocation69_spill] sm:$0xff] %v3984_v53  ;;  %v4000_v53 = vmul.f32 %v1118_v42, %v1082_v31  ;;  %s4012_s30 = sld [smem:[#allocation17 + $0x5]]  ;;  %v4014_v43 = vmax.f32 %v1127_v15, 0.0 }
  0xca   : > { %4916 = vst [vmem:[#allocation70_spill] sm:$0xff] %v3986_v6  ;;  %s4020_s25 = sld [smem:[#allocation17 + $0x6]] }
  0xcb   : > { %4917 = vst [vmem:[#allocation71_spill] sm:$0xff] %v3988_v5  ;;  %v1128_v5 = vadd.f32 %v1126_v47, %v1125_v0  ;;  %v934_v0 = vstv %s3972_s2  ;;  %v4024_v47 = vmul.f32 %v1171_v63, %v3701_v39  ;;  %s2641_s8 = sld [smem:[#allocation17 + $0x7]]  ;;  %v940_v22 = vstv %s3982_s12 }
  0xcc   : > { %4918 = vst [vmem:[#allocation72_spill] sm:$0xff] %v3990_v13  ;;  %v935_v15 = vadd.f32 %v934_v0, %v3743_v58  ;;  %v4034_v31 = vmul.f32 %v1131_v52, %v4014_v43  ;;  %v941_v13 = vadd.f32 %v940_v22, %v3749_v60  ;;  %v942_v33 = vadd.f32 %v940_v22, %v3752_v61  ;;  %s4085_s5 = sld [smem:[#allocation13 + $0x6]] }
  0xcd   : > { %4919 = vst [vmem:[#allocation73_spill] sm:$0xff] %v3994_v4  ;;  %v4016_v42 = vmax.f32 %v1128_v5, 0.0  ;;  %v4027_v4 = vmul.f32 %v1171_v63, %v3703_v40  ;;  %v936_v5 = vadd.f32 %v934_v0, %v3746_v59  ;;  %v946_v6 = vstv %s3992_s1  ;;  %s4091_s20 = sld [smem:[#allocation13 + $0x7]] }
  0xce   : > { %4920 = vst [vmem:[#allocation74_spill] sm:$0xff] %v3996_v14  ;;  %v947_v14 = vadd.f32 %v946_v6, %v3765_v2  ;;  %v948_v58 = vadd.f32 %v946_v6, %v3768_v3  ;;  %v952_v40 = vstv %s4002_s21  ;;  %v990_v59 = vadd.f32 %v3776_v7, %v935_v15  ;;  %v4929_v15 = vld [vmem:[#allocation64_spill] sm:$0xff]  ;;  %s4097_s26 = sld [smem:[#allocation16 + $0x5]] }
  0xcf   : > { %4921 = vst [vmem:[#allocation75_spill] sm:$0xff] %v4024_v47  ;;  %v4040_v63 = vmul.f32 %v1131_v52, %v4016_v42  ;;  %v953_v0 = vadd.f32 %v952_v40, %v3787_v10  ;;  %v954_v39 = vadd.f32 %v952_v40, %v3790_v11  ;;  %v991_v60 = vadd.f32 %v3779_v8, %v936_v5  ;;  %s4103_s17 = sld [smem:[#allocation16 + $0x85]] }
  0xd0   : > { %4922 = vst [vmem:[#allocation76_spill] sm:$0xff] %v4027_v4  ;;  %v958_v4 = vstv %s4006_s3  ;;  %v964_v52 = vstv %s4012_s30  ;;  %v995_v47 = vadd.f32 %v3782_v9, %v941_v13  ;;  %v970_v6 = vstv %s4020_s25  ;;  %v4924_v13 = vld [vmem:[#allocation59_spill] sm:$0xff]  ;;  %s4109_s29 = sld [smem:[#allocation16 + $0x105]] }
  0xd1   : > { %v959_v61 = vadd.f32 %v958_v4, %v3805_v18  ;;  %v960_v22 = vadd.f32 %v958_v4, %v3808_v19  ;;  %v965_v2 = vadd.f32 %v964_v52, %v3823_v26  ;;  %v966_v3 = vadd.f32 %v964_v52, %v3826_v27  ;;  %v4932_v52 = vld [vmem:[#allocation67_spill] sm:$0xff]  ;;  %s4115_s9 = sld [smem:[#allocation16 + $0x185]] }
  0xd2   : > { %v996_v7 = vadd.f32 %v3793_v12, %v942_v33  ;;  %v971_v10 = vadd.f32 %v970_v6, %v3842_v34  ;;  %v972_v40 = vadd.f32 %v970_v6, %v3845_v35  ;;  %v976_v11 = vstv %s2641_s8  ;;  %v4927_v33 = vld [vmem:[#allocation62_spill] sm:$0xff]  ;;  %v4934_v6 = vld [vmem:[#allocation69_spill] sm:$0xff]  ;;  %s4123_s22 = sld [smem:[#allocation16 + $0x205]] }
  0xd3   : > { %v1000_v8 = vadd.f32 %v3811_v20, %v947_v14  ;;  %v977_v18 = vadd.f32 %v976_v11, %v3909_v16  ;;  %v978_v19 = vadd.f32 %v976_v11, %v3912_v17  ;;  %v1001_v9 = vadd.f32 %v3814_v21, %v948_v58  ;;  %v4925_v14 = vld [vmem:[#allocation60_spill] sm:$0xff]  ;;  %s4137_s27 = sld [smem:[#allocation14 + $0x6]] }
  0xd4   : > { %v1005_v26 = vadd.f32 %v3829_v28, %v953_v0  ;;  %v1006_v27 = vadd.f32 %v3832_v29, %v954_v39  ;;  %v1010_v4 = vadd.f32 %v3848_v36, %v959_v61  ;;  %v1011_v12 = vadd.f32 %v3851_v37, %v960_v22  ;;  %v4931_v0 = vld [vmem:[#allocation66_spill] sm:$0xff]  ;;  %v4938_v11 = vld [vmem:[#allocation73_spill] sm:$0xff]  ;;  %s4148_s14 = sld [smem:[#allocation14 + $0x7]] }
  0xd5   : > { %v1015_v34 = vadd.f32 %v3856_v38, %v965_v2  ;;  %v1016_v35 = vadd.f32 %v3859_v41, %v966_v3  ;;  %v1020_v20 = vadd.f32 %v3865_v44, %v971_v10  ;;  %v1021_v16 = vadd.f32 %v3868_v45, %v972_v40  ;;  %v4923_v45 = vld [vmem:[#allocation58_spill] sm:$0xff]  ;;  %v4933_v3 = vld [vmem:[#allocation68_spill] sm:$0xff]  ;;  %v4936_v10 = vld [vmem:[#allocation71_spill] sm:$0xff]  ;;  %s4195_s2 = sld [smem:[#allocation16 + $0x286]] }
  0xd6   : > { %v1025_v17 = vadd.f32 %v3920_v24, %v977_v18  ;;  %v1026_v21 = vadd.f32 %v3923_v25, %v978_v19  ;;  %v1038_v28 = vadd.f32 %v3870_v46, %v990_v59  ;;  %v1039_v39 = vadd.f32 %v3875_v48, %v991_v60  ;;  %v4926_v48 = vld [vmem:[#allocation61_spill] sm:$0xff]  ;;  %v4939_v18 = vld [vmem:[#allocation74_spill] sm:$0xff]  ;;  %s4205_s12 = sld [smem:[#allocation16 + $0x306]] }
  0xd7   : > { %v1043_v29 = vadd.f32 %v3877_v49, %v995_v47  ;;  %v1044_v36 = vadd.f32 %v3879_v50, %v996_v7  ;;  %v1048_v37 = vadd.f32 %v3884_v54, %v1000_v8  ;;  %v1049_v38 = vadd.f32 %v3886_v55, %v1001_v9  ;;  %v4928_v47 = vld [vmem:[#allocation63_spill] sm:$0xff]  ;;  %s4215_s1 = sld [smem:[#allocation16 + $0x386]] }
  0xd8   : > { %v1053_v41 = vadd.f32 %v3892_v62, %v1005_v26  ;;  %v1054_v44 = vadd.f32 %v3894_v1, %v1006_v27  ;;  %v1058_v24 = vadd.f32 %v4923_v45, %v1010_v4  ;;  %v1059_v25 = vadd.f32 %v4924_v13, %v1011_v12  ;;  %v4930_v62 = vld [vmem:[#allocation65_spill] sm:$0xff]  ;;  %s4219_s21 = sld [smem:[#allocation16 + $0x7]] }
  0xd9   : > { %v1063_v46 = vadd.f32 %v4925_v14, %v1015_v34  ;;  %v1064_v49 = vadd.f32 %v4926_v48, %v1016_v35  ;;  %v1068_v50 = vadd.f32 %v4927_v33, %v1020_v20  ;;  %v1069_v54 = vadd.f32 %v4928_v47, %v1021_v16  ;;  %s4235_s3 = sld [smem:[#allocation13 + $0x8]] }
  0xda   : > { %v1073_v55 = vadd.f32 %v4929_v15, %v1025_v17  ;;  %v1074_v1 = vadd.f32 %v4930_v62, %v1026_v21  ;;  %v1086_v5 = vadd.f32 %v3964_v51, %v1038_v28  ;;  %v1087_v58 = vadd.f32 %v3966_v30, %v1039_v39  ;;  %s4239_s30 = sld [smem:[#allocation14 + $0x8]] }
  0xdb   : > { %v1091_v59 = vadd.f32 %v3968_v23, %v1043_v29  ;;  %v1092_v60 = vadd.f32 %v4931_v0, %v1044_v36  ;;  %v1096_v61 = vadd.f32 %v3974_v56, %v1048_v37  ;;  %v1097_v22 = vadd.f32 %v3976_v57, %v1049_v38  ;;  %v4935_v23 = vld [vmem:[#allocation70_spill] sm:$0xff]  ;;  %v4937_v56 = vld [vmem:[#allocation72_spill] sm:$0xff]  ;;  %s4245_s25 = sld [smem:[#allocation16 + $0x87]] }
  0xdc   : > { %v1101_v2 = vadd.f32 %v4932_v52, %v1053_v41  ;;  %v1102_v51 = vadd.f32 %v4933_v3, %v1054_v44  ;;  %v1106_v30 = vadd.f32 %v4934_v6, %v1058_v24  ;;  %v1107_v7 = vadd.f32 %v4935_v23, %v1059_v25  ;;  %s4247_s8 = sld [smem:[#allocation16 + $0x107]] }
  0xdd   : > { %v1111_v40 = vadd.f32 %v4936_v10, %v1063_v46  ;;  %v1112_v57 = vadd.f32 %v4937_v56, %v1064_v49  ;;  %v1116_v8 = vadd.f32 %v4938_v11, %v1068_v50  ;;  %v1117_v19 = vadd.f32 %v4939_v18, %v1069_v54 }
  0xde   : > { %v1121_v9 = vadd.f32 %v3998_v32, %v1073_v55  ;;  %v1122_v26 = vadd.f32 %v4000_v53, %v1074_v1  ;;  %v1134_v27 = vadd.f32 %v4034_v31, %v1086_v5  ;;  %v1135_v4 = vadd.f32 %v4040_v63, %v1087_v58 }
  0xdf   : > { %v4940_v12 = vstv %s3906_s15  ;;  %v4942_v16 = vstv %s3917_s4  ;;  %v4944_v53 = vstv %s3929_s10  ;;  %v4946_v29 = vstv %s3936_s7  ;;  %s4150_s15 = sld [smem:[#allocation16 + $0x6]] }
  0xe0   : > { %v1137_v34 = vmul.f32 %v4940_v12, %v4014_v43  ;;  %v4941_v35 = vmov %v4940_v12  ;;  %v1142_v17 = vmul.f32 %v4942_v16, %v4014_v43  ;;  %v4943_v32 = vmov %v4942_v16  ;;  %s4155_s4 = sld [smem:[#allocation16 + $0x285]] }
  0xe1   : > { %v1138_v20 = vmul.f32 %v4941_v35, %v4016_v42  ;;  %v1143_v21 = vmul.f32 %v4943_v32, %v4016_v42  ;;  %v1147_v31 = vmul.f32 %v4944_v53, %v4014_v43  ;;  %v4945_v28 = vmov %v4944_v53  ;;  %s4169_s10 = sld [smem:[#allocation16 + $0x305]] }
  0xe2   : > { %v1139_v63 = vadd.f32 %v1137_v34, %v1091_v59  ;;  %v1148_v39 = vmul.f32 %v4945_v28, %v4016_v42  ;;  %v1152_v36 = vmul.f32 %v4946_v29, %v4014_v43  ;;  %v4947_v37 = vmov %v4946_v29  ;;  %v4954_v59 = vld [vmem:[#allocation75_spill] sm:$0xff]  ;;  %s4180_s7 = sld [smem:[#allocation16 + $0x86]] }
  0xe3   : > { %v1153_v38 = vmul.f32 %v4947_v37, %v4016_v42  ;;  %v1140_v41 = vadd.f32 %v1138_v20, %v1092_v60  ;;  %v1144_v44 = vadd.f32 %v1142_v17, %v1096_v61  ;;  %v1145_v45 = vadd.f32 %v1143_v21, %v1097_v22  ;;  %v4956_v61 = vld [vmem:[#allocation76_spill] sm:$0xff] }
  0xe4   : > { %v1149_v24 = vadd.f32 %v1147_v31, %v1101_v2  ;;  %v1150_v13 = vadd.f32 %v1148_v39, %v1102_v51  ;;  %v1154_v25 = vadd.f32 %v1152_v36, %v1106_v30  ;;  %v4948_v46 = vstv %s3944_s18  ;;  %s4182_s18 = sld [smem:[#allocation16 + $0x385]] }
  0xe5   : > { %v1155_v14 = vadd.f32 %v1153_v38, %v1107_v7  ;;  %v1157_v48 = vmul.f32 %v4948_v46, %v4014_v43  ;;  %v4949_v49 = vmov %v4948_v46  ;;  %v4950_v50 = vstv %s3948_s28  ;;  %s4185_s28 = sld [smem:[#allocation16 + $0x106]] }
  0xe6   : > { %v1158_v33 = vmul.f32 %v4949_v49, %v4016_v42  ;;  %v1162_v47 = vmul.f32 %v4950_v50, %v4014_v43  ;;  %v4951_v54 = vmov %v4950_v50  ;;  %v4952_v55 = vstv %s3954_s13  ;;  %s4191_s13 = sld [smem:[#allocation16 + $0x186]]  ;;  %v4958_v49 = vld [vmem:[#allocation56_spill] sm:$0xff] }
  0xe7   : > { %v1163_v15 = vmul.f32 %v4951_v54, %v4016_v42  ;;  %v1167_v62 = vmul.f32 %v4952_v55, %v4014_v43  ;;  %v1159_v1 = vadd.f32 %v1157_v48, %v1111_v40  ;;  %v4953_v5 = vmov %v4952_v55 }
  0xe8   : > { %v1168_v58 = vmul.f32 %v4953_v5, %v4016_v42  ;;  %v4955_v0 = vstv %s3958_s0  ;;  %v1160_v2 = vadd.f32 %v1158_v33, %v1112_v57  ;;  %v1164_v43 = vadd.f32 %v1162_v47, %v1116_v8  ;;  %s4193_s0 = sld [smem:[#allocation16 + $0x206]]  ;;  %v4959_v33 = vld [vmem:[#allocation57_spill] sm:$0xff] }
  0xe9   : > { %v1175_v60 = vadd.f32 %v4955_v0, %v4954_v59  ;;  %v4957_v22 = vmov %v4955_v0  ;;  %v1165_v3 = vadd.f32 %v1163_v15, %v1117_v19  ;;  %v1169_v51 = vadd.f32 %v1167_v62, %v1121_v9 }
  0xea   : > { %v1176_v52 = vadd.f32 %v4957_v22, %v4956_v61  ;;  %v1170_v6 = vadd.f32 %v1168_v58, %v1122_v26  ;;  %v1179_v42 = vstv %s4097_s26  ;;  %v1184_v7 = vstv %s4103_s17  ;;  %s4257_s26 = sld [smem:[#allocation16 + $0x207]] }
  0xeb   : > { %v1177_v30 = vmax.f32 %v1175_v60, 0.0  ;;  %v1189_v10 = vstv %s4109_s29  ;;  %v1194_v40 = vstv %s4115_s9  ;;  %v1199_v56 = vstv %s4123_s22  ;;  %s4263_s17 = sld [smem:[#allocation16 + $0x287]] }
  0xec   : > { %v1178_v23 = vmax.f32 %v1176_v52, 0.0  ;;  %v1204_v31 = vstv %s4155_s4  ;;  %v1222_v47 = vstv %s4137_s27  ;;  %v1227_v54 = vstv %s4150_s15  ;;  %s4265_s29 = sld [smem:[#allocation16 + $0x307]] }
  0xed   : > { %v1180_v11 = vmul.f32 %v1179_v42, %v1177_v30  ;;  %v1185_v57 = vmul.f32 %v1184_v7, %v1177_v30  ;;  %v1190_v19 = vmul.f32 %v1189_v10, %v1177_v30  ;;  %v1195_v26 = vmul.f32 %v1194_v40, %v1177_v30  ;;  %s4273_s9 = sld [smem:[#allocation16 + $0x8]] }
  0xee   : > { %v1181_v18 = vmul.f32 %v1179_v42, %v1178_v23  ;;  %v1186_v8 = vmul.f32 %v1184_v7, %v1178_v23  ;;  %v1191_v9 = vmul.f32 %v1189_v10, %v1178_v23  ;;  %v1196_v12 = vmul.f32 %v1194_v40, %v1178_v23  ;;  %s4279_s22 = sld [smem:[#allocation13 + $0x9]] }
  0xef   : > { %v4197_v34 = vadd.f32 %v1180_v11, %v1134_v27  ;;  %v4201_v20 = vadd.f32 %v1185_v57, %v1139_v63  ;;  %v4207_v17 = vadd.f32 %v1190_v19, %v1144_v44  ;;  %v4211_v21 = vadd.f32 %v1195_v26, %v1149_v24  ;;  %s4285_s27 = sld [smem:[#allocation14 + $0x9]] }
  0xf0   : > { %v4199_v35 = vadd.f32 %v1181_v18, %v1135_v4  ;;  %v4203_v16 = vadd.f32 %v1186_v8, %v1140_v41  ;;  %v4209_v32 = vadd.f32 %v1191_v9, %v1145_v45  ;;  %v4213_v53 = vadd.f32 %v1196_v12, %v1150_v13  ;;  %s4293_s15 = sld [smem:[#allocation16 + $0x108]] }
  0xf1   : > { %v1200_v27 = vmul.f32 %v1199_v56, %v1177_v30  ;;  %v1201_v4 = vmul.f32 %v1199_v56, %v1178_v23  ;;  %v1209_v63 = vstv %s4169_s10  ;;  %v1205_v28 = vmul.f32 %v1204_v31, %v1177_v30  ;;  %s4299_s4 = sld [smem:[#allocation16 + $0x188]] }
  0xf2   : > { %v1206_v39 = vmul.f32 %v1204_v31, %v1178_v23  ;;  %v1210_v29 = vmul.f32 %v1209_v63, %v1177_v30  ;;  %v1211_v36 = vmul.f32 %v1209_v63, %v1178_v23  ;;  %v1214_v41 = vstv %s4182_s18  ;;  %s4303_s10 = sld [smem:[#allocation16 + $0x208]] }
  0xf3   : > { %v4221_v37 = vadd.f32 %v1200_v27, %v1154_v25  ;;  %v4223_v38 = vadd.f32 %v1201_v4, %v1155_v14  ;;  %v1219_v44 = vstv %s4085_s5  ;;  %v4227_v45 = vadd.f32 %v1205_v28, %v1159_v1  ;;  %s4253_s5 = sld [smem:[#allocation16 + $0x187]] }
  0xf4   : > { %v4229_v24 = vadd.f32 %v1206_v39, %v1160_v2  ;;  %v4231_v13 = vadd.f32 %v1210_v29, %v1164_v43  ;;  %v4233_v46 = vadd.f32 %v1211_v36, %v1165_v3  ;;  %v1215_v48 = vmul.f32 %v1214_v41, %v1177_v30  ;;  %s4311_s18 = sld [smem:[#allocation16 + $0x308]] }
  0xf5   : > { %v1216_v25 = vmul.f32 %v1214_v41, %v1178_v23  ;;  %v1220_v14 = vmul.f32 %v1219_v44, %v4958_v49  ;;  %v1221_v50 = vmul.f32 %v1219_v44, %v4959_v33  ;;  %v1232_v15 = vstv %s4180_s7  ;;  %s4309_s7 = sld [smem:[#allocation16 + $0x288]] }
  0xf6   : > { %v1237_v55 = vstv %s4185_s28  ;;  %v1217_v62 = vadd.f32 %v1215_v48, %v1169_v51  ;;  %v1242_v59 = vstv %s4191_s13  ;;  %v1247_v0 = vstv %s4193_s0  ;;  %s4313_s28 = sld [smem:[#allocation16 + $0x388]] }
  0xf7   : > { %v1218_v1 = vadd.f32 %v1216_v25, %v1170_v6  ;;  %v1223_v5 = vadd.f32 %v1222_v47, %v1220_v14  ;;  %v1224_v58 = vadd.f32 %v1222_v47, %v1221_v50  ;;  %v1252_v60 = vstv %s4195_s2  ;;  %s4315_s13 = sld [smem:[#allocation16 + $0x9]] }
  0xf8   : > { %v1257_v61 = vstv %s4205_s12  ;;  %v1262_v2 = vstv %s4215_s1  ;;  %v1267_v43 = vstv %s4091_s20  ;;  %v1270_v6 = vstv %s4148_s14  ;;  %s4267_s20 = sld [smem:[#allocation16 + $0x387]] }
  0xf9   : > { %v1225_v22 = vmax.f32 %v1223_v5, 0.0  ;;  %v1226_v52 = vmax.f32 %v1224_v58, 0.0  ;;  %v1268_v3 = vmul.f32 %v1267_v43, %v4958_v49  ;;  %v1269_v51 = vmul.f32 %v1267_v43, %v4959_v33  ;;  %s4289_s14 = sld [smem:[#allocation16 + $0x88]] }
  0xfa   : > { %v1275_v30 = vstv %s4219_s21  ;;  %v1280_v48 = vstv %s4245_s25  ;;  %v1295_v25 = vstv %s4257_s26  ;;  %v1300_v14 = vstv %s4263_s17  ;;  %s4317_s0 = sld [smem:[#allocation13 + $0xa]] }
  0xfb   : > { %v1228_v23 = vmul.f32 %v1227_v54, %v1225_v22  ;;  %v1229_v42 = vmul.f32 %v1227_v54, %v1226_v52  ;;  %v1233_v7 = vmul.f32 %v1232_v15, %v1225_v22  ;;  %v1234_v10 = vmul.f32 %v1232_v15, %v1226_v52  ;;  %s4319_s2 = sld [smem:[#allocation14 + $0xa]] }
  0xfc   : > { %v1238_v40 = vmul.f32 %v1237_v55, %v1225_v22  ;;  %v1239_v56 = vmul.f32 %v1237_v55, %v1226_v52  ;;  %v1243_v11 = vmul.f32 %v1242_v59, %v1225_v22  ;;  %v1244_v18 = vmul.f32 %v1242_v59, %v1226_v52  ;;  %s4321_s12 = sld [smem:[#allocation16 + $0x89]] }
  0xfd   : > { %v1230_v57 = vadd.f32 %v1228_v23, %v4197_v34  ;;  %v1231_v8 = vadd.f32 %v1229_v42, %v4199_v35  ;;  %v1235_v19 = vadd.f32 %v1233_v7, %v4201_v20  ;;  %v1236_v9 = vadd.f32 %v1234_v10, %v4203_v16  ;;  %s4325_s1 = sld [smem:[#allocation16 + $0x109]] }
  0xfe   : > { %v1240_v26 = vadd.f32 %v1238_v40, %v4207_v17  ;;  %v1241_v12 = vadd.f32 %v1239_v56, %v4209_v32  ;;  %v1245_v27 = vadd.f32 %v1243_v11, %v4211_v21  ;;  %v1246_v4 = vadd.f32 %v1244_v18, %v4213_v53  ;;  %s4331_s21 = sld [smem:[#allocation16 + $0x189]] }
  0xff   : > { %v1248_v31 = vmul.f32 %v1247_v0, %v1225_v22  ;;  %v1249_v63 = vmul.f32 %v1247_v0, %v1226_v52  ;;  %v1253_v28 = vmul.f32 %v1252_v60, %v1225_v22  ;;  %v1254_v34 = vmul.f32 %v1252_v60, %v1226_v52  ;;  %s4343_s25 = sld [smem:[#allocation16 + $0x309]] }
 0x100   : > { %v1258_v39 = vmul.f32 %v1257_v61, %v1225_v22  ;;  %v1259_v35 = vmul.f32 %v1257_v61, %v1226_v52  ;;  %v1263_v20 = vmul.f32 %v1262_v2, %v1225_v22  ;;  %v1264_v16 = vmul.f32 %v1262_v2, %v1226_v52  ;;  %s4349_s26 = sld [smem:[#allocation13 + $0xb]] }
 0x101   : > { %v1250_v17 = vadd.f32 %v1248_v31, %v4221_v37  ;;  %v1251_v32 = vadd.f32 %v1249_v63, %v4223_v38  ;;  %v1255_v21 = vadd.f32 %v1253_v28, %v4227_v45  ;;  %v1256_v53 = vadd.f32 %v1254_v34, %v4229_v24  ;;  %s4351_s17 = sld [smem:[#allocation14 + $0xb]] }
 0x102   : > { %v1260_v29 = vadd.f32 %v1258_v39, %v4231_v13  ;;  %v1261_v36 = vadd.f32 %v1259_v35, %v4233_v46  ;;  %v1265_v41 = vadd.f32 %v1263_v20, %v1217_v62  ;;  %v1266_v44 = vadd.f32 %v1264_v16, %v1218_v1 }
 0x103   : > { %v1271_v37 = vadd.f32 %v1270_v6, %v1268_v3  ;;  %v1272_v38 = vadd.f32 %v1270_v6, %v1269_v51  ;;  %v1285_v45 = vstv %s4247_s8  ;;  %v1290_v24 = vstv %s4253_s5  ;;  %s4345_s8 = sld [smem:[#allocation16 + $0x389]] }
 0x104   : > { %v1305_v13 = vstv %s4265_s29  ;;  %v1310_v47 = vstv %s4267_s20  ;;  %v1315_v54 = vstv %s4235_s3  ;;  %v1318_v62 = vstv %s4239_s30  ;;  %s4335_s3 = sld [smem:[#allocation16 + $0x209]] }
 0x105   : > { %v1273_v46 = vmax.f32 %v1271_v37, 0.0  ;;  %v1274_v50 = vmax.f32 %v1272_v38, 0.0  ;;  %v1316_v15 = vmul.f32 %v1315_v54, %v4958_v49  ;;  %v1317_v55 = vmul.f32 %v1315_v54, %v4959_v33  ;;  %s4341_s30 = sld [smem:[#allocation16 + $0x289]] }
 0x106   : > { %v1323_v1 = vstv %s4273_s9  ;;  %v1328_v39 = vstv %s4289_s14  ;;  %v1333_v35 = vstv %s4293_s15  ;;  %v1338_v20 = vstv %s4299_s4  ;;  %s4347_s5 = sld [smem:[#allocation16 + $0xa]] }
 0x107   : > { %v1276_v5 = vmul.f32 %v1275_v30, %v1273_v46  ;;  %v1277_v58 = vmul.f32 %v1275_v30, %v1274_v50  ;;  %v1281_v59 = vmul.f32 %v1280_v48, %v1273_v46  ;;  %v1282_v0 = vmul.f32 %v1280_v48, %v1274_v50  ;;  %s4353_s29 = sld [smem:[#allocation16 + $0x8a]] }
 0x108   : > { %v1286_v60 = vmul.f32 %v1285_v45, %v1273_v46  ;;  %v1287_v61 = vmul.f32 %v1285_v45, %v1274_v50  ;;  %v1291_v22 = vmul.f32 %v1290_v24, %v1273_v46  ;;  %v1292_v52 = vmul.f32 %v1290_v24, %v1274_v50  ;;  %s4357_s20 = sld [smem:[#allocation16 + $0x10a]] }
 0x109   : > { %v1278_v2 = vadd.f32 %v1276_v5, %v1230_v57  ;;  %v1279_v43 = vadd.f32 %v1277_v58, %v1231_v8  ;;  %v1283_v3 = vadd.f32 %v1281_v59, %v1235_v19  ;;  %v1284_v51 = vadd.f32 %v1282_v0, %v1236_v9  ;;  %s4363_s9 = sld [smem:[#allocation16 + $0x18a]] }
 0x10a   : > { %v1288_v6 = vadd.f32 %v1286_v60, %v1240_v26  ;;  %v1289_v23 = vadd.f32 %v1287_v61, %v1241_v12  ;;  %v1293_v42 = vadd.f32 %v1291_v22, %v1245_v27  ;;  %v1294_v30 = vadd.f32 %v1292_v52, %v1246_v4  ;;  %s4375_s14 = sld [smem:[#allocation16 + $0x30a]] }
 0x10b   : > { %v1296_v7 = vmul.f32 %v1295_v25, %v1273_v46  ;;  %v1297_v10 = vmul.f32 %v1295_v25, %v1274_v50  ;;  %v1301_v40 = vmul.f32 %v1300_v14, %v1273_v46  ;;  %v1302_v56 = vmul.f32 %v1300_v14, %v1274_v50  ;;  %s4377_s15 = sld [smem:[#allocation16 + $0x38a]] }
 0x10c   : > { %v1306_v11 = vmul.f32 %v1305_v13, %v1273_v46  ;;  %v1307_v18 = vmul.f32 %v1305_v13, %v1274_v50  ;;  %v1311_v31 = vmul.f32 %v1310_v47, %v1273_v46  ;;  %v1312_v63 = vmul.f32 %v1310_v47, %v1274_v50  ;;  %s4379_s4 = sld [smem:[#allocation16 + $0xb]] }
 0x10d   : > { %v1298_v57 = vadd.f32 %v1296_v7, %v1250_v17  ;;  %v1299_v8 = vadd.f32 %v1297_v10, %v1251_v32  ;;  %v1303_v19 = vadd.f32 %v1301_v40, %v1255_v21  ;;  %v1304_v9 = vadd.f32 %v1302_v56, %v1256_v53 }
 0x10e   : > { %v1308_v26 = vadd.f32 %v1306_v11, %v1260_v29  ;;  %v1309_v12 = vadd.f32 %v1307_v18, %v1261_v36  ;;  %v1313_v27 = vadd.f32 %v1311_v31, %v1265_v41  ;;  %v1314_v4 = vadd.f32 %v1312_v63, %v1266_v44 }
 0x10f   : > { %v1319_v28 = vadd.f32 %v1318_v62, %v1316_v15  ;;  %v1320_v34 = vadd.f32 %v1318_v62, %v1317_v55  ;;  %v1343_v16 = vstv %s4303_s10  ;;  %v1348_v17 = vstv %s4309_s7  ;;  %s4381_s10 = sld [smem:[#allocation13 + $0xc]] }
 0x110   : > { %v1353_v32 = vstv %s4311_s18  ;;  %v1358_v29 = vstv %s4313_s28  ;;  %v1363_v36 = vstv %s4279_s22  ;;  %v1366_v37 = vstv %s4285_s27  ;;  %s4367_s22 = sld [smem:[#allocation16 + $0x20a]] }
 0x111   : > { %v1321_v21 = vmax.f32 %v1319_v28, 0.0  ;;  %v1322_v53 = vmax.f32 %v1320_v34, 0.0  ;;  %v1364_v41 = vmul.f32 %v1363_v36, %v4958_v49  ;;  %v1365_v44 = vmul.f32 %v1363_v36, %v4959_v33  ;;  %s4373_s27 = sld [smem:[#allocation16 + $0x28a]] }
 0x112   : > { %v1371_v38 = vstv %s4315_s13  ;;  %v1376_v11 = vstv %s4321_s12  ;;  %v1381_v18 = vstv %s4325_s1  ;;  %v1386_v31 = vstv %s4331_s21  ;;  %s4383_s7 = sld [smem:[#allocation14 + $0xc]] }
 0x113   : > { %v1324_v48 = vmul.f32 %v1323_v1, %v1321_v21  ;;  %v1325_v45 = vmul.f32 %v1323_v1, %v1322_v53  ;;  %v1329_v24 = vmul.f32 %v1328_v39, %v1321_v21  ;;  %v1330_v25 = vmul.f32 %v1328_v39, %v1322_v53  ;;  %s4385_s18 = sld [smem:[#allocation16 + $0x8b]] }
 0x114   : > { %v1334_v14 = vmul.f32 %v1333_v35, %v1321_v21  ;;  %v1335_v13 = vmul.f32 %v1333_v35, %v1322_v53  ;;  %v1339_v46 = vmul.f32 %v1338_v20, %v1321_v21  ;;  %v1340_v50 = vmul.f32 %v1338_v20, %v1322_v53  ;;  %s4389_s28 = sld [smem:[#allocation16 + $0x10b]] }
 0x115   : > { %v1326_v47 = vadd.f32 %v1324_v48, %v1278_v2  ;;  %v1327_v54 = vadd.f32 %v1325_v45, %v1279_v43  ;;  %v1331_v15 = vadd.f32 %v1329_v24, %v1283_v3  ;;  %v1332_v55 = vadd.f32 %v1330_v25, %v1284_v51  ;;  %s4395_s13 = sld [smem:[#allocation16 + $0x18b]] }
 0x116   : > { %v1336_v62 = vadd.f32 %v1334_v14, %v1288_v6  ;;  %v1337_v5 = vadd.f32 %v1335_v13, %v1289_v23  ;;  %v1341_v58 = vadd.f32 %v1339_v46, %v1293_v42  ;;  %v1342_v1 = vadd.f32 %v1340_v50, %v1294_v30  ;;  %s4407_s12 = sld [smem:[#allocation16 + $0x30b]] }
 0x117   : > { %v1344_v59 = vmul.f32 %v1343_v16, %v1321_v21  ;;  %v1345_v0 = vmul.f32 %v1343_v16, %v1322_v53  ;;  %v1349_v60 = vmul.f32 %v1348_v17, %v1321_v21  ;;  %v1350_v61 = vmul.f32 %v1348_v17, %v1322_v53  ;;  %s4409_s1 = sld [smem:[#allocation16 + $0x38b]] }
 0x118   : > { %v1354_v22 = vmul.f32 %v1353_v32, %v1321_v21  ;;  %v1355_v52 = vmul.f32 %v1353_v32, %v1322_v53  ;;  %v1359_v7 = vmul.f32 %v1358_v29, %v1321_v21  ;;  %v1360_v10 = vmul.f32 %v1358_v29, %v1322_v53  ;;  %s4411_s21 = sld [smem:[#allocation16 + $0xc]] }
 0x119   : > { %v1346_v2 = vadd.f32 %v1344_v59, %v1298_v57  ;;  %v1347_v43 = vadd.f32 %v1345_v0, %v1299_v8  ;;  %v1351_v3 = vadd.f32 %v1349_v60, %v1303_v19  ;;  %v1352_v51 = vadd.f32 %v1350_v61, %v1304_v9 }
 0x11a   : > { %v1356_v6 = vadd.f32 %v1354_v22, %v1308_v26  ;;  %v1357_v23 = vadd.f32 %v1355_v52, %v1309_v12  ;;  %v1361_v42 = vadd.f32 %v1359_v7, %v1313_v27  ;;  %v1362_v30 = vadd.f32 %v1360_v10, %v1314_v4 }
 0x11b   : > { %v1367_v40 = vadd.f32 %v1366_v37, %v1364_v41  ;;  %v1368_v56 = vadd.f32 %v1366_v37, %v1365_v44  ;;  %v1391_v63 = vstv %s4335_s3  ;;  %v1396_v57 = vstv %s4341_s30  ;;  %s4413_s3 = sld [smem:[#allocation13 + $0xd]] }
 0x11c   : > { %v1401_v8 = vstv %s4343_s25  ;;  %v1406_v26 = vstv %s4345_s8  ;;  %v1411_v12 = vstv %s4317_s0  ;;  %v1414_v28 = vstv %s4319_s2  ;;  %s4399_s0 = sld [smem:[#allocation16 + $0x20b]] }
 0x11d   : > { %v1369_v19 = vmax.f32 %v1367_v40, 0.0  ;;  %v1370_v9 = vmax.f32 %v1368_v56, 0.0  ;;  %v1412_v27 = vmul.f32 %v1411_v12, %v4958_v49  ;;  %v1413_v4 = vmul.f32 %v1411_v12, %v4959_v33  ;;  %s4405_s2 = sld [smem:[#allocation16 + $0x28b]] }
 0x11e   : > { %v1419_v34 = vstv %s4347_s5  ;;  %v1424_v22 = vstv %s4353_s29  ;;  %v1429_v52 = vstv %s4357_s20  ;;  %v1434_v7 = vstv %s4363_s9  ;;  %s4415_s30 = sld [smem:[#allocation14 + $0xd]] }
 0x11f   : > { %v1372_v39 = vmul.f32 %v1371_v38, %v1369_v19  ;;  %v1373_v35 = vmul.f32 %v1371_v38, %v1370_v9  ;;  %v1377_v20 = vmul.f32 %v1376_v11, %v1369_v19  ;;  %v1378_v16 = vmul.f32 %v1376_v11, %v1370_v9  ;;  %s4417_s25 = sld [smem:[#allocation16 + $0x8c]] }
 0x120   : > { %v1382_v17 = vmul.f32 %v1381_v18, %v1369_v19  ;;  %v1383_v32 = vmul.f32 %v1381_v18, %v1370_v9  ;;  %v1387_v21 = vmul.f32 %v1386_v31, %v1369_v19  ;;  %v1388_v53 = vmul.f32 %v1386_v31, %v1370_v9  ;;  %s4421_s8 = sld [smem:[#allocation16 + $0x10c]] }
 0x121   : > { %v1374_v29 = vadd.f32 %v1372_v39, %v1326_v47  ;;  %v1375_v36 = vadd.f32 %v1373_v35, %v1327_v54  ;;  %v1379_v41 = vadd.f32 %v1377_v20, %v1331_v15  ;;  %v1380_v44 = vadd.f32 %v1378_v16, %v1332_v55  ;;  %s4427_s5 = sld [smem:[#allocation16 + $0x18c]] }
 0x122   : > { %v1384_v37 = vadd.f32 %v1382_v17, %v1336_v62  ;;  %v1385_v48 = vadd.f32 %v1383_v32, %v1337_v5  ;;  %v1389_v45 = vadd.f32 %v1387_v21, %v1341_v58  ;;  %v1390_v38 = vadd.f32 %v1388_v53, %v1342_v1  ;;  %s4439_s29 = sld [smem:[#allocation16 + $0x30c]] }
 0x123   : > { %v1392_v24 = vmul.f32 %v1391_v63, %v1369_v19  ;;  %v1393_v25 = vmul.f32 %v1391_v63, %v1370_v9  ;;  %v1397_v14 = vmul.f32 %v1396_v57, %v1369_v19  ;;  %v1398_v13 = vmul.f32 %v1396_v57, %v1370_v9  ;;  %s4441_s20 = sld [smem:[#allocation16 + $0x38c]] }
 0x124   : > { %v1402_v46 = vmul.f32 %v1401_v8, %v1369_v19  ;;  %v1403_v50 = vmul.f32 %v1401_v8, %v1370_v9  ;;  %v1407_v59 = vmul.f32 %v1406_v26, %v1369_v19  ;;  %v1408_v0 = vmul.f32 %v1406_v26, %v1370_v9  ;;  %s4443_s9 = sld [smem:[#allocation16 + $0xd]] }
 0x125   : > { %v1394_v47 = vadd.f32 %v1392_v24, %v1346_v2  ;;  %v1395_v54 = vadd.f32 %v1393_v25, %v1347_v43  ;;  %v1399_v15 = vadd.f32 %v1397_v14, %v1351_v3  ;;  %v1400_v55 = vadd.f32 %v1398_v13, %v1352_v51 }
 0x126   : > { %v1404_v62 = vadd.f32 %v1402_v46, %v1356_v6  ;;  %v1405_v5 = vadd.f32 %v1403_v50, %v1357_v23  ;;  %v1409_v58 = vadd.f32 %v1407_v59, %v1361_v42  ;;  %v1410_v1 = vadd.f32 %v1408_v0, %v1362_v30 }
 0x127   : > { %v1415_v60 = vadd.f32 %v1414_v28, %v1412_v27  ;;  %v1416_v61 = vadd.f32 %v1414_v28, %v1413_v4  ;;  %v1439_v10 = vstv %s4367_s22  ;;  %v1444_v2 = vstv %s4373_s27  ;;  %s4445_s22 = sld [smem:[#allocation13 + $0xe]] }
 0x128   : > { %v1449_v43 = vstv %s4375_s14  ;;  %v1454_v6 = vstv %s4377_s15  ;;  %v1459_v23 = vstv %s4349_s26  ;;  %v1462_v40 = vstv %s4351_s17  ;;  %s4431_s26 = sld [smem:[#allocation16 + $0x20c]] }
 0x129   : > { %v1417_v3 = vmax.f32 %v1415_v60, 0.0  ;;  %v1418_v51 = vmax.f32 %v1416_v61, 0.0  ;;  %v1460_v42 = vmul.f32 %v1459_v23, %v4958_v49  ;;  %v1461_v30 = vmul.f32 %v1459_v23, %v4959_v33  ;;  %s4437_s17 = sld [smem:[#allocation16 + $0x28c]] }
 0x12a   : > { %v1467_v56 = vstv %s4379_s4  ;;  %v1472_v46 = vstv %s4385_s18  ;;  %v1477_v50 = vstv %s4389_s28  ;;  %v1482_v59 = vstv %s4395_s13  ;;  %s4447_s27 = sld [smem:[#allocation14 + $0xe]] }
 0x12b   : > { %v1420_v11 = vmul.f32 %v1419_v34, %v1417_v3  ;;  %v1421_v18 = vmul.f32 %v1419_v34, %v1418_v51  ;;  %v1425_v31 = vmul.f32 %v1424_v22, %v1417_v3  ;;  %v1426_v63 = vmul.f32 %v1424_v22, %v1418_v51  ;;  %s4449_s14 = sld [smem:[#allocation16 + $0x8d]] }
 0x12c   : > { %v1430_v57 = vmul.f32 %v1429_v52, %v1417_v3  ;;  %v1431_v8 = vmul.f32 %v1429_v52, %v1418_v51  ;;  %v1435_v19 = vmul.f32 %v1434_v7, %v1417_v3  ;;  %v1436_v9 = vmul.f32 %v1434_v7, %v1418_v51  ;;  %s4453_s15 = sld [smem:[#allocation16 + $0x10d]] }
 0x12d   : > { %v1422_v26 = vadd.f32 %v1420_v11, %v1374_v29  ;;  %v1423_v12 = vadd.f32 %v1421_v18, %v1375_v36  ;;  %v1427_v27 = vadd.f32 %v1425_v31, %v1379_v41  ;;  %v1428_v4 = vadd.f32 %v1426_v63, %v1380_v44  ;;  %s4459_s4 = sld [smem:[#allocation16 + $0x18d]] }
 0x12e   : > { %v1432_v28 = vadd.f32 %v1430_v57, %v1384_v37  ;;  %v1433_v39 = vadd.f32 %v1431_v8, %v1385_v48  ;;  %v1437_v35 = vadd.f32 %v1435_v19, %v1389_v45  ;;  %v1438_v34 = vadd.f32 %v1436_v9, %v1390_v38  ;;  %s4471_s18 = sld [smem:[#allocation16 + $0x30d]] }
 0x12f   : > { %v1440_v20 = vmul.f32 %v1439_v10, %v1417_v3  ;;  %v1441_v16 = vmul.f32 %v1439_v10, %v1418_v51  ;;  %v1445_v17 = vmul.f32 %v1444_v2, %v1417_v3  ;;  %v1446_v32 = vmul.f32 %v1444_v2, %v1418_v51  ;;  %s4473_s28 = sld [smem:[#allocation16 + $0x38d]] }
 0x130   : > { %v1450_v21 = vmul.f32 %v1449_v43, %v1417_v3  ;;  %v1451_v53 = vmul.f32 %v1449_v43, %v1418_v51  ;;  %v1455_v24 = vmul.f32 %v1454_v6, %v1417_v3  ;;  %v1456_v25 = vmul.f32 %v1454_v6, %v1418_v51  ;;  %s4475_s13 = sld [smem:[#allocation16 + $0xe]] }
 0x131   : > { %v1442_v29 = vadd.f32 %v1440_v20, %v1394_v47  ;;  %v1443_v36 = vadd.f32 %v1441_v16, %v1395_v54  ;;  %v1447_v41 = vadd.f32 %v1445_v17, %v1399_v15  ;;  %v1448_v44 = vadd.f32 %v1446_v32, %v1400_v55 }
 0x132   : > { %v1452_v37 = vadd.f32 %v1450_v21, %v1404_v62  ;;  %v1453_v48 = vadd.f32 %v1451_v53, %v1405_v5  ;;  %v1457_v45 = vadd.f32 %v1455_v24, %v1409_v58  ;;  %v1458_v38 = vadd.f32 %v1456_v25, %v1410_v1 }
 0x133   : > { %v1463_v14 = vadd.f32 %v1462_v40, %v1460_v42  ;;  %v1464_v13 = vadd.f32 %v1462_v40, %v1461_v30  ;;  %v1487_v0 = vstv %s4399_s0  ;;  %v1492_v47 = vstv %s4405_s2  ;;  %s4477_s0 = sld [smem:[#allocation13 + $0xf]] }
 0x134   : > { %v1497_v54 = vstv %s4407_s12  ;;  %v1502_v62 = vstv %s4409_s1  ;;  %v1507_v5 = vstv %s4381_s10  ;;  %v1510_v60 = vstv %s4383_s7  ;;  %s4463_s10 = sld [smem:[#allocation16 + $0x20d]] }
 0x135   : > { %v1465_v15 = vmax.f32 %v1463_v14, 0.0  ;;  %v1466_v55 = vmax.f32 %v1464_v13, 0.0  ;;  %v1508_v58 = vmul.f32 %v1507_v5, %v4958_v49  ;;  %v1509_v1 = vmul.f32 %v1507_v5, %v4959_v33  ;;  %s4469_s7 = sld [smem:[#allocation16 + $0x28d]] }
 0x136   : > { %v1515_v61 = vstv %s4411_s21  ;;  %v1520_v21 = vstv %s4417_s25  ;;  %v1525_v53 = vstv %s4421_s8  ;;  %v1530_v24 = vstv %s4427_s5  ;;  %s4479_s2 = sld [smem:[#allocation14 + $0xf]] }
 0x137   : > { %v1468_v22 = vmul.f32 %v1467_v56, %v1465_v15  ;;  %v1469_v52 = vmul.f32 %v1467_v56, %v1466_v55  ;;  %v1473_v7 = vmul.f32 %v1472_v46, %v1465_v15  ;;  %v1474_v10 = vmul.f32 %v1472_v46, %v1466_v55  ;;  %s4481_s12 = sld [smem:[#allocation16 + $0x8e]] }
 0x138   : > { %v1478_v2 = vmul.f32 %v1477_v50, %v1465_v15  ;;  %v1479_v43 = vmul.f32 %v1477_v50, %v1466_v55  ;;  %v1483_v3 = vmul.f32 %v1482_v59, %v1465_v15  ;;  %v1484_v51 = vmul.f32 %v1482_v59, %v1466_v55  ;;  %s4485_s1 = sld [smem:[#allocation16 + $0x10e]] }
 0x139   : > { %v1470_v6 = vadd.f32 %v1468_v22, %v1422_v26  ;;  %v1471_v23 = vadd.f32 %v1469_v52, %v1423_v12  ;;  %v1475_v42 = vadd.f32 %v1473_v7, %v1427_v27  ;;  %v1476_v30 = vadd.f32 %v1474_v10, %v1428_v4  ;;  %s4491_s21 = sld [smem:[#allocation16 + $0x18e]] }
 0x13a   : > { %v1480_v40 = vadd.f32 %v1478_v2, %v1432_v28  ;;  %v1481_v11 = vadd.f32 %v1479_v43, %v1433_v39  ;;  %v1485_v18 = vadd.f32 %v1483_v3, %v1437_v35  ;;  %v1486_v56 = vadd.f32 %v1484_v51, %v1438_v34  ;;  %s4503_s25 = sld [smem:[#allocation16 + $0x30e]] }
 0x13b   : > { %v1488_v31 = vmul.f32 %v1487_v0, %v1465_v15  ;;  %v1489_v63 = vmul.f32 %v1487_v0, %v1466_v55  ;;  %v1493_v57 = vmul.f32 %v1492_v47, %v1465_v15  ;;  %v1494_v8 = vmul.f32 %v1492_v47, %v1466_v55  ;;  %s4505_s8 = sld [smem:[#allocation16 + $0x38e]] }
 0x13c   : > { %v1498_v19 = vmul.f32 %v1497_v54, %v1465_v15  ;;  %v1499_v9 = vmul.f32 %v1497_v54, %v1466_v55  ;;  %v1503_v20 = vmul.f32 %v1502_v62, %v1465_v15  ;;  %v1504_v16 = vmul.f32 %v1502_v62, %v1466_v55  ;;  %s4507_s5 = sld [smem:[#allocation16 + $0xf]] }
 0x13d   : > { %v1490_v26 = vadd.f32 %v1488_v31, %v1442_v29  ;;  %v1491_v12 = vadd.f32 %v1489_v63, %v1443_v36  ;;  %v1495_v27 = vadd.f32 %v1493_v57, %v1447_v41  ;;  %v1496_v4 = vadd.f32 %v1494_v8, %v1448_v44 }
 0x13e   : > { %v1500_v28 = vadd.f32 %v1498_v19, %v1452_v37  ;;  %v1501_v39 = vadd.f32 %v1499_v9, %v1453_v48  ;;  %v1505_v35 = vadd.f32 %v1503_v20, %v1457_v45  ;;  %v1506_v34 = vadd.f32 %v1504_v16, %v1458_v38 }
 0x13f   : > { %v1511_v17 = vadd.f32 %v1510_v60, %v1508_v58  ;;  %v1512_v32 = vadd.f32 %v1510_v60, %v1509_v1  ;;  %v1535_v25 = vstv %s4431_s26  ;;  %v1540_v29 = vstv %s4437_s17  ;;  %s4509_s26 = sld [smem:[#allocation16 + $0x8f]] }
 0x140   : > { %v1545_v36 = vstv %s4439_s29  ;;  %v1550_v37 = vstv %s4441_s20  ;;  %v1555_v48 = vstv %s4413_s3  ;;  %v1558_v14 = vstv %s4415_s30  ;;  %s4495_s3 = sld [smem:[#allocation16 + $0x20e]] }
 0x141   : > { %v1513_v41 = vmax.f32 %v1511_v17, 0.0  ;;  %v1514_v44 = vmax.f32 %v1512_v32, 0.0  ;;  %v1556_v45 = vmul.f32 %v1555_v48, %v4958_v49  ;;  %v1557_v38 = vmul.f32 %v1555_v48, %v4959_v33  ;;  %s4501_s30 = sld [smem:[#allocation16 + $0x28e]] }
 0x142   : > { %v1563_v13 = vstv %s4443_s9  ;;  %v1568_v19 = vstv %s4449_s14  ;;  %v1573_v9 = vstv %s4453_s15  ;;  %v1578_v20 = vstv %s4459_s4  ;;  %s4511_s17 = sld [smem:[#allocation16 + $0x10f]] }
 0x143   : > { %v1516_v46 = vmul.f32 %v1515_v61, %v1513_v41  ;;  %v1517_v50 = vmul.f32 %v1515_v61, %v1514_v44  ;;  %v1521_v59 = vmul.f32 %v1520_v21, %v1513_v41  ;;  %v1522_v0 = vmul.f32 %v1520_v21, %v1514_v44  ;;  %s4513_s29 = sld [smem:[#allocation16 + $0x18f]] }
 0x144   : > { %v1526_v47 = vmul.f32 %v1525_v53, %v1513_v41  ;;  %v1527_v54 = vmul.f32 %v1525_v53, %v1514_v44  ;;  %v1531_v15 = vmul.f32 %v1530_v24, %v1513_v41  ;;  %v1532_v55 = vmul.f32 %v1530_v24, %v1514_v44  ;;  %s4515_s20 = sld [smem:[#allocation16 + $0x20f]] }
 0x145   : > { %v1518_v62 = vadd.f32 %v1516_v46, %v1470_v6  ;;  %v1519_v5 = vadd.f32 %v1517_v50, %v1471_v23  ;;  %v1523_v58 = vadd.f32 %v1521_v59, %v1475_v42  ;;  %v1524_v1 = vadd.f32 %v1522_v0, %v1476_v30  ;;  %s4517_s9 = sld [smem:[#allocation16 + $0x28f]] }
 0x146   : > { %v1528_v60 = vadd.f32 %v1526_v47, %v1480_v40  ;;  %v1529_v22 = vadd.f32 %v1527_v54, %v1481_v11  ;;  %v1533_v52 = vadd.f32 %v1531_v15, %v1485_v18  ;;  %v1534_v61 = vadd.f32 %v1532_v55, %v1486_v56  ;;  %s4531_s14 = sld [smem:[#allocation18]] }
 0x147   : > { %v1536_v7 = vmul.f32 %v1535_v25, %v1513_v41  ;;  %v1537_v10 = vmul.f32 %v1535_v25, %v1514_v44  ;;  %v1541_v2 = vmul.f32 %v1540_v29, %v1513_v41  ;;  %v1542_v43 = vmul.f32 %v1540_v29, %v1514_v44  ;;  %s4537_s15 = sld [smem:[#allocation18 + $0x1]] }
 0x148   : > { %v1546_v3 = vmul.f32 %v1545_v36, %v1513_v41  ;;  %v1547_v51 = vmul.f32 %v1545_v36, %v1514_v44  ;;  %v1551_v31 = vmul.f32 %v1550_v37, %v1513_v41  ;;  %v1552_v63 = vmul.f32 %v1550_v37, %v1514_v44  ;;  %s4543_s4 = sld [smem:[#allocation18 + $0x2]] }
 0x149   : > { %v1538_v6 = vadd.f32 %v1536_v7, %v1490_v26  ;;  %v1539_v23 = vadd.f32 %v1537_v10, %v1491_v12  ;;  %v1543_v42 = vadd.f32 %v1541_v2, %v1495_v27  ;;  %v1544_v30 = vadd.f32 %v1542_v43, %v1496_v4 }
 0x14a   : > { %v1548_v40 = vadd.f32 %v1546_v3, %v1500_v28  ;;  %v1549_v11 = vadd.f32 %v1547_v51, %v1501_v39  ;;  %v1553_v18 = vadd.f32 %v1551_v31, %v1505_v35  ;;  %v1554_v56 = vadd.f32 %v1552_v63, %v1506_v34 }
 0x14b   : > { %v1559_v57 = vadd.f32 %v1558_v14, %v1556_v45  ;;  %v1560_v8 = vadd.f32 %v1558_v14, %v1557_v38  ;;  %v1583_v16 = vstv %s4463_s10  ;;  %v1588_v26 = vstv %s4469_s7  ;;  %s4545_s10 = sld [smem:[#allocation18 + $0x3]] }
 0x14c   : > { %v1593_v12 = vstv %s4471_s18  ;;  %v1598_v28 = vstv %s4473_s28  ;;  %v1603_v39 = vstv %s4445_s22  ;;  %v1606_v17 = vstv %s4447_s27  ;;  %s4521_s22 = sld [smem:[#allocation16 + $0x30f]] }
 0x14d   : > { %v1561_v27 = vmax.f32 %v1559_v57, 0.0  ;;  %v1562_v4 = vmax.f32 %v1560_v8, 0.0  ;;  %v1604_v35 = vmul.f32 %v1603_v39, %v4958_v49  ;;  %v1605_v34 = vmul.f32 %v1603_v39, %v4959_v33  ;;  %s4527_s27 = sld [smem:[#allocation16 + $0x38f]] }
 0x14e   : > { %v1611_v32 = vstv %s4475_s13  ;;  %v1616_v3 = vstv %s4481_s12  ;;  %v1621_v51 = vstv %s4485_s1  ;;  %v1626_v31 = vstv %s4491_s21  ;;  %s4547_s7 = sld [smem:[#allocation18 + $0x4]]  ;;  %s4961_s1 = sshll.u32 %s3622_s24, 4 }
 0x14f   : > { %v1564_v21 = vmul.f32 %v1563_v13, %v1561_v27  ;;  %v1565_v53 = vmul.f32 %v1563_v13, %v1562_v4  ;;  %v1569_v24 = vmul.f32 %v1568_v19, %v1561_v27  ;;  %v1570_v25 = vmul.f32 %v1568_v19, %v1562_v4  ;;  %s4561_s18 = sld [smem:[#allocation18 + $0x5]]  ;;  %s4580_s21 = scalar_lea.vmem [#allocation21], %s4961_s1 }
 0x150   : > { %v1574_v29 = vmul.f32 %v1573_v9, %v1561_v27  ;;  %v1575_v36 = vmul.f32 %v1573_v9, %v1562_v4  ;;  %v1579_v41 = vmul.f32 %v1578_v20, %v1561_v27  ;;  %v1580_v44 = vmul.f32 %v1578_v20, %v1562_v4  ;;  %s4563_s28 = sld [smem:[#allocation18 + $0x6]] }
 0x151   : > { %v1566_v37 = vadd.f32 %v1564_v21, %v1518_v62  ;;  %v1567_v48 = vadd.f32 %v1565_v53, %v1519_v5  ;;  %v1571_v45 = vadd.f32 %v1569_v24, %v1523_v58  ;;  %v1572_v38 = vadd.f32 %v1570_v25, %v1524_v1  ;;  %s4565_s13 = sld [smem:[#allocation18 + $0x7]] }
 0x152   : > { %v1576_v14 = vadd.f32 %v1574_v29, %v1528_v60  ;;  %v1577_v46 = vadd.f32 %v1575_v36, %v1529_v22  ;;  %v1581_v50 = vadd.f32 %v1579_v41, %v1533_v52  ;;  %v1582_v13 = vadd.f32 %v1580_v44, %v1534_v61 }
 0x153   : > { %v1584_v59 = vmul.f32 %v1583_v16, %v1561_v27  ;;  %v1585_v0 = vmul.f32 %v1583_v16, %v1562_v4  ;;  %v1589_v47 = vmul.f32 %v1588_v26, %v1561_v27  ;;  %v1590_v54 = vmul.f32 %v1588_v26, %v1562_v4 }
 0x154   : > { %v1594_v15 = vmul.f32 %v1593_v12, %v1561_v27  ;;  %v1595_v55 = vmul.f32 %v1593_v12, %v1562_v4  ;;  %v1599_v62 = vmul.f32 %v1598_v28, %v1561_v27  ;;  %v1600_v5 = vmul.f32 %v1598_v28, %v1562_v4 }
 0x155   : > { %v1586_v58 = vadd.f32 %v1584_v59, %v1538_v6  ;;  %v1587_v1 = vadd.f32 %v1585_v0, %v1539_v23  ;;  %v1591_v60 = vadd.f32 %v1589_v47, %v1543_v42  ;;  %v1592_v22 = vadd.f32 %v1590_v54, %v1544_v30 }
 0x156   : > { %v1596_v52 = vadd.f32 %v1594_v15, %v1548_v40  ;;  %v1597_v61 = vadd.f32 %v1595_v55, %v1549_v11  ;;  %v1601_v7 = vadd.f32 %v1599_v62, %v1553_v18  ;;  %v1602_v10 = vadd.f32 %v1600_v5, %v1554_v56 }
 0x157   : > { %v1607_v2 = vadd.f32 %v1606_v17, %v1604_v35  ;;  %v1608_v43 = vadd.f32 %v1606_v17, %v1605_v34  ;;  %v1631_v63 = vstv %s4495_s3  ;;  %v1636_v6 = vstv %s4501_s30  ;;  %s671_s3 = scalar_lea.vmem [#allocation23], %s3657_s16  ;;  %s678_s30 = scalar_lea.vmem [#allocation24], %s3657_s16 }
 0x158   : > { %v1641_v23 = vstv %s4503_s25  ;;  %v1646_v40 = vstv %s4505_s8  ;;  %v1651_v11 = vstv %s4477_s0  ;;  %v1654_v57 = vstv %s4479_s2  ;;  %s1765_s0 = sld [smem:[#allocation4]]  ;;  %s4960_s2 = sshll.u32 %s3608_s6, 1 }
 0x159   : > { %v1609_v42 = vmax.f32 %v1607_v2, 0.0  ;;  %v1610_v30 = vmax.f32 %v1608_v43, 0.0  ;;  %v1652_v18 = vmul.f32 %v1651_v11, %v4958_v49  ;;  %v1653_v56 = vmul.f32 %v1651_v11, %v4959_v33  ;;  %s4576_s12 = scalar_lea.vmem [#allocation20], %s4960_s2  ;;  %s685_s25 = scalar_lea.vmem [#allocation26], %s3657_s16 }
 0x15a   : > { %v1659_v8 = vstv %s4507_s5  ;;  %v1664_v47 = vstv %s4509_s26  ;;  %v1669_v54 = vstv %s4511_s17  ;;  %v1674_v15 = vstv %s4513_s29  ;;  %s4962_s8 = sld [smem:[#allocation42_spill]] }
 0x15b   : > { %v1612_v19 = vmul.f32 %v1611_v32, %v1609_v42  ;;  %v1613_v9 = vmul.f32 %v1611_v32, %v1610_v30  ;;  %v1617_v20 = vmul.f32 %v1616_v3, %v1609_v42  ;;  %v1618_v16 = vmul.f32 %v1616_v3, %v1610_v30 }
 0x15c   : > { %v1622_v26 = vmul.f32 %v1621_v51, %v1609_v42  ;;  %v1623_v12 = vmul.f32 %v1621_v51, %v1610_v30  ;;  %v1627_v27 = vmul.f32 %v1626_v31, %v1609_v42  ;;  %v1628_v4 = vmul.f32 %v1626_v31, %v1610_v30 }
 0x15d   : > { %v1614_v49 = vadd.f32 %v1612_v19, %v1566_v37  ;;  %v1615_v33 = vadd.f32 %v1613_v9, %v1567_v48  ;;  %v1619_v28 = vadd.f32 %v1617_v20, %v1571_v45  ;;  %v1620_v39 = vadd.f32 %v1618_v16, %v1572_v38 }
 0x15e   : > { %v1624_v35 = vadd.f32 %v1622_v26, %v1576_v14  ;;  %v1625_v34 = vadd.f32 %v1623_v12, %v1577_v46  ;;  %v1629_v17 = vadd.f32 %v1627_v27, %v1581_v50  ;;  %v1630_v32 = vadd.f32 %v1628_v4, %v1582_v13 }
 0x15f   : > { %v1632_v21 = vmul.f32 %v1631_v63, %v1609_v42  ;;  %v1633_v53 = vmul.f32 %v1631_v63, %v1610_v30  ;;  %v1637_v24 = vmul.f32 %v1636_v6, %v1609_v42  ;;  %v1638_v25 = vmul.f32 %v1636_v6, %v1610_v30 }
 0x160   : > { %v1642_v29 = vmul.f32 %v1641_v23, %v1609_v42  ;;  %v1643_v36 = vmul.f32 %v1641_v23, %v1610_v30  ;;  %v1647_v41 = vmul.f32 %v1646_v40, %v1609_v42  ;;  %v1648_v44 = vmul.f32 %v1646_v40, %v1610_v30  ;;  %p2651_p4 = scmp.ne.s32.totalorder %s4962_s8, 0 }
 0x161   : > { %v1634_v37 = vadd.f32 %v1632_v21, %v1586_v58  ;;  %v1635_v48 = vadd.f32 %v1633_v53, %v1587_v1  ;;  %v1639_v45 = vadd.f32 %v1637_v24, %v1591_v60  ;;  %v1640_v38 = vadd.f32 %v1638_v25, %v1592_v22 }
 0x162   : > { %v1644_v14 = vadd.f32 %v1642_v29, %v1596_v52  ;;  %v1645_v46 = vadd.f32 %v1643_v36, %v1597_v61  ;;  %v1649_v50 = vadd.f32 %v1647_v41, %v1601_v7  ;;  %v1650_v13 = vadd.f32 %v1648_v44, %v1602_v10 }
 0x163   : > { %v1655_v59 = vadd.f32 %v1654_v57, %v1652_v18  ;;  %v1656_v0 = vadd.f32 %v1654_v57, %v1653_v56  ;;  %v1679_v55 = vstv %s4515_s20  ;;  %v1684_v62 = vstv %s4517_s9 }
 0x164   : > { %v1689_v5 = vstv %s4521_s22  ;;  %v1694_v60 = vstv %s4527_s27  ;;  %v1701_v22 = vstv %s4531_s14  ;;  %v1706_v52 = vstv %s4537_s15 }
 0x165   : > { %v1657_v58 = vmax.f32 %v1655_v59, 0.0  ;;  %v1658_v1 = vmax.f32 %v1656_v0, 0.0  ;;  %v1713_v2 = vstv %s4543_s4  ;;  %v1720_v61 = vstv %s4545_s10 }
 0x166   : > { %v1727_v43 = vstv %s4547_s7 }
 0x167   : > { %v1660_v7 = vmul.f32 %v1659_v8, %v1657_v58  ;;  %v1661_v3 = vmul.f32 %v1659_v8, %v1658_v1  ;;  %v1665_v10 = vmul.f32 %v1664_v47, %v1657_v58  ;;  %v1666_v51 = vmul.f32 %v1664_v47, %v1658_v1 }
 0x168   : > { %v1670_v31 = vmul.f32 %v1669_v54, %v1657_v58  ;;  %v1671_v63 = vmul.f32 %v1669_v54, %v1658_v1  ;;  %v1675_v6 = vmul.f32 %v1674_v15, %v1657_v58  ;;  %v1676_v23 = vmul.f32 %v1674_v15, %v1658_v1 }
 0x169   : > { %v1662_v42 = vadd.f32 %v1660_v7, %v1614_v49  ;;  %v1663_v30 = vadd.f32 %v1661_v3, %v1615_v33  ;;  %v1667_v40 = vadd.f32 %v1665_v10, %v1619_v28  ;;  %v1668_v11 = vadd.f32 %v1666_v51, %v1620_v39 }
 0x16a   : > { %v1672_v18 = vadd.f32 %v1670_v31, %v1624_v35  ;;  %v1673_v56 = vadd.f32 %v1671_v63, %v1625_v34  ;;  %v1677_v57 = vadd.f32 %v1675_v6, %v1629_v17  ;;  %v1678_v19 = vadd.f32 %v1676_v23, %v1630_v32 }
 0x16b   : > { %v1680_v9 = vmul.f32 %v1679_v55, %v1657_v58  ;;  %v1681_v20 = vmul.f32 %v1679_v55, %v1658_v1  ;;  %v1685_v16 = vmul.f32 %v1684_v62, %v1657_v58  ;;  %v1686_v26 = vmul.f32 %v1684_v62, %v1658_v1 }
 0x16c   : > { %v1690_v8 = vmul.f32 %v1689_v5, %v1657_v58  ;;  %v1691_v12 = vmul.f32 %v1689_v5, %v1658_v1  ;;  %v1695_v27 = vmul.f32 %v1694_v60, %v1657_v58  ;;  %v1696_v4 = vmul.f32 %v1694_v60, %v1658_v1 }
 0x16d   : > { %v1682_v21 = vadd.f32 %v1680_v9, %v1634_v37  ;;  %v1683_v53 = vadd.f32 %v1681_v20, %v1635_v48  ;;  %v1687_v49 = vadd.f32 %v1685_v16, %v1639_v45  ;;  %v1688_v33 = vadd.f32 %v1686_v26, %v1640_v38 }
 0x16e   : > { %v1692_v28 = vadd.f32 %v1690_v8, %v1644_v14  ;;  %v1693_v39 = vadd.f32 %v1691_v12, %v1645_v46  ;;  %v1697_v35 = vadd.f32 %v1695_v27, %v1649_v50  ;;  %v1698_v34 = vadd.f32 %v1696_v4, %v1650_v13 }
 0x16f   : > { %v1699_v17 = vmax.f32 %v1662_v42, 0.0  ;;  %v1700_v32 = vmax.f32 %v1663_v30, 0.0  ;;  %v1704_v24 = vmax.f32 %v1667_v40, 0.0  ;;  %v1705_v25 = vmax.f32 %v1668_v11, 0.0 }
 0x170   : > { %v1711_v29 = vmax.f32 %v1672_v18, 0.0  ;;  %v1712_v36 = vmax.f32 %v1673_v56, 0.0  ;;  %v1718_v41 = vmax.f32 %v1677_v57, 0.0  ;;  %v1719_v44 = vmax.f32 %v1678_v19, 0.0 }
 0x171   : > { %v1702_v37 = vmul.f32 %v1701_v22, %v1699_v17  ;;  %v1703_v48 = vmul.f32 %v1701_v22, %v1700_v32  ;;  %v1707_v45 = vmul.f32 %v1706_v52, %v1704_v24  ;;  %v1708_v38 = vmul.f32 %v1706_v52, %v1705_v25 }
 0x172   : > { %v1714_v14 = vmul.f32 %v1713_v2, %v1711_v29  ;;  %v1715_v46 = vmul.f32 %v1713_v2, %v1712_v36  ;;  %v1721_v50 = vmul.f32 %v1720_v61, %v1718_v41  ;;  %v1722_v13 = vmul.f32 %v1720_v61, %v1719_v44 }
 0x173   : > { %v1709_v59 = vadd.f32 %v1707_v45, %v1702_v37  ;;  %v1710_v0 = vadd.f32 %v1708_v38, %v1703_v48  ;;  %v1725_v47 = vmax.f32 %v1682_v21, 0.0  ;;  %v1726_v54 = vmax.f32 %v1683_v53, 0.0 }
 0x174   : > { %v1732_v15 = vmax.f32 %v1687_v49, 0.0  ;;  %v1733_v55 = vmax.f32 %v1688_v33, 0.0  ;;  %v1734_v62 = vstv %s4561_s18  ;;  %v1739_v5 = vmax.f32 %v1692_v28, 0.0 }
 0x175   : > { %v1716_v58 = vadd.f32 %v1714_v14, %v1709_v59  ;;  %v1717_v1 = vadd.f32 %v1715_v46, %v1710_v0  ;;  %v1728_v60 = vmul.f32 %v1727_v43, %v1725_v47  ;;  %v1729_v22 = vmul.f32 %v1727_v43, %v1726_v54 }
 0x176   : > { %v1735_v52 = vmul.f32 %v1734_v62, %v1732_v15  ;;  %v1740_v2 = vmax.f32 %v1693_v39, 0.0  ;;  %v1741_v7 = vstv %s4563_s28  ;;  %v1736_v10 = vmul.f32 %v1734_v62, %v1733_v55 }
 0x177   : > { %v1723_v3 = vadd.f32 %v1721_v50, %v1716_v58  ;;  %v1724_v61 = vadd.f32 %v1722_v13, %v1717_v1  ;;  %v1746_v51 = vmax.f32 %v1697_v35, 0.0  ;;  %v1747_v31 = vmax.f32 %v1698_v34, 0.0 }
 0x178   : > { %v1748_v63 = vstv %s4565_s13  ;;  %v1742_v42 = vmul.f32 %v1741_v7, %v1739_v5  ;;  %v1743_v30 = vmul.f32 %v1741_v7, %v1740_v2  ;;  %v1766_v33 = vstv %s1765_s0 }
 0x179   : > { %v1730_v6 = vadd.f32 %v1728_v60, %v1723_v3  ;;  %v1731_v23 = vadd.f32 %v1729_v22, %v1724_v61  ;;  %v1749_v18 = vmul.f32 %v1748_v63, %v1746_v51  ;;  %v1750_v56 = vmul.f32 %v1748_v63, %v1747_v31 }
 0x17b   : > { %v1737_v40 = vadd.f32 %v1735_v52, %v1730_v6  ;;  %v1738_v11 = vadd.f32 %v1736_v10, %v1731_v23 }
 0x17d   : > { %v1744_v57 = vadd.f32 %v1742_v42, %v1737_v40  ;;  %v1745_v19 = vadd.f32 %v1743_v30, %v1738_v11 }
 0x17f   : > { %v1751_v43 = vadd.f32 %v1749_v18, %v1744_v57  ;;  %v1752_v9 = vadd.f32 %v1750_v56, %v1745_v19 }
 0x181   : > { %v1753_v20 = vrot.slane %v1751_v43, 4  ;;  %v1759_v16 = vrot.slane %v1752_v9, 4 }
 0x183   : > { %v1754_v26 = vmax.f32 %v1751_v43, %v1753_v20  ;;  %v1760_v8 = vmax.f32 %v1752_v9, %v1759_v16 }
 0x185   : > { %v1755_v12 = vrot.slane %v1754_v26, 2  ;;  %v1761_v27 = vrot.slane %v1760_v8, 2 }
 0x187   : > { %v1756_v4 = vmax.f32 %v1754_v26, %v1755_v12  ;;  %v1762_v21 = vmax.f32 %v1760_v8, %v1761_v27 }
 0x189   : > { %v1757_v53 = vrot.slane %v1756_v4, 1  ;;  %v1763_v49 = vrot.slane %v1762_v21, 1 }
 0x18b   : > { %v1758_v28 = vmax.f32 %v1756_v4, %v1757_v53  ;;  %v1764_v39 = vmax.f32 %v1762_v21, %v1763_v49 }
 0x18d   : > { %v1767_v35 = vadd.f32 %v1766_v33, %v1758_v28  ;;  %v1768_v34 = vadd.f32 %v1766_v33, %v1764_v39 }
 0x18f   : > { %v2649_v17 = vmul.f32 -1.442695, %v1767_v35  ;;  %v2650_v32 = vmul.f32 -1.442695, %v1768_v34 }
 0x191   : > { %2857 = vpow2.f32 %v2649_v17 }
 0x192   : > { %2859 = vpow2.f32 %v2650_v32 }
 0x197   : > { %v2858_v24 = vpop.eup %2857 }
 0x198   : > { %v2860_v25 = vpop.eup %2859  ;;  %v1775_v29 = vadd.f32 1.0, %v2858_v24 }
 0x199   : > { %v1776_v36 = vadd.f32 1.0, %v2860_v25 }
 0x19a   : > { %2861 = vrcp.f32 %v1775_v29  ;;  %vm1782_vm0 = vweird.f32 %v1775_v29  ;;  %v1788_v48 = vand.u32 2147483648, %v1775_v29  ;;  %v1786_v14 = vand.u32 2147483647, %v1775_v29 }
 0x19b   : > { %2863 = vrcp.f32 %v1776_v36  ;;  %v1803_v46 = vand.u32 2147483648, %v1776_v36  ;;  %vm1797_vm2 = vweird.f32 %v1776_v36  ;;  %v1801_v13 = vand.u32 2147483647, %v1776_v36 }
 0x19c   : > { %v1789_v0 = vor.u32 1.1754944e-38, %v1788_v48  ;;  %vm1787_vm5 = vcmp.eq.f32.partialorder %v1786_v14, 8.507059e+37 }
 0x19d   : > { %v1804_v15 = vor.u32 1.1754944e-38, %v1803_v46  ;;  %vm1802_vm7 = vcmp.eq.f32.partialorder %v1801_v13, 8.507059e+37 }
 0x1a0   : > { %v2862_v41 = vpop.eup %2861 }
 0x1a1   : > { %v2864_v44 = vpop.eup %2863  ;;  %v1778_v37 = vmul.f32 %v2862_v41, %v1775_v29  ;;  %vm1783_vm1 = vweird.f32 %v2862_v41 }
 0x1a2   : > { %v1793_v45 = vmul.f32 %v2864_v44, %v1776_v36  ;;  %vm1798_vm3 = vweird.f32 %v2864_v44  ;;  %vm1784_vm4 = vmor %vm1782_vm0, %vm1783_vm1 }
 0x1a3   : > { %v1779_v38 = vsub.f32 1.0, %v1778_v37  ;;  %vm1799_vm6 = vmor %vm1797_vm2, %vm1798_vm3 }
 0x1a4   : > { %v1794_v50 = vsub.f32 1.0, %v1793_v45 }
 0x1a5   : > { %v1780_v59 = vmul.f32 %v2862_v41, %v1779_v38 }
 0x1a6   : > { %v1795_v47 = vmul.f32 %v2864_v44, %v1794_v50 }
 0x1a7   : > { %v1781_v54 = vadd.f32 %v2862_v41, %v1780_v59  ;;  %1810 = sbr.rel (%p2651_p4) target bundleno = 432 (0x1b0), region = 92 }
 0x1a8   : > { %v1796_v55 = vadd.f32 %v2864_v44, %v1795_v47 }
 0x1a9   : > { %v1785_v62 = vsel %vm1784_vm4, %v2862_v41, %v1781_v54 }
 0x1aa   : > { %v1790_v5 = vsel %vm1787_vm5, %v1789_v0, %v1785_v62  ;;  %v1800_v58 = vsel %vm1799_vm6, %v2864_v44, %v1796_v55 }
 0x1ab   : > { %v1805_v1 = vsel %vm1802_vm7, %v1804_v15, %v1800_v58 }
 0x1ac   : > { %v1813_v60 = vlaneseq  ;;  %v3315_v22 = vmov 0.0   ;;  %v3316_v52 = vmov 1e-05  }
 0x1ad   : > { %1811 = vst [vmem:[#allocation2] sm:$0xff] %v3315_v22 }
 0x1ae   : > { %1812 = vst [vmem:[#allocation2 + $0x8] sm:$0xff] %v3315_v22  ;;  %vm1815_vm8 = vcmp.lt.s32.totalorder %v1813_v60, 256 }
 0x1af   : > { %1817 = vst.msk [vmem:[#allocation3] sm:$0x3] %vm1815_vm8, %v3316_v52 }
 0x1b0 PF: > { %v4963_v7 = vld [vmem:[#allocation56_spill] sm:$0xff]  ;;  %v4964_v10 = vld [vmem:[#allocation57_spill] sm:$0xff]  ;;  %v1829_v63 = vrot.slane %v1805_v1, 7  ;;  %vm1830_vm9 = vcmask 1040384   ;;  %v1834_v6 = vlaneseq  ;;  %s4967_s24 = sld [smem:[#allocation42_spill]] }
 0x1b1   : > { %v1820_v3 = vmul.f32 %v1790_v5, %v4963_v7  ;;  %v1821_v51 = vmul.f32 %v1805_v1, %v4964_v10 }
 0x1b2   : > { %v1831_v30 = vsel %vm1830_vm9, %v1790_v5, %v1829_v63  ;;  %vm4589_vm10 = vcmp.lt.s32.totalorder %v1834_v6, 256 }
 0x1b3   : > { %1839 = vst.msk [vmem:[%s4576_s12] sm:$0x3] %vm4589_vm10, %v1831_v30 }
 0x1b4   : > { %v1818_v2 = vld [vmem:[#allocation2] sm:$0xff] }
 0x1b5   : > { %v1819_v61 = vld [vmem:[#allocation2 + $0x8] sm:$0xff]  ;;  %v1822_v23 = vadd.f32 %v1820_v3, %v1818_v2 }
 0x1b6   : > { %v1826_v31 = vld [vmem:[#allocation3] sm:$0x3]  ;;  %v1823_v42 = vadd.f32 %v1821_v51, %v1819_v61  ;;  %p2652_p3 = scmp.ne.s32.totalorder %s4967_s24, 1 }
 0x1b7   : > { %v1833_v40 = vadd.f32 %v1831_v30, %v1826_v31  ;;  %1824 = vst [vmem:[#allocation2] sm:$0xff] %v1822_v23 }
 0x1b8   : > { %1825 = vst [vmem:[#allocation2 + $0x8] sm:$0xff] %v1823_v42  ;;  %1843 = sbr.rel (%p2652_p3) target bundleno = 543 (0x21f), region = 96 }
 0x1b9   : > { %1838 = vst.msk [vmem:[#allocation3] sm:$0x3] %vm4589_vm10, %v1833_v40 }
 0x1bd   : > { %v1959_v41 = vshrl.u32 %v1834_v6, 7  ;;  %v4605_v52 = vld [vmem:[%s3633_s11] sm:$0xff]  ;;  %v4608_v2 = vld [vmem:[%s3633_s11 + $0x8] sm:$0xff] }
 0x1be   : > { %v1844_v12 = vld [vmem:[#allocation2] sm:$0xff] }
 0x1bf   : > { %v1845_v4 = vld [vmem:[#allocation2 + $0x8] sm:$0xff] }
 0x1c0   : > { %v1846_v18 = vld [vmem:[#allocation3] sm:$0x3] }
 0x1c1   : > { %2865 = vrcp.f32 %v1846_v18  ;;  %v1858_v19 = vand.u32 2147483648, %v1846_v18  ;;  %vm1852_vm11 = vweird.f32 %v1846_v18  ;;  %v1856_v9 = vand.u32 2147483647, %v1846_v18 }
 0x1c3   : > { %v1859_v16 = vor.u32 1.1754944e-38, %v1858_v19  ;;  %vm1857_vm14 = vcmp.eq.f32.partialorder %v1856_v9, 8.507059e+37 }
 0x1c7   : > { %v2866_v56 = vpop.eup %2865 }
 0x1c8   : > { %v1848_v57 = vmul.f32 %v2866_v56, %v1846_v18  ;;  %vm1853_vm12 = vweird.f32 %v2866_v56 }
 0x1c9   : > { %vm1854_vm13 = vmor %vm1852_vm11, %vm1853_vm12 }
 0x1ca   : > { %v1849_v43 = vsub.f32 1.0, %v1848_v57 }
 0x1cc   : > { %v1850_v20 = vmul.f32 %v2866_v56, %v1849_v43 }
 0x1ce   : > { %v1851_v26 = vadd.f32 %v2866_v56, %v1850_v20 }
 0x1d0   : > { %v1855_v8 = vsel %vm1854_vm13, %v2866_v56, %v1851_v26 }
 0x1d1   : > { %v1860_v27 = vsel %vm1857_vm14, %v1859_v16, %v1855_v8 }
 0x1d2   : > { %v1862_v21 = vperm.slane %v1860_v27, 0  ;;  %v1863_v53 = vperm.slane %v1860_v27, 1 }
 0x1d4   : > { %v1866_v49 = vmul.f32 %v1862_v21, %v1844_v12  ;;  %v1867_v33 = vmul.f32 %v1863_v53, %v1845_v4 }
 0x1d6   : > { %v1870_v28 = vrot.slane %v1866_v49, 4  ;;  %v1876_v39 = vrot.slane %v1867_v33, 4 }
 0x1d8   : > { %v1871_v35 = vmax.f32 %v1866_v49, %v1870_v28  ;;  %v1877_v34 = vmax.f32 %v1867_v33, %v1876_v39 }
 0x1da   : > { %v1872_v17 = vrot.slane %v1871_v35, 2  ;;  %v1878_v32 = vrot.slane %v1877_v34, 2 }
 0x1dc   : > { %v1873_v24 = vmax.f32 %v1871_v35, %v1872_v17  ;;  %v1879_v25 = vmax.f32 %v1877_v34, %v1878_v32 }
 0x1de   : > { %v1874_v29 = vrot.slane %v1873_v24, 1  ;;  %v1880_v36 = vrot.slane %v1879_v25, 1 }
 0x1e0   : > { %v1875_v44 = vmax.f32 %v1873_v24, %v1874_v29  ;;  %v1881_v37 = vmax.f32 %v1879_v25, %v1880_v36 }
 0x1e2   : > { %v1882_v48 = vsub.f32 %v1866_v49, %v1875_v44  ;;  %vm1960_vm15 = vcmp.ge.f32.partialorder %v1866_v49, %v1875_v44  ;;  %v1883_v45 = vsub.f32 %v1867_v33, %v1881_v37  ;;  %vm1961_vm0 = vcmp.ge.f32.partialorder %v1867_v33, %v1881_v37 }
 0x1e3   : > { %v1962_v38 = vsel %vm1960_vm15, %v1959_v41, 8  ;;  %v1963_v14 = vsel %vm1961_vm0, %v1959_v41, 8 }
 0x1e4   : > { %v1884_v46 = vmul.f32 1.442695, %v1882_v48  ;;  %v1964_v50 = vrot.slane %v1962_v38, 4  ;;  %v1886_v13 = vmul.f32 1.442695, %v1883_v45  ;;  %v1973_v59 = vrot.slane %v1963_v14, 4 }
 0x1e6   : > { %2867 = vpow2.f32 %v1884_v46  ;;  %vm1965_vm1 = vcmp.lt.s32.totalorder %v1962_v38, %v1964_v50  ;;  %vm1974_vm2 = vcmp.lt.s32.totalorder %v1963_v14, %v1973_v59 }
 0x1e7   : > { %v1966_v0 = vsel %vm1965_vm1, %v1962_v38, %v1964_v50  ;;  %2869 = vpow2.f32 %v1886_v13  ;;  %v1975_v47 = vsel %vm1974_vm2, %v1963_v14, %v1973_v59 }
 0x1e8   : > { %v1967_v54 = vrot.slane %v1966_v0, 2  ;;  %v1976_v15 = vrot.slane %v1975_v47, 2 }
 0x1ea   : > { %vm1968_vm3 = vcmp.lt.s32.totalorder %v1966_v0, %v1967_v54  ;;  %vm1977_vm4 = vcmp.lt.s32.totalorder %v1975_v47, %v1976_v15 }
 0x1eb   : > { %v1969_v55 = vsel %vm1968_vm3, %v1966_v0, %v1967_v54  ;;  %v1978_v62 = vsel %vm1977_vm4, %v1975_v47, %v1976_v15 }
 0x1ec   : > { %v4599_v5 = vpop.eup %2867  ;;  %v1970_v58 = vrot.slane %v1969_v55, 1  ;;  %v1979_v1 = vrot.slane %v1978_v62, 1 }
 0x1ed   : > { %v4601_v60 = vpop.eup %2869  ;;  %v1888_v22 = vrot.slane %v4599_v5, 4 }
 0x1ee   : > { %vm1971_vm5 = vcmp.lt.s32.totalorder %v1969_v55, %v1970_v58  ;;  %v1894_v7 = vrot.slane %v4601_v60, 4  ;;  %vm1980_vm6 = vcmp.lt.s32.totalorder %v1978_v62, %v1979_v1 }
 0x1ef   : > { %v1889_v3 = vadd.f32 %v4599_v5, %v1888_v22  ;;  %v1972_v61 = vsel %vm1971_vm5, %v1969_v55, %v1970_v58  ;;  %v1981_v10 = vsel %vm1980_vm6, %v1978_v62, %v1979_v1 }
 0x1f0   : > { %vm1982_vm7 = vcmp.eq.s32.totalorder %v1959_v41, %v1972_v61  ;;  %v1895_v51 = vadd.f32 %v4601_v60, %v1894_v7  ;;  %vm1983_vm8 = vcmp.eq.s32.totalorder %v1959_v41, %v1981_v10 }
 0x1f1   : > { %v1890_v31 = vrot.slane %v1889_v3, 2  ;;  %v1984_v63 = vsel %vm1982_vm7, %v4605_v52, 0.0  ;;  %v1985_v6 = vsel %vm1983_vm8, %v4608_v2, 0.0 }
 0x1f2   : > { %v1986_v23 = vrot.slane %v1984_v63, 4  ;;  %v1896_v42 = vrot.slane %v1895_v51, 2  ;;  %v1992_v30 = vrot.slane %v1985_v6, 4 }
 0x1f3   : > { %v1891_v40 = vadd.f32 %v1890_v31, %v1889_v3 }
 0x1f4   : > { %v1897_v18 = vadd.f32 %v1896_v42, %v1895_v51  ;;  %v1987_v56 = vadd.f32 %v1986_v23, %v1984_v63  ;;  %v1993_v57 = vadd.f32 %v1992_v30, %v1985_v6 }
 0x1f5   : > { %v1892_v19 = vrot.slane %v1891_v40, 1 }
 0x1f6   : > { %v1898_v43 = vrot.slane %v1897_v18, 1  ;;  %v1988_v9 = vrot.slane %v1987_v56, 2  ;;  %v1994_v20 = vrot.slane %v1993_v57, 2 }
 0x1f7   : > { %v1893_v16 = vadd.f32 %v1892_v19, %v1891_v40 }
 0x1f8   : > { %v1899_v26 = vadd.f32 %v1898_v43, %v1897_v18  ;;  %v1989_v8 = vadd.f32 %v1988_v9, %v1987_v56  ;;  %v1995_v12 = vadd.f32 %v1994_v20, %v1993_v57 }
 0x1f9   : > { %2871 = vrcp.f32 %v1893_v16  ;;  %vm1905_vm11 = vweird.f32 %v1893_v16  ;;  %v1911_v35 = vand.u32 2147483648, %v1893_v16  ;;  %v1909_v24 = vand.u32 2147483647, %v1893_v16 }
 0x1fa   : > { %2873 = vrcp.f32 %v1899_v26  ;;  %v1990_v27 = vrot.slane %v1989_v8, 1  ;;  %v1996_v4 = vrot.slane %v1995_v12, 1  ;;  %v1925_v25 = vand.u32 2147483648, %v1899_v26 }
 0x1fb   : > { %vm1919_vm13 = vweird.f32 %v1899_v26  ;;  %v1923_v36 = vand.u32 2147483647, %v1899_v26  ;;  %v1912_v44 = vor.u32 1.1754944e-38, %v1911_v35  ;;  %vm1910_vm0 = vcmp.eq.f32.partialorder %v1909_v24, 8.507059e+37 }
 0x1fc   : > { %v1991_v21 = vadd.f32 %v1990_v27, %v1989_v8  ;;  %v1997_v53 = vadd.f32 %v1996_v4, %v1995_v12  ;;  %v1926_v45 = vor.u32 1.1754944e-38, %v1925_v25 }
 0x1fd   : > { %vm1924_vm2 = vcmp.eq.f32.partialorder %v1923_v36, 8.507059e+37 }
 0x1fe   : > { %v2000_v33 = vrot.slane %v1997_v53, 7 }
 0x1ff   : > { %v2872_v49 = vpop.eup %2871 }
 0x200   : > { %v2874_v28 = vpop.eup %2873  ;;  %v1901_v39 = vmul.f32 %v2872_v49, %v1893_v16  ;;  %v2001_v17 = vsel %vm1830_vm9, %v1991_v21, %v2000_v33  ;;  %vm1906_vm12 = vweird.f32 %v2872_v49 }
 0x201   : > { %v1915_v34 = vmul.f32 %v2874_v28, %v1899_v26  ;;  %2003 = vst.msk [vmem:[%s678_s30] sm:$0x3] %vm4589_vm10, %v2001_v17  ;;  %vm1920_vm14 = vweird.f32 %v2874_v28  ;;  %vm1907_vm15 = vmor %vm1905_vm11, %vm1906_vm12 }
 0x202   : > { %v1902_v32 = vsub.f32 1.0, %v1901_v39  ;;  %vm1921_vm1 = vmor %vm1919_vm13, %vm1920_vm14 }
 0x203   : > { %v1916_v29 = vsub.f32 1.0, %v1915_v34 }
 0x204   : > { %v1903_v41 = vmul.f32 %v2872_v49, %v1902_v32 }
 0x205   : > { %v1917_v37 = vmul.f32 %v2874_v28, %v1916_v29 }
 0x206   : > { %v1904_v48 = vadd.f32 %v2872_v49, %v1903_v41 }
 0x207   : > { %v1918_v38 = vadd.f32 %v2874_v28, %v1917_v37 }
 0x208   : > { %v1908_v14 = vsel %vm1907_vm15, %v2872_v49, %v1904_v48 }
 0x209   : > { %v1913_v46 = vsel %vm1910_vm0, %v1912_v44, %v1908_v14  ;;  %v1922_v50 = vsel %vm1921_vm1, %v2874_v28, %v1918_v38 }
 0x20a   : > { %v1928_v13 = vmul.f32 %v4599_v5, %v1913_v46  ;;  %v1927_v59 = vsel %vm1924_vm2, %v1926_v45, %v1922_v50 }
 0x20b   : > { %v1929_v0 = vmul.f32 %v4601_v60, %v1927_v59  ;;  %v1954_v47 = vrot.slane %v1927_v59, 7 }
 0x20c   : > { %1930 = vst [vmem:[%s4580_s21] sm:$0xff] %v1928_v13  ;;  %v1932_v54 = vmul.f32 %v1928_v13, %v4605_v52 }
 0x20d   : > { %1931 = vst [vmem:[%s4580_s21 + $0x8] sm:$0xff] %v1929_v0  ;;  %v1933_v15 = vmul.f32 %v1929_v0, %v4608_v2  ;;  %v1955_v55 = vsel %vm1830_vm9, %v1913_v46, %v1954_v47 }
 0x20e   : > { %v1934_v62 = vrot.slane %v1932_v54, 4  ;;  %1957 = vst.msk [vmem:[%s685_s25] sm:$0x3] %vm4589_vm10, %v1955_v55 }
 0x20f   : > { %v1940_v58 = vrot.slane %v1933_v15, 4 }
 0x210   : > { %v1935_v5 = vadd.f32 %v1934_v62, %v1932_v54 }
 0x211   : > { %v1941_v1 = vadd.f32 %v1940_v58, %v1933_v15 }
 0x212   : > { %v1936_v22 = vrot.slane %v1935_v5, 2 }
 0x213   : > { %v1942_v60 = vrot.slane %v1941_v1, 2 }
 0x214   : > { %v1937_v7 = vadd.f32 %v1936_v22, %v1935_v5 }
 0x215   : > { %v1943_v3 = vadd.f32 %v1942_v60, %v1941_v1 }
 0x216   : > { %v1938_v61 = vrot.slane %v1937_v7, 1 }
 0x217   : > { %v1944_v52 = vrot.slane %v1943_v3, 1 }
 0x218   : > { %v1939_v10 = vadd.f32 %v1938_v61, %v1937_v7 }
 0x219   : > { %v1945_v51 = vadd.f32 %v1944_v52, %v1943_v3 }
 0x21b   : > { %v1948_v2 = vrot.slane %v1945_v51, 7 }
 0x21d   : > { %v1949_v31 = vsel %vm1830_vm9, %v1939_v10, %v1948_v2 }
 0x21e   : > { %1951 = vst.msk [vmem:[%s671_s3] sm:$0x3] %vm4589_vm10, %v1949_v31 }
 0x21f PF: > { %s4968_s11 = sld [smem:[#allocation43_spill]]  ;;  %s2058_s22 = sshll.u32 %s4580_s21, 4  ;;  %s2059_s22 = int_to_ptr.vmem [resolvable:$true] %s2058_s22 }
 0x220   : > { %s4970_s20 = sld [smem:[#allocation86_spill]]  ;;  %s4830_s14 = scalar_lea.sflag [#allocation22], %s3619_s23 }
 0x225   : > { %s2669_s26 = sshll.u32 %s4968_s11, 4 }
 0x226   : > { %s2056_s9 = scalar_lea.hbm %s4970_s20, %s2669_s26  ;;  %s3060_s18 = scalar_lea.hbm %s4970_s20, 32 }
 0x227   : > { %s2060_s27 = sshll.u32 %s2056_s9, 4  ;;  %s2061_s27 = int_to_ptr.hbm [resolvable:$true] %s2060_s27 }
 0x228   : > { %s3054_s15 = sshra.s32 %s2061_s27, 4  ;;  %s3055_s15 = int_to_ptr.hbm [resolvable:$true] %s3054_s15 }
 0x229   : > { %s3056_s4 = scalar_lea.hbm %s3055_s15, 16  ;;  %p3061_p10 = scmp.lt.s32.totalorder %s3055_s15, %s4970_s20 }
 0x22a   : > { %p3057_p6 = scmp.ne.s32.totalorder %s3055_s15, %s3056_s4  ;;  %p3062_p12 = scmp.lt.s32.totalorder %s3060_s18, %s3056_s4 }
 0x22c   : > { %p3058_p8 = pnand %p3057_p6, %p3514_p11  ;;  %p3063_p13 = por %p3062_p12, %p3061_p10 }
 0x22e   : > { %p3059_p9 = pneg %p3058_p8 }
 0x230   : > { %p3064_p0 = pnand %p3063_p13, %p3059_p9 }
 0x232   : > { %3067 = shalt.err (!%p3064_p0)
}
 0x233   : > { %s4971_s0 = sld [smem:[#allocation42_spill]]  ;;  %s4655_s2 = sshll.u32 %s4968_s11, 1 }
 0x234   : > { %2697 = dma.vmem_to_hbm [thread:$0]  (%p3514_p11), %s2059_s22, 256, %s2061_s27, %s4830_s14  }
 0x235   : > { %s2090_s1 = sshll.u32 %s678_s30, 4  ;;  %s4972_s24 = sld [smem:[#allocation88_spill]]  ;;  %s2091_s1 = int_to_ptr.vmem [resolvable:$true] %s2090_s1 }
 0x236   : > { %s2020_s9 = scalar_lea.sflag [#allocation25], %s3619_s23 }
 0x239   : > { %s2658_s29 = sshll.u32 %s4971_s0, 1 }
 0x23b   : > { %s2088_s26 = scalar_lea.hbm %s4972_s24, %s4655_s2  ;;  %s3088_s30 = scalar_lea.hbm %s4972_s24, 4 }
 0x23c   : > { %s2092_s17 = sshll.u32 %s2088_s26, 4  ;;  %s2093_s17 = int_to_ptr.hbm [resolvable:$true] %s2092_s17 }
 0x23d   : > { %s3082_s15 = sshra.s32 %s2093_s17, 4  ;;  %s3083_s15 = int_to_ptr.hbm [resolvable:$true] %s3082_s15 }
 0x23e   : > { %s3084_s4 = scalar_lea.hbm %s3083_s15, 2  ;;  %p3089_p6 = scmp.lt.s32.totalorder %s3083_s15, %s4972_s24 }
 0x23f   : > { %p3085_p2 = scmp.ne.s32.totalorder %s3083_s15, %s3084_s4  ;;  %p3090_p8 = scmp.lt.s32.totalorder %s3088_s30, %s3084_s4 }
 0x241   : > { %p3086_p4 = pnand %p3085_p2, %p3514_p11  ;;  %p3091_p9 = por %p3090_p8, %p3089_p6 }
 0x243   : > { %p3087_p3 = pneg %p3086_p4 }
 0x245   : > { %p3092_p10 = pnand %p3091_p9, %p3087_p3 }
 0x247   : > { %3095 = shalt.err (!%p3092_p10)
}
 0x248   : > { %2699 = dma.vmem_to_hbm [thread:$0]  (%p3514_p11), %s2091_s1, 32, %s2093_s17, %s2020_s9  }
 0x249   : > { %s2659_s28 = sshll.u32 %s4968_s11, 2  ;;  %s2041_s13 = sshll.u32 %s4576_s12, 4  ;;  %s2042_s13 = int_to_ptr.vmem [resolvable:$true] %s2041_s13 }
 0x24a   : > { %s2038_s0 = sadd.s32 %s2659_s28, %s2658_s29  ;;  %s4974_s26 = sld [smem:[#allocation85_spill]] }
 0x24b   : > { %s4975_s27 = sld [smem:[#allocation87_spill]]  ;;  %s4688_s14 = sshll.u32 %s671_s3, 4  ;;  %s2075_s14 = int_to_ptr.vmem [resolvable:$true] %s4688_s14 }
 0x24c   : > { %s2005_s1 = scalar_lea.sflag [#allocation7], %s3608_s6 }
 0x250   : > { %s2039_s15 = scalar_lea.hbm %s4974_s26, %s2038_s0  ;;  %s3116_s28 = scalar_lea.hbm %s4974_s26, 8 }
 0x251   : > { %s4976_s10 = smov %s4975_s27  ;;  %s2072_s30 = scalar_lea.hbm %s4975_s27, %s4655_s2 }
 0x252   : > { %s2043_s7 = sshll.u32 %s2039_s15, 4  ;;  %s2044_s7 = int_to_ptr.hbm [resolvable:$true] %s2043_s7 }
 0x253   : > { %s3110_s11 = sshra.s32 %s2044_s7, 4  ;;  %s3111_s11 = int_to_ptr.hbm [resolvable:$true] %s3110_s11 }
 0x254   : > { %s3112_s12 = scalar_lea.hbm %s3111_s11, 2  ;;  %p3117_p2 = scmp.lt.s32.totalorder %s3111_s11, %s4974_s26 }
 0x255   : > { %p3113_p12 = scmp.ne.s32.totalorder %s3111_s11, %s3112_s12  ;;  %p3118_p4 = scmp.lt.s32.totalorder %s3116_s28, %s3112_s12 }
 0x257   : > { %p3114_p13 = pnand %p3113_p12, %p3506_p5  ;;  %p3119_p3 = por %p3118_p4, %p3117_p2 }
 0x259   : > { %p3115_p0 = pneg %p3114_p13 }
 0x25b   : > { %p3120_p6 = pnand %p3119_p3, %p3115_p0 }
 0x25d   : > { %3123 = shalt.err (!%p3120_p6)
}
 0x25e   : > { %2696 = dma.vmem_to_hbm [thread:$0]  (%p3506_p5), %s2042_s13, 32, %s2044_s7, %s2005_s1  }
 0x25f   : > { %s2076_s6 = sshll.u32 %s2072_s30, 4  ;;  %s4977_s15 = sld [smem:[#allocation89_spill]]  ;;  %s2077_s6 = int_to_ptr.hbm [resolvable:$true] %s2076_s6 }
 0x260   : > { %s4708_s27 = sshll.u32 %s685_s25, 4  ;;  %s3138_s11 = sshra.s32 %s2077_s6, 4  ;;  %s3139_s11 = int_to_ptr.hbm [resolvable:$true] %s3138_s11  ;;  %s2107_s27 = int_to_ptr.vmem [resolvable:$true] %s4708_s27 }
 0x261   : > { %s3140_s12 = scalar_lea.hbm %s3139_s11, 2  ;;  %s3144_s13 = scalar_lea.hbm %s4976_s10, 4 }
 0x262   : > { %p3141_p8 = scmp.ne.s32.totalorder %s3139_s11, %s3140_s12  ;;  %p3145_p5 = scmp.lt.s32.totalorder %s3139_s11, %s4976_s10 }
 0x263   : > { %p3146_p12 = scmp.lt.s32.totalorder %s3144_s13, %s3140_s12 }
 0x264   : > { %p3142_p9 = pnand %p3141_p8, %p3514_p11 }
 0x265   : > { %s4978_s4 = smov %s4977_s15  ;;  %s2104_s22 = scalar_lea.hbm %s4977_s15, %s4655_s2 }
 0x266   : > { %p3143_p10 = pneg %p3142_p9  ;;  %p3147_p13 = por %p3146_p12, %p3145_p5 }
 0x268   : > { %p3148_p0 = pnand %p3147_p13, %p3143_p10 }
 0x26a   : > { %3151 = shalt.err (!%p3148_p0)
}
 0x26b   : > { %s4979_s16 = scalar_lea.sflag [#allocation22], %s3619_s23  ;;  %s2108_s25 = sshll.u32 %s2104_s22, 4  ;;  %s2109_s25 = int_to_ptr.hbm [resolvable:$true] %s2108_s25 }
 0x26c   : > { %2698 = dma.vmem_to_hbm [thread:$0]  (%p3514_p11), %s2075_s14, 32, %s2077_s6, %s4979_s16  }
 0x26d   : > { %s3166_s2 = sshra.s32 %s2109_s25, 4  ;;  %s3172_s0 = scalar_lea.hbm %s4978_s4, 4  ;;  %s3167_s2 = int_to_ptr.hbm [resolvable:$true] %s3166_s2 }
 0x26e   : > { %s3168_s1 = scalar_lea.hbm %s3167_s2, 2  ;;  %p3173_p6 = scmp.lt.s32.totalorder %s3167_s2, %s4978_s4 }
 0x26f   : > { %p3169_p2 = scmp.ne.s32.totalorder %s3167_s2, %s3168_s1  ;;  %p3174_p8 = scmp.lt.s32.totalorder %s3172_s0, %s3168_s1 }
 0x271   : > { %p3170_p4 = pnand %p3169_p2, %p3514_p11  ;;  %p3175_p9 = por %p3174_p8, %p3173_p6 }
 0x273   : > { %p3171_p3 = pneg %p3170_p4 }
 0x275   : > { %p3176_p10 = pnand %p3175_p9, %p3171_p3 }
 0x277   : > { %3179 = shalt.err (!%p3176_p10)
}
 0x278   : > { %2700 = dma.vmem_to_hbm [thread:$0]  (%p3514_p11), %s2107_s27, 32, %s2109_s25, %s2020_s9  }
 0x279 PF: > { %s4980_s14 = sld [smem:[#allocation39_spill]]  ;;  %p2759_p5 = scmp.ge.s32.totalorder %s3306_s19, 2 }
 0x27b   : > { %p2733_p12 = pnand %p2759_p5, %p3510_p7 }
 0x27d   : > { %p2734_p13 = pneg %p2733_p12 }
 0x27f   : > { %s2120_s8 = sand.u32 1, %s4980_s14  }
 0x280   : > { %s2121_s15 = scalar_lea.sflag [#allocation7], %s2120_s8 }
 0x281   : > { %3253 = dma.done.wait (%p2734_p13), %s2121_s15, 32  }
 0x282   : > { %3255 = vsyncadd (%p2734_p13), %s2121_s15, 4294967264  ;;  %s4982_s22 = sadd.s32 4294967294, %s3306_s19   ;;  %p2736_p0 = pnand %p2759_p5, %p3518_p1 }
 0x283   : > { %s2130_s12 = sand.u32 1, %s4982_s22  }
 0x284   : > { %p2737_p2 = pneg %p2736_p0  ;;  %s2131_s23 = scalar_lea.sflag [#allocation22], %s2130_s12 }
 0x286   : > { %3257 = dma.done.wait (%p2737_p2), %s2131_s23, 288  }
 0x287   : > { %3259 = vsyncadd (%p2737_p2), %s2131_s23, 4294967008  ;;  %s2151_s5 = scalar_lea.sflag [#allocation25], %s2130_s12 }
 0x288   : > { %3261 = dma.done.wait (%p2737_p2), %s2151_s5, 64  }
 0x289   : > { %3263 = vsyncadd (%p2737_p2), %s2151_s5, 4294967232  ;;  %s44_s19 = sadd.s32 1, %s3306_s19   ;;  %s4984_s27 = sld [smem:[#allocation37_spill]] }
 0x28a   : > { %p41_p11 = scmp.ge.s32.totalorder %s44_s19, 6   ;;  %s4985_s28 = sld [smem:[#allocation38_spill]] }
 0x28b   : > { %s4986_s29 = sld [smem:[#allocation54_spill]] }
 0x28c   : > { %s4987_s8 = sld [smem:[#allocation40_spill]] }
 0x28d   : > { %s4988_s30 = sld [smem:[#allocation41_spill]] }
 0x28e   : > { %s4989_s14 = sld [smem:[#allocation55_spill]]  ;;  %43 = sbr.rel (!%p41_p11) target bundleno = 34 (0x22), region = 222 }
 0x28f   : > { %s4990_s15 = sld [smem:[#allocation44_spill]] }
 0x290   : > { %s4991_s16 = sld [smem:[#allocation45_spill]] }
 0x291   : > { %s4992_s17 = sld [smem:[#allocation52_spill]] }
 0x292   : > { %s4993_s18 = sld [smem:[#allocation53_spill]] }
 0x293   :  { %2167 = vsyncpa [#allocation6], 1 }
 0x294   :  { %2169 = vsyncpa [#allocation6 + $0x1], 1 }
 0x295   :  { %2170 = vsyncpa [#allocation11], 1 }
 0x296   :  { %2172 = vsyncpa [#allocation11 + $0x1], 1 }
 0x297   :  { %2173 = vsyncpa [#allocation7], 1 }
 0x298   :  { %2175 = vsyncpa [#allocation7 + $0x1], 1 }
 0x299   :  { %2176 = vsyncpa [#allocation22], 1 }
 0x29a   :  { %2178 = vsyncpa [#allocation22 + $0x1], 1 }
 0x29b   :  { %2179 = vsyncpa [#allocation25], 1 }
 0x29c   :  { %2181 = vsyncpa [#allocation25 + $0x1], 1 }
 0x29d   :  { %2182 = vsyncpa [#allocation8], 1 }
 0x29e   :  { %2184 = vsyncpa [#allocation8 + $0x1], 1 }
 0x29f   :  { %2185 = vsyncpa [#allocation9], 1 }
 0x2a0   :  { %2187 = vsyncpa [#allocation9 + $0x1], 1 }
 0x2a1   :  { %2188 = vsyncpa [#allocation15], 1 }
 0x2a2   :  { %2189 = vsyncpa [#allocation19], 1 }

</bundles_post_ra>
